<compile_context>
chip_gen: v6e
topology: v6e:2x2x1
jax: 0.10.0
libtpu: 0.0.40
codegen_flags: <defaults>
</compile_context>

<pallas_src>
import functools

import jax
import jax.numpy as jnp
from jax.experimental import pallas as pl
from jax.experimental.pallas import tpu as pltpu


def _round_up(a, m):
    return ((a + m - 1) // m) * m


def _make_kernel(num_layers, hidden_size, seq_len, batch_block, output_size):
    H, L, T, Bt = hidden_size, num_layers, seq_len, batch_block

    def kernel(x_ref, *refs):
        # refs layout: [w_ih_l, w_hh_l, b_l] for l = 0..L-1, then w_fc, b_fc, out.
        w_refs = refs[:3 * L]
        w_fc_ref = refs[3 * L]
        b_fc_ref = refs[3 * L + 1]
        out_ref = refs[3 * L + 2]

        x = x_ref[0]                                     # (T*Bt, I), time-major
        w_ih0, w_hh0, b0 = w_refs[0], w_refs[1], w_refs[2]

        # Layer-0 input projection hoisted off the serial recurrence:
        # one (T*Bt, I) x (I, 4H) matmul, bias folded in.
        xproj = (jnp.dot(x, w_ih0[...],
                         preferred_element_type=jnp.float32) + b0[...])

        hs = [jnp.zeros((Bt, H), jnp.float32) for _ in range(L)]
        cs = [jnp.zeros((Bt, H), jnp.float32) for _ in range(L)]

        def gate_update(gates, c_prev):
            # Gate columns were permuted offline to (i, f, o, g): sigmoid over
            # the first 3H lanes, tanh over the last H lanes only.
            sig = jax.nn.sigmoid(gates[:, :3 * H])
            g = jnp.tanh(gates[:, 3 * H:])
            i = sig[:, 0 * H:1 * H]
            f = sig[:, 1 * H:2 * H]
            o = sig[:, 2 * H:3 * H]
            c = f * c_prev + i * g
            h = o * jnp.tanh(c)
            return h, c

        # T is a small compile-time constant -> static unroll gives the LLO
        # scheduler cross-timestep visibility (recurrent dots can issue early).
        for t in range(T):
            gates0 = (xproj[t * Bt:(t + 1) * Bt, :]
                      + jnp.dot(hs[0], w_hh0[...],
                                preferred_element_type=jnp.float32))
            hs[0], cs[0] = gate_update(gates0, cs[0])
            inp = hs[0]
            for l in range(1, L):
                w_ih = w_refs[3 * l]
                w_hh = w_refs[3 * l + 1]
                b = w_refs[3 * l + 2]
                # Two accumulating dots; no concat on the critical path.  The
                # recurrent dot only needs h_l^{t-1} and can overlap layer l-1.
                gates = (jnp.dot(inp, w_ih[...],
                                 preferred_element_type=jnp.float32)
                         + jnp.dot(hs[l], w_hh[...],
                                   preferred_element_type=jnp.float32)
                         + b[...])
                hs[l], cs[l] = gate_update(gates, cs[l])
                inp = hs[l]

        h_last = hs[-1]                                  # (Bt, H)
        if output_size == 1:
            # N=1 final projection as VPU multiply + lane reduce (no MXU pass).
            out = (jnp.sum(h_last * w_fc_ref[...], axis=-1, keepdims=True)
                   + b_fc_ref[...])
        else:
            out = (jnp.dot(h_last, w_fc_ref[...],
                           preferred_element_type=jnp.float32) + b_fc_ref[...])
        out_ref[...] = out.astype(out_ref.dtype)

    return kernel


def _permute_gate_cols(w, H):
    """Permute last-dim gate columns from PyTorch (i,f,g,o) to (i,f,o,g)."""
    return jnp.concatenate(
        [w[..., :2 * H], w[..., 3 * H:4 * H], w[..., 2 * H:3 * H]], axis=-1)


def stock_lstm_pallas(x, params, *, num_layers, hidden_size, output_size,
                      batch_block=None):
    """x: (B, T, I) f32, batch_first. params: transposed weights (see init)."""
    B, T, I = x.shape
    H = hidden_size

    # Adaptive batch block: fill MXU rows for large B, keep tiny B cheap.
    if batch_block is None:
        batch_block = min(128, _round_up(B, 8))
    tb = batch_block
    B_pad = _round_up(B, tb)
    if B_pad != B:
        x = jnp.pad(x, ((0, B_pad - B), (0, 0), (0, 0)))
    nb = B_pad // tb

    # (nb, tb, T, I) -> (nb, T, tb, I) -> (nb, T*tb, I): time-major within each
    # batch block so per-step slices of the hoisted projection are aligned
    # full-sublane blocks.  Pure XLA layout plumbing, outside the kernel.
    xb = x.reshape(nb, tb, T, I).transpose(0, 2, 1, 3).reshape(nb, T * tb, I)

    inputs = [xb]
    for l in range(num_layers):
        inputs.append(_permute_gate_cols(params[f"w_ih_{l}"], H))  # (in, 4H)
        inputs.append(_permute_gate_cols(params[f"w_hh_{l}"], H))  # (H, 4H)
        inputs.append(_permute_gate_cols(params[f"b_{l}"], H))     # (1, 4H)
    if output_size == 1:
        inputs.append(params["w_fc"].T)                            # (1, H)
    else:
        inputs.append(params["w_fc"])                              # (H, O)
    inputs.append(params["b_fc"])                                  # (1, O)

    def _bcast_spec(arr):
        nd = arr.ndim
        return pl.BlockSpec(arr.shape, lambda b, _nd=nd: (0,) * _nd)

    in_specs = [pl.BlockSpec((1, T * tb, I), lambda b: (b, 0, 0))]
    in_specs += [_bcast_spec(a) for a in inputs[1:]]
    out_specs = pl.BlockSpec((tb, output_size), lambda b: (b, 0))

    kernel = _make_kernel(num_layers, H, T, tb, output_size)
    out = pl.pallas_call(
        kernel,
        grid=(nb,),
        in_specs=in_specs,
        out_specs=out_specs,
        out_shape=jax.ShapeDtypeStruct((B_pad, output_size), jnp.float32),
        compiler_params=pltpu.CompilerParams(
            dimension_semantics=("parallel",)),
    )(*inputs)
    return out[:B]


def init_params(key, *, input_size, hidden_size, num_layers, output_size):
    """Deterministic init mimicking PyTorch's U(-1/sqrt(H), 1/sqrt(H)).

    Gate column order is PyTorch's (i, f, g, o); the kernel wrapper permutes.
    """
    H = hidden_size
    scale = 1.0 / jnp.sqrt(jnp.float32(H))
    params = {}
    for l in range(num_layers):
        in_dim = input_size if l == 0 else H
        key, k1, k2, k3, k4 = jax.random.split(key, 5)
        # Stored transposed: (in_dim, 4H) and (H, 4H).
        params[f"w_ih_{l}"] = jax.random.uniform(k1, (in_dim, 4 * H),
                                                 jnp.float32, -scale, scale)
        params[f"w_hh_{l}"] = jax.random.uniform(k2, (H, 4 * H),
                                                 jnp.float32, -scale, scale)
        b_ih = jax.random.uniform(k3, (1, 4 * H), jnp.float32, -scale, scale)
        b_hh = jax.random.uniform(k4, (1, 4 * H), jnp.float32, -scale, scale)
        params[f"b_{l}"] = b_ih + b_hh
    key, k5, k6 = jax.random.split(key, 3)
    params["w_fc"] = jax.random.uniform(k5, (H, output_size), jnp.float32,
                                        -scale, scale)
    params["b_fc"] = jax.random.uniform(k6, (1, output_size), jnp.float32,
                                        -scale, scale)
    return params


def stock_lstm_ref(x, params, *, num_layers, hidden_size, output_size):
    """Pure-JAX reference of the same forward pass (for validation)."""
    B, T, _ = x.shape
    H = hidden_size
    hs = [jnp.zeros((B, H), jnp.float32) for _ in range(num_layers)]
    cs = [jnp.zeros((B, H), jnp.float32) for _ in range(num_layers)]
    for t in range(T):
        inp = x[:, t, :]
        for l in range(num_layers):
            gates = (inp @ params[f"w_ih_{l}"] + hs[l] @ params[f"w_hh_{l}"]
                     + params[f"b_{l}"])
            i = jax.nn.sigmoid(gates[:, 0 * H:1 * H])
            f = jax.nn.sigmoid(gates[:, 1 * H:2 * H])
            g = jnp.tanh(gates[:, 2 * H:3 * H])
            o = jax.nn.sigmoid(gates[:, 3 * H:4 * H])
            cs[l] = f * cs[l] + i * g
            hs[l] = o * jnp.tanh(cs[l])
            inp = hs[l]
    return hs[-1] @ params["w_fc"] + params["b_fc"]


if __name__ == "__main__":
    # Small shapes consistent with the module: (batch, seq, features)
    INPUT_SIZE = 6
    HIDDEN_SIZE = 32
    NUM_LAYERS = 3
    OUTPUT_SIZE = 1
    B, T = 2, 8

    key = jax.random.PRNGKey(0)
    key, xkey = jax.random.split(key)
    x = jax.random.normal(xkey, (B, T, INPUT_SIZE), jnp.float32)
    params = init_params(key, input_size=INPUT_SIZE, hidden_size=HIDDEN_SIZE,
                         num_layers=NUM_LAYERS, output_size=OUTPUT_SIZE)

    run = functools.partial(stock_lstm_pallas, num_layers=NUM_LAYERS,
                            hidden_size=HIDDEN_SIZE, output_size=OUTPUT_SIZE)
    out = jax.block_until_ready(run(x, params))

    ref = stock_lstm_ref(x, params, num_layers=NUM_LAYERS,
                         hidden_size=HIDDEN_SIZE, output_size=OUTPUT_SIZE)
    assert out.shape == (B, OUTPUT_SIZE)
    assert jnp.allclose(out, ref, atol=1e-4, rtol=1e-4), (out, ref)
    print("KERNEL_OK")
</pallas_src>

<mosaic_0001>
module attributes {stable_mosaic.version = 11 : i64} {
  func.func @kernel(%arg0: i32, %arg1: memref<1x64x6xf32, #tpu.memory_space<vmem>>, %arg2: memref<6x128xf32, #tpu.memory_space<vmem>>, %arg3: memref<32x128xf32, #tpu.memory_space<vmem>>, %arg4: memref<1x128xf32, #tpu.memory_space<vmem>>, %arg5: memref<32x128xf32, #tpu.memory_space<vmem>>, %arg6: memref<32x128xf32, #tpu.memory_space<vmem>>, %arg7: memref<1x128xf32, #tpu.memory_space<vmem>>, %arg8: memref<32x128xf32, #tpu.memory_space<vmem>>, %arg9: memref<32x128xf32, #tpu.memory_space<vmem>>, %arg10: memref<1x128xf32, #tpu.memory_space<vmem>>, %arg11: memref<1x32xf32, #tpu.memory_space<vmem>>, %arg12: memref<1x1xf32, #tpu.memory_space<vmem>>, %arg13: memref<8x1xf32, #tpu.memory_space<vmem>>) attributes {dimension_semantics = [#tpu.dimension_semantics<parallel>], iteration_bounds = array<i64: 1>, scalar_prefetch = 0 : i64, scratch_operands = 0 : i64, tpu.core_type = #tpu.core_type<tc>, window_params = [{transform_indices = @transform_0, window_bounds = array<i64: 1, 64, 6>}, {pipeline_mode = #tpu.pipeline_mode<synchronous>, transform_indices = @transform_1, window_bounds = array<i64: 6, 128>}, {pipeline_mode = #tpu.pipeline_mode<synchronous>, transform_indices = @transform_2, window_bounds = array<i64: 32, 128>}, {pipeline_mode = #tpu.pipeline_mode<synchronous>, transform_indices = @transform_3, window_bounds = array<i64: 1, 128>}, {pipeline_mode = #tpu.pipeline_mode<synchronous>, transform_indices = @transform_4, window_bounds = array<i64: 32, 128>}, {pipeline_mode = #tpu.pipeline_mode<synchronous>, transform_indices = @transform_5, window_bounds = array<i64: 32, 128>}, {pipeline_mode = #tpu.pipeline_mode<synchronous>, transform_indices = @transform_6, window_bounds = array<i64: 1, 128>}, {pipeline_mode = #tpu.pipeline_mode<synchronous>, transform_indices = @transform_7, window_bounds = array<i64: 32, 128>}, {pipeline_mode = #tpu.pipeline_mode<synchronous>, transform_indices = @transform_8, window_bounds = array<i64: 32, 128>}, {pipeline_mode = #tpu.pipeline_mode<synchronous>, transform_indices = @transform_9, window_bounds = array<i64: 1, 128>}, {pipeline_mode = #tpu.pipeline_mode<synchronous>, transform_indices = @transform_10, window_bounds = array<i64: 1, 32>}, {pipeline_mode = #tpu.pipeline_mode<synchronous>, transform_indices = @transform_11, window_bounds = array<i64: 1, 1>}, {transform_indices = @transform_12, window_bounds = array<i64: 8, 1>}]} {
    %c0 = arith.constant 0 : index
    %c0_0 = arith.constant 0 : index
    %c0_1 = arith.constant 0 : index
    %0 = vector.load %arg1[%c0, %c0_0, %c0_1] : memref<1x64x6xf32, #tpu.memory_space<vmem>>, vector<1x64x6xf32>
    %1 = vector.shape_cast %0 : vector<1x64x6xf32> to vector<64x6xf32>
    %c0_2 = arith.constant 0 : index
    %c0_3 = arith.constant 0 : index
    %2 = vector.load %arg2[%c0_2, %c0_3] : memref<6x128xf32, #tpu.memory_space<vmem>>, vector<6x128xf32>
    %cst = arith.constant dense<0.000000e+00> : vector<64x128xf32>
    %3 = tpu.matmul %1, %2, %cst {dimension_numbers = #tpu.dot_dimension_numbers<[1], [0], [0], [1], [0, 0, 1, 1], [], []>} : vector<64x6xf32>, vector<6x128xf32>, vector<64x128xf32> -> vector<64x128xf32>
    %c0_4 = arith.constant 0 : index
    %c0_5 = arith.constant 0 : index
    %4 = vector.load %arg4[%c0_4, %c0_5] : memref<1x128xf32, #tpu.memory_space<vmem>>, vector<1x128xf32>
    %5 = vector.broadcast %4 : vector<1x128xf32> to vector<64x128xf32>
    %6 = arith.addf %3, %5 : vector<64x128xf32>
    %cst_6 = arith.constant 0.000000e+00 : f32
    %7 = vector.broadcast %cst_6 : f32 to vector<8x32xf32>
    %cst_7 = arith.constant 0.000000e+00 : f32
    %8 = vector.broadcast %cst_7 : f32 to vector<8x32xf32>
    %cst_8 = arith.constant 0.000000e+00 : f32
    %9 = vector.broadcast %cst_8 : f32 to vector<8x32xf32>
    %cst_9 = arith.constant 0.000000e+00 : f32
    %10 = vector.broadcast %cst_9 : f32 to vector<8x32xf32>
    %cst_10 = arith.constant 0.000000e+00 : f32
    %11 = vector.broadcast %cst_10 : f32 to vector<8x32xf32>
    %cst_11 = arith.constant 0.000000e+00 : f32
    %12 = vector.broadcast %cst_11 : f32 to vector<8x32xf32>
    %13 = vector.extract_strided_slice %6 {offsets = [0, 0], sizes = [8, 128], strides = [1, 1]} : vector<64x128xf32> to vector<8x128xf32>
    %c0_12 = arith.constant 0 : index
    %c0_13 = arith.constant 0 : index
    %14 = vector.load %arg3[%c0_12, %c0_13] : memref<32x128xf32, #tpu.memory_space<vmem>>, vector<32x128xf32>
    %cst_14 = arith.constant dense<0.000000e+00> : vector<8x128xf32>
    %15 = tpu.matmul %7, %14, %cst_14 {dimension_numbers = #tpu.dot_dimension_numbers<[1], [0], [0], [1], [0, 0, 1, 1], [], []>} : vector<8x32xf32>, vector<32x128xf32>, vector<8x128xf32> -> vector<8x128xf32>
    %16 = arith.addf %13, %15 : vector<8x128xf32>
    %17 = vector.extract_strided_slice %16 {offsets = [0, 0], sizes = [8, 96], strides = [1, 1]} : vector<8x128xf32> to vector<8x96xf32>
    %18 = arith.negf %17 : vector<8x96xf32>
    %19 = math.exp %18 : vector<8x96xf32>
    %cst_15 = arith.constant 1.000000e+00 : f32
    %20 = vector.broadcast %cst_15 : f32 to vector<8x96xf32>
    %21 = arith.addf %20, %19 : vector<8x96xf32>
    %22 = arith.divf %20, %21 : vector<8x96xf32>
    %23 = vector.extract_strided_slice %16 {offsets = [0, 96], sizes = [8, 32], strides = [1, 1]} : vector<8x128xf32> to vector<8x32xf32>
    %24 = math.tanh %23 : vector<8x32xf32>
    %25 = vector.extract_strided_slice %22 {offsets = [0, 0], sizes = [8, 32], strides = [1, 1]} : vector<8x96xf32> to vector<8x32xf32>
    %26 = vector.extract_strided_slice %22 {offsets = [0, 32], sizes = [8, 32], strides = [1, 1]} : vector<8x96xf32> to vector<8x32xf32>
    %27 = vector.extract_strided_slice %22 {offsets = [0, 64], sizes = [8, 32], strides = [1, 1]} : vector<8x96xf32> to vector<8x32xf32>
    %28 = arith.mulf %26, %10 : vector<8x32xf32>
    %29 = arith.mulf %25, %24 : vector<8x32xf32>
    %30 = arith.addf %28, %29 : vector<8x32xf32>
    %31 = math.tanh %30 : vector<8x32xf32>
    %32 = arith.mulf %27, %31 : vector<8x32xf32>
    %c0_16 = arith.constant 0 : index
    %c0_17 = arith.constant 0 : index
    %33 = vector.load %arg5[%c0_16, %c0_17] : memref<32x128xf32, #tpu.memory_space<vmem>>, vector<32x128xf32>
    %cst_18 = arith.constant dense<0.000000e+00> : vector<8x128xf32>
    %34 = tpu.matmul %32, %33, %cst_18 {dimension_numbers = #tpu.dot_dimension_numbers<[1], [0], [0], [1], [0, 0, 1, 1], [], []>} : vector<8x32xf32>, vector<32x128xf32>, vector<8x128xf32> -> vector<8x128xf32>
    %c0_19 = arith.constant 0 : index
    %c0_20 = arith.constant 0 : index
    %35 = vector.load %arg6[%c0_19, %c0_20] : memref<32x128xf32, #tpu.memory_space<vmem>>, vector<32x128xf32>
    %cst_21 = arith.constant dense<0.000000e+00> : vector<8x128xf32>
    %36 = tpu.matmul %8, %35, %cst_21 {dimension_numbers = #tpu.dot_dimension_numbers<[1], [0], [0], [1], [0, 0, 1, 1], [], []>} : vector<8x32xf32>, vector<32x128xf32>, vector<8x128xf32> -> vector<8x128xf32>
    %37 = arith.addf %34, %36 : vector<8x128xf32>
    %c0_22 = arith.constant 0 : index
    %c0_23 = arith.constant 0 : index
    %38 = vector.load %arg7[%c0_22, %c0_23] : memref<1x128xf32, #tpu.memory_space<vmem>>, vector<1x128xf32>
    %39 = vector.broadcast %38 : vector<1x128xf32> to vector<8x128xf32>
    %40 = arith.addf %37, %39 : vector<8x128xf32>
    %41 = vector.extract_strided_slice %40 {offsets = [0, 0], sizes = [8, 96], strides = [1, 1]} : vector<8x128xf32> to vector<8x96xf32>
    %42 = arith.negf %41 : vector<8x96xf32>
    %43 = math.exp %42 : vector<8x96xf32>
    %cst_24 = arith.constant 1.000000e+00 : f32
    %44 = vector.broadcast %cst_24 : f32 to vector<8x96xf32>
    %45 = arith.addf %44, %43 : vector<8x96xf32>
    %46 = arith.divf %44, %45 : vector<8x96xf32>
    %47 = vector.extract_strided_slice %40 {offsets = [0, 96], sizes = [8, 32], strides = [1, 1]} : vector<8x128xf32> to vector<8x32xf32>
    %48 = math.tanh %47 : vector<8x32xf32>
    %49 = vector.extract_strided_slice %46 {offsets = [0, 0], sizes = [8, 32], strides = [1, 1]} : vector<8x96xf32> to vector<8x32xf32>
    %50 = vector.extract_strided_slice %46 {offsets = [0, 32], sizes = [8, 32], strides = [1, 1]} : vector<8x96xf32> to vector<8x32xf32>
    %51 = vector.extract_strided_slice %46 {offsets = [0, 64], sizes = [8, 32], strides = [1, 1]} : vector<8x96xf32> to vector<8x32xf32>
    %52 = arith.mulf %50, %11 : vector<8x32xf32>
    %53 = arith.mulf %49, %48 : vector<8x32xf32>
    %54 = arith.addf %52, %53 : vector<8x32xf32>
    %55 = math.tanh %54 : vector<8x32xf32>
    %56 = arith.mulf %51, %55 : vector<8x32xf32>
    %c0_25 = arith.constant 0 : index
    %c0_26 = arith.constant 0 : index
    %57 = vector.load %arg8[%c0_25, %c0_26] : memref<32x128xf32, #tpu.memory_space<vmem>>, vector<32x128xf32>
    %cst_27 = arith.constant dense<0.000000e+00> : vector<8x128xf32>
    %58 = tpu.matmul %56, %57, %cst_27 {dimension_numbers = #tpu.dot_dimension_numbers<[1], [0], [0], [1], [0, 0, 1, 1], [], []>} : vector<8x32xf32>, vector<32x128xf32>, vector<8x128xf32> -> vector<8x128xf32>
    %c0_28 = arith.constant 0 : index
    %c0_29 = arith.constant 0 : index
    %59 = vector.load %arg9[%c0_28, %c0_29] : memref<32x128xf32, #tpu.memory_space<vmem>>, vector<32x128xf32>
    %cst_30 = arith.constant dense<0.000000e+00> : vector<8x128xf32>
    %60 = tpu.matmul %9, %59, %cst_30 {dimension_numbers = #tpu.dot_dimension_numbers<[1], [0], [0], [1], [0, 0, 1, 1], [], []>} : vector<8x32xf32>, vector<32x128xf32>, vector<8x128xf32> -> vector<8x128xf32>
    %61 = arith.addf %58, %60 : vector<8x128xf32>
    %c0_31 = arith.constant 0 : index
    %c0_32 = arith.constant 0 : index
    %62 = vector.load %arg10[%c0_31, %c0_32] : memref<1x128xf32, #tpu.memory_space<vmem>>, vector<1x128xf32>
    %63 = vector.broadcast %62 : vector<1x128xf32> to vector<8x128xf32>
    %64 = arith.addf %61, %63 : vector<8x128xf32>
    %65 = vector.extract_strided_slice %64 {offsets = [0, 0], sizes = [8, 96], strides = [1, 1]} : vector<8x128xf32> to vector<8x96xf32>
    %66 = arith.negf %65 : vector<8x96xf32>
    %67 = math.exp %66 : vector<8x96xf32>
    %cst_33 = arith.constant 1.000000e+00 : f32
    %68 = vector.broadcast %cst_33 : f32 to vector<8x96xf32>
    %69 = arith.addf %68, %67 : vector<8x96xf32>
    %70 = arith.divf %68, %69 : vector<8x96xf32>
    %71 = vector.extract_strided_slice %64 {offsets = [0, 96], sizes = [8, 32], strides = [1, 1]} : vector<8x128xf32> to vector<8x32xf32>
    %72 = math.tanh %71 : vector<8x32xf32>
    %73 = vector.extract_strided_slice %70 {offsets = [0, 0], sizes = [8, 32], strides = [1, 1]} : vector<8x96xf32> to vector<8x32xf32>
    %74 = vector.extract_strided_slice %70 {offsets = [0, 32], sizes = [8, 32], strides = [1, 1]} : vector<8x96xf32> to vector<8x32xf32>
    %75 = vector.extract_strided_slice %70 {offsets = [0, 64], sizes = [8, 32], strides = [1, 1]} : vector<8x96xf32> to vector<8x32xf32>
    %76 = arith.mulf %74, %12 : vector<8x32xf32>
    %77 = arith.mulf %73, %72 : vector<8x32xf32>
    %78 = arith.addf %76, %77 : vector<8x32xf32>
    %79 = math.tanh %78 : vector<8x32xf32>
    %80 = arith.mulf %75, %79 : vector<8x32xf32>
    %81 = vector.extract_strided_slice %6 {offsets = [8, 0], sizes = [8, 128], strides = [1, 1]} : vector<64x128xf32> to vector<8x128xf32>
    %c0_34 = arith.constant 0 : index
    %c0_35 = arith.constant 0 : index
    %82 = vector.load %arg3[%c0_34, %c0_35] : memref<32x128xf32, #tpu.memory_space<vmem>>, vector<32x128xf32>
    %cst_36 = arith.constant dense<0.000000e+00> : vector<8x128xf32>
    %83 = tpu.matmul %32, %82, %cst_36 {dimension_numbers = #tpu.dot_dimension_numbers<[1], [0], [0], [1], [0, 0, 1, 1], [], []>} : vector<8x32xf32>, vector<32x128xf32>, vector<8x128xf32> -> vector<8x128xf32>
    %84 = arith.addf %81, %83 : vector<8x128xf32>
    %85 = vector.extract_strided_slice %84 {offsets = [0, 0], sizes = [8, 96], strides = [1, 1]} : vector<8x128xf32> to vector<8x96xf32>
    %86 = arith.negf %85 : vector<8x96xf32>
    %87 = math.exp %86 : vector<8x96xf32>
    %cst_37 = arith.constant 1.000000e+00 : f32
    %88 = vector.broadcast %cst_37 : f32 to vector<8x96xf32>
    %89 = arith.addf %88, %87 : vector<8x96xf32>
    %90 = arith.divf %88, %89 : vector<8x96xf32>
    %91 = vector.extract_strided_slice %84 {offsets = [0, 96], sizes = [8, 32], strides = [1, 1]} : vector<8x128xf32> to vector<8x32xf32>
    %92 = math.tanh %91 : vector<8x32xf32>
    %93 = vector.extract_strided_slice %90 {offsets = [0, 0], sizes = [8, 32], strides = [1, 1]} : vector<8x96xf32> to vector<8x32xf32>
    %94 = vector.extract_strided_slice %90 {offsets = [0, 32], sizes = [8, 32], strides = [1, 1]} : vector<8x96xf32> to vector<8x32xf32>
    %95 = vector.extract_strided_slice %90 {offsets = [0, 64], sizes = [8, 32], strides = [1, 1]} : vector<8x96xf32> to vector<8x32xf32>
    %96 = arith.mulf %94, %30 : vector<8x32xf32>
    %97 = arith.mulf %93, %92 : vector<8x32xf32>
    %98 = arith.addf %96, %97 : vector<8x32xf32>
    %99 = math.tanh %98 : vector<8x32xf32>
    %100 = arith.mulf %95, %99 : vector<8x32xf32>
    %c0_38 = arith.constant 0 : index
    %c0_39 = arith.constant 0 : index
    %101 = vector.load %arg5[%c0_38, %c0_39] : memref<32x128xf32, #tpu.memory_space<vmem>>, vector<32x128xf32>
    %cst_40 = arith.constant dense<0.000000e+00> : vector<8x128xf32>
    %102 = tpu.matmul %100, %101, %cst_40 {dimension_numbers = #tpu.dot_dimension_numbers<[1], [0], [0], [1], [0, 0, 1, 1], [], []>} : vector<8x32xf32>, vector<32x128xf32>, vector<8x128xf32> -> vector<8x128xf32>
    %c0_41 = arith.constant 0 : index
    %c0_42 = arith.constant 0 : index
    %103 = vector.load %arg6[%c0_41, %c0_42] : memref<32x128xf32, #tpu.memory_space<vmem>>, vector<32x128xf32>
    %cst_43 = arith.constant dense<0.000000e+00> : vector<8x128xf32>
    %104 = tpu.matmul %56, %103, %cst_43 {dimension_numbers = #tpu.dot_dimension_numbers<[1], [0], [0], [1], [0, 0, 1, 1], [], []>} : vector<8x32xf32>, vector<32x128xf32>, vector<8x128xf32> -> vector<8x128xf32>
    %105 = arith.addf %102, %104 : vector<8x128xf32>
    %c0_44 = arith.constant 0 : index
    %c0_45 = arith.constant 0 : index
    %106 = vector.load %arg7[%c0_44, %c0_45] : memref<1x128xf32, #tpu.memory_space<vmem>>, vector<1x128xf32>
    %107 = vector.broadcast %106 : vector<1x128xf32> to vector<8x128xf32>
    %108 = arith.addf %105, %107 : vector<8x128xf32>
    %109 = vector.extract_strided_slice %108 {offsets = [0, 0], sizes = [8, 96], strides = [1, 1]} : vector<8x128xf32> to vector<8x96xf32>
    %110 = arith.negf %109 : vector<8x96xf32>
    %111 = math.exp %110 : vector<8x96xf32>
    %cst_46 = arith.constant 1.000000e+00 : f32
    %112 = vector.broadcast %cst_46 : f32 to vector<8x96xf32>
    %113 = arith.addf %112, %111 : vector<8x96xf32>
    %114 = arith.divf %112, %113 : vector<8x96xf32>
    %115 = vector.extract_strided_slice %108 {offsets = [0, 96], sizes = [8, 32], strides = [1, 1]} : vector<8x128xf32> to vector<8x32xf32>
    %116 = math.tanh %115 : vector<8x32xf32>
    %117 = vector.extract_strided_slice %114 {offsets = [0, 0], sizes = [8, 32], strides = [1, 1]} : vector<8x96xf32> to vector<8x32xf32>
    %118 = vector.extract_strided_slice %114 {offsets = [0, 32], sizes = [8, 32], strides = [1, 1]} : vector<8x96xf32> to vector<8x32xf32>
    %119 = vector.extract_strided_slice %114 {offsets = [0, 64], sizes = [8, 32], strides = [1, 1]} : vector<8x96xf32> to vector<8x32xf32>
    %120 = arith.mulf %118, %54 : vector<8x32xf32>
    %121 = arith.mulf %117, %116 : vector<8x32xf32>
    %122 = arith.addf %120, %121 : vector<8x32xf32>
    %123 = math.tanh %122 : vector<8x32xf32>
    %124 = arith.mulf %119, %123 : vector<8x32xf32>
    %c0_47 = arith.constant 0 : index
    %c0_48 = arith.constant 0 : index
    %125 = vector.load %arg8[%c0_47, %c0_48] : memref<32x128xf32, #tpu.memory_space<vmem>>, vector<32x128xf32>
    %cst_49 = arith.constant dense<0.000000e+00> : vector<8x128xf32>
    %126 = tpu.matmul %124, %125, %cst_49 {dimension_numbers = #tpu.dot_dimension_numbers<[1], [0], [0], [1], [0, 0, 1, 1], [], []>} : vector<8x32xf32>, vector<32x128xf32>, vector<8x128xf32> -> vector<8x128xf32>
    %c0_50 = arith.constant 0 : index
    %c0_51 = arith.constant 0 : index
    %127 = vector.load %arg9[%c0_50, %c0_51] : memref<32x128xf32, #tpu.memory_space<vmem>>, vector<32x128xf32>
    %cst_52 = arith.constant dense<0.000000e+00> : vector<8x128xf32>
    %128 = tpu.matmul %80, %127, %cst_52 {dimension_numbers = #tpu.dot_dimension_numbers<[1], [0], [0], [1], [0, 0, 1, 1], [], []>} : vector<8x32xf32>, vector<32x128xf32>, vector<8x128xf32> -> vector<8x128xf32>
    %129 = arith.addf %126, %128 : vector<8x128xf32>
    %c0_53 = arith.constant 0 : index
    %c0_54 = arith.constant 0 : index
    %130 = vector.load %arg10[%c0_53, %c0_54] : memref<1x128xf32, #tpu.memory_space<vmem>>, vector<1x128xf32>
    %131 = vector.broadcast %130 : vector<1x128xf32> to vector<8x128xf32>
    %132 = arith.addf %129, %131 : vector<8x128xf32>
    %133 = vector.extract_strided_slice %132 {offsets = [0, 0], sizes = [8, 96], strides = [1, 1]} : vector<8x128xf32> to vector<8x96xf32>
    %134 = arith.negf %133 : vector<8x96xf32>
    %135 = math.exp %134 : vector<8x96xf32>
    %cst_55 = arith.constant 1.000000e+00 : f32
    %136 = vector.broadcast %cst_55 : f32 to vector<8x96xf32>
    %137 = arith.addf %136, %135 : vector<8x96xf32>
    %138 = arith.divf %136, %137 : vector<8x96xf32>
    %139 = vector.extract_strided_slice %132 {offsets = [0, 96], sizes = [8, 32], strides = [1, 1]} : vector<8x128xf32> to vector<8x32xf32>
    %140 = math.tanh %139 : vector<8x32xf32>
    %141 = vector.extract_strided_slice %138 {offsets = [0, 0], sizes = [8, 32], strides = [1, 1]} : vector<8x96xf32> to vector<8x32xf32>
    %142 = vector.extract_strided_slice %138 {offsets = [0, 32], sizes = [8, 32], strides = [1, 1]} : vector<8x96xf32> to vector<8x32xf32>
    %143 = vector.extract_strided_slice %138 {offsets = [0, 64], sizes = [8, 32], strides = [1, 1]} : vector<8x96xf32> to vector<8x32xf32>
    %144 = arith.mulf %142, %78 : vector<8x32xf32>
    %145 = arith.mulf %141, %140 : vector<8x32xf32>
    %146 = arith.addf %144, %145 : vector<8x32xf32>
    %147 = math.tanh %146 : vector<8x32xf32>
    %148 = arith.mulf %143, %147 : vector<8x32xf32>
    %149 = vector.extract_strided_slice %6 {offsets = [16, 0], sizes = [8, 128], strides = [1, 1]} : vector<64x128xf32> to vector<8x128xf32>
    %c0_56 = arith.constant 0 : index
    %c0_57 = arith.constant 0 : index
    %150 = vector.load %arg3[%c0_56, %c0_57] : memref<32x128xf32, #tpu.memory_space<vmem>>, vector<32x128xf32>
    %cst_58 = arith.constant dense<0.000000e+00> : vector<8x128xf32>
    %151 = tpu.matmul %100, %150, %cst_58 {dimension_numbers = #tpu.dot_dimension_numbers<[1], [0], [0], [1], [0, 0, 1, 1], [], []>} : vector<8x32xf32>, vector<32x128xf32>, vector<8x128xf32> -> vector<8x128xf32>
    %152 = arith.addf %149, %151 : vector<8x128xf32>
    %153 = vector.extract_strided_slice %152 {offsets = [0, 0], sizes = [8, 96], strides = [1, 1]} : vector<8x128xf32> to vector<8x96xf32>
    %154 = arith.negf %153 : vector<8x96xf32>
    %155 = math.exp %154 : vector<8x96xf32>
    %cst_59 = arith.constant 1.000000e+00 : f32
    %156 = vector.broadcast %cst_59 : f32 to vector<8x96xf32>
    %157 = arith.addf %156, %155 : vector<8x96xf32>
    %158 = arith.divf %156, %157 : vector<8x96xf32>
    %159 = vector.extract_strided_slice %152 {offsets = [0, 96], sizes = [8, 32], strides = [1, 1]} : vector<8x128xf32> to vector<8x32xf32>
    %160 = math.tanh %159 : vector<8x32xf32>
    %161 = vector.extract_strided_slice %158 {offsets = [0, 0], sizes = [8, 32], strides = [1, 1]} : vector<8x96xf32> to vector<8x32xf32>
    %162 = vector.extract_strided_slice %158 {offsets = [0, 32], sizes = [8, 32], strides = [1, 1]} : vector<8x96xf32> to vector<8x32xf32>
    %163 = vector.extract_strided_slice %158 {offsets = [0, 64], sizes = [8, 32], strides = [1, 1]} : vector<8x96xf32> to vector<8x32xf32>
    %164 = arith.mulf %162, %98 : vector<8x32xf32>
    %165 = arith.mulf %161, %160 : vector<8x32xf32>
    %166 = arith.addf %164, %165 : vector<8x32xf32>
    %167 = math.tanh %166 : vector<8x32xf32>
    %168 = arith.mulf %163, %167 : vector<8x32xf32>
    %c0_60 = arith.constant 0 : index
    %c0_61 = arith.constant 0 : index
    %169 = vector.load %arg5[%c0_60, %c0_61] : memref<32x128xf32, #tpu.memory_space<vmem>>, vector<32x128xf32>
    %cst_62 = arith.constant dense<0.000000e+00> : vector<8x128xf32>
    %170 = tpu.matmul %168, %169, %cst_62 {dimension_numbers = #tpu.dot_dimension_numbers<[1], [0], [0], [1], [0, 0, 1, 1], [], []>} : vector<8x32xf32>, vector<32x128xf32>, vector<8x128xf32> -> vector<8x128xf32>
    %c0_63 = arith.constant 0 : index
    %c0_64 = arith.constant 0 : index
    %171 = vector.load %arg6[%c0_63, %c0_64] : memref<32x128xf32, #tpu.memory_space<vmem>>, vector<32x128xf32>
    %cst_65 = arith.constant dense<0.000000e+00> : vector<8x128xf32>
    %172 = tpu.matmul %124, %171, %cst_65 {dimension_numbers = #tpu.dot_dimension_numbers<[1], [0], [0], [1], [0, 0, 1, 1], [], []>} : vector<8x32xf32>, vector<32x128xf32>, vector<8x128xf32> -> vector<8x128xf32>
    %173 = arith.addf %170, %172 : vector<8x128xf32>
    %c0_66 = arith.constant 0 : index
    %c0_67 = arith.constant 0 : index
    %174 = vector.load %arg7[%c0_66, %c0_67] : memref<1x128xf32, #tpu.memory_space<vmem>>, vector<1x128xf32>
    %175 = vector.broadcast %174 : vector<1x128xf32> to vector<8x128xf32>
    %176 = arith.addf %173, %175 : vector<8x128xf32>
    %177 = vector.extract_strided_slice %176 {offsets = [0, 0], sizes = [8, 96], strides = [1, 1]} : vector<8x128xf32> to vector<8x96xf32>
    %178 = arith.negf %177 : vector<8x96xf32>
    %179 = math.exp %178 : vector<8x96xf32>
    %cst_68 = arith.constant 1.000000e+00 : f32
    %180 = vector.broadcast %cst_68 : f32 to vector<8x96xf32>
    %181 = arith.addf %180, %179 : vector<8x96xf32>
    %182 = arith.divf %180, %181 : vector<8x96xf32>
    %183 = vector.extract_strided_slice %176 {offsets = [0, 96], sizes = [8, 32], strides = [1, 1]} : vector<8x128xf32> to vector<8x32xf32>
    %184 = math.tanh %183 : vector<8x32xf32>
    %185 = vector.extract_strided_slice %182 {offsets = [0, 0], sizes = [8, 32], strides = [1, 1]} : vector<8x96xf32> to vector<8x32xf32>
    %186 = vector.extract_strided_slice %182 {offsets = [0, 32], sizes = [8, 32], strides = [1, 1]} : vector<8x96xf32> to vector<8x32xf32>
    %187 = vector.extract_strided_slice %182 {offsets = [0, 64], sizes = [8, 32], strides = [1, 1]} : vector<8x96xf32> to vector<8x32xf32>
    %188 = arith.mulf %186, %122 : vector<8x32xf32>
    %189 = arith.mulf %185, %184 : vector<8x32xf32>
    %190 = arith.addf %188, %189 : vector<8x32xf32>
    %191 = math.tanh %190 : vector<8x32xf32>
    %192 = arith.mulf %187, %191 : vector<8x32xf32>
    %c0_69 = arith.constant 0 : index
    %c0_70 = arith.constant 0 : index
    %193 = vector.load %arg8[%c0_69, %c0_70] : memref<32x128xf32, #tpu.memory_space<vmem>>, vector<32x128xf32>
    %cst_71 = arith.constant dense<0.000000e+00> : vector<8x128xf32>
    %194 = tpu.matmul %192, %193, %cst_71 {dimension_numbers = #tpu.dot_dimension_numbers<[1], [0], [0], [1], [0, 0, 1, 1], [], []>} : vector<8x32xf32>, vector<32x128xf32>, vector<8x128xf32> -> vector<8x128xf32>
    %c0_72 = arith.constant 0 : index
    %c0_73 = arith.constant 0 : index
    %195 = vector.load %arg9[%c0_72, %c0_73] : memref<32x128xf32, #tpu.memory_space<vmem>>, vector<32x128xf32>
    %cst_74 = arith.constant dense<0.000000e+00> : vector<8x128xf32>
    %196 = tpu.matmul %148, %195, %cst_74 {dimension_numbers = #tpu.dot_dimension_numbers<[1], [0], [0], [1], [0, 0, 1, 1], [], []>} : vector<8x32xf32>, vector<32x128xf32>, vector<8x128xf32> -> vector<8x128xf32>
    %197 = arith.addf %194, %196 : vector<8x128xf32>
    %c0_75 = arith.constant 0 : index
    %c0_76 = arith.constant 0 : index
    %198 = vector.load %arg10[%c0_75, %c0_76] : memref<1x128xf32, #tpu.memory_space<vmem>>, vector<1x128xf32>
    %199 = vector.broadcast %198 : vector<1x128xf32> to vector<8x128xf32>
    %200 = arith.addf %197, %199 : vector<8x128xf32>
    %201 = vector.extract_strided_slice %200 {offsets = [0, 0], sizes = [8, 96], strides = [1, 1]} : vector<8x128xf32> to vector<8x96xf32>
    %202 = arith.negf %201 : vector<8x96xf32>
    %203 = math.exp %202 : vector<8x96xf32>
    %cst_77 = arith.constant 1.000000e+00 : f32
    %204 = vector.broadcast %cst_77 : f32 to vector<8x96xf32>
    %205 = arith.addf %204, %203 : vector<8x96xf32>
    %206 = arith.divf %204, %205 : vector<8x96xf32>
    %207 = vector.extract_strided_slice %200 {offsets = [0, 96], sizes = [8, 32], strides = [1, 1]} : vector<8x128xf32> to vector<8x32xf32>
    %208 = math.tanh %207 : vector<8x32xf32>
    %209 = vector.extract_strided_slice %206 {offsets = [0, 0], sizes = [8, 32], strides = [1, 1]} : vector<8x96xf32> to vector<8x32xf32>
    %210 = vector.extract_strided_slice %206 {offsets = [0, 32], sizes = [8, 32], strides = [1, 1]} : vector<8x96xf32> to vector<8x32xf32>
    %211 = vector.extract_strided_slice %206 {offsets = [0, 64], sizes = [8, 32], strides = [1, 1]} : vector<8x96xf32> to vector<8x32xf32>
    %212 = arith.mulf %210, %146 : vector<8x32xf32>
    %213 = arith.mulf %209, %208 : vector<8x32xf32>
    %214 = arith.addf %212, %213 : vector<8x32xf32>
    %215 = math.tanh %214 : vector<8x32xf32>
    %216 = arith.mulf %211, %215 : vector<8x32xf32>
    %217 = vector.extract_strided_slice %6 {offsets = [24, 0], sizes = [8, 128], strides = [1, 1]} : vector<64x128xf32> to vector<8x128xf32>
    %c0_78 = arith.constant 0 : index
    %c0_79 = arith.constant 0 : index
    %218 = vector.load %arg3[%c0_78, %c0_79] : memref<32x128xf32, #tpu.memory_space<vmem>>, vector<32x128xf32>
    %cst_80 = arith.constant dense<0.000000e+00> : vector<8x128xf32>
    %219 = tpu.matmul %168, %218, %cst_80 {dimension_numbers = #tpu.dot_dimension_numbers<[1], [0], [0], [1], [0, 0, 1, 1], [], []>} : vector<8x32xf32>, vector<32x128xf32>, vector<8x128xf32> -> vector<8x128xf32>
    %220 = arith.addf %217, %219 : vector<8x128xf32>
    %221 = vector.extract_strided_slice %220 {offsets = [0, 0], sizes = [8, 96], strides = [1, 1]} : vector<8x128xf32> to vector<8x96xf32>
    %222 = arith.negf %221 : vector<8x96xf32>
    %223 = math.exp %222 : vector<8x96xf32>
    %cst_81 = arith.constant 1.000000e+00 : f32
    %224 = vector.broadcast %cst_81 : f32 to vector<8x96xf32>
    %225 = arith.addf %224, %223 : vector<8x96xf32>
    %226 = arith.divf %224, %225 : vector<8x96xf32>
    %227 = vector.extract_strided_slice %220 {offsets = [0, 96], sizes = [8, 32], strides = [1, 1]} : vector<8x128xf32> to vector<8x32xf32>
    %228 = math.tanh %227 : vector<8x32xf32>
    %229 = vector.extract_strided_slice %226 {offsets = [0, 0], sizes = [8, 32], strides = [1, 1]} : vector<8x96xf32> to vector<8x32xf32>
    %230 = vector.extract_strided_slice %226 {offsets = [0, 32], sizes = [8, 32], strides = [1, 1]} : vector<8x96xf32> to vector<8x32xf32>
    %231 = vector.extract_strided_slice %226 {offsets = [0, 64], sizes = [8, 32], strides = [1, 1]} : vector<8x96xf32> to vector<8x32xf32>
    %232 = arith.mulf %230, %166 : vector<8x32xf32>
    %233 = arith.mulf %229, %228 : vector<8x32xf32>
    %234 = arith.addf %232, %233 : vector<8x32xf32>
    %235 = math.tanh %234 : vector<8x32xf32>
    %236 = arith.mulf %231, %235 : vector<8x32xf32>
    %c0_82 = arith.constant 0 : index
    %c0_83 = arith.constant 0 : index
    %237 = vector.load %arg5[%c0_82, %c0_83] : memref<32x128xf32, #tpu.memory_space<vmem>>, vector<32x128xf32>
    %cst_84 = arith.constant dense<0.000000e+00> : vector<8x128xf32>
    %238 = tpu.matmul %236, %237, %cst_84 {dimension_numbers = #tpu.dot_dimension_numbers<[1], [0], [0], [1], [0, 0, 1, 1], [], []>} : vector<8x32xf32>, vector<32x128xf32>, vector<8x128xf32> -> vector<8x128xf32>
    %c0_85 = arith.constant 0 : index
    %c0_86 = arith.constant 0 : index
    %239 = vector.load %arg6[%c0_85, %c0_86] : memref<32x128xf32, #tpu.memory_space<vmem>>, vector<32x128xf32>
    %cst_87 = arith.constant dense<0.000000e+00> : vector<8x128xf32>
    %240 = tpu.matmul %192, %239, %cst_87 {dimension_numbers = #tpu.dot_dimension_numbers<[1], [0], [0], [1], [0, 0, 1, 1], [], []>} : vector<8x32xf32>, vector<32x128xf32>, vector<8x128xf32> -> vector<8x128xf32>
    %241 = arith.addf %238, %240 : vector<8x128xf32>
    %c0_88 = arith.constant 0 : index
    %c0_89 = arith.constant 0 : index
    %242 = vector.load %arg7[%c0_88, %c0_89] : memref<1x128xf32, #tpu.memory_space<vmem>>, vector<1x128xf32>
    %243 = vector.broadcast %242 : vector<1x128xf32> to vector<8x128xf32>
    %244 = arith.addf %241, %243 : vector<8x128xf32>
    %245 = vector.extract_strided_slice %244 {offsets = [0, 0], sizes = [8, 96], strides = [1, 1]} : vector<8x128xf32> to vector<8x96xf32>
    %246 = arith.negf %245 : vector<8x96xf32>
    %247 = math.exp %246 : vector<8x96xf32>
    %cst_90 = arith.constant 1.000000e+00 : f32
    %248 = vector.broadcast %cst_90 : f32 to vector<8x96xf32>
    %249 = arith.addf %248, %247 : vector<8x96xf32>
    %250 = arith.divf %248, %249 : vector<8x96xf32>
    %251 = vector.extract_strided_slice %244 {offsets = [0, 96], sizes = [8, 32], strides = [1, 1]} : vector<8x128xf32> to vector<8x32xf32>
    %252 = math.tanh %251 : vector<8x32xf32>
    %253 = vector.extract_strided_slice %250 {offsets = [0, 0], sizes = [8, 32], strides = [1, 1]} : vector<8x96xf32> to vector<8x32xf32>
    %254 = vector.extract_strided_slice %250 {offsets = [0, 32], sizes = [8, 32], strides = [1, 1]} : vector<8x96xf32> to vector<8x32xf32>
    %255 = vector.extract_strided_slice %250 {offsets = [0, 64], sizes = [8, 32], strides = [1, 1]} : vector<8x96xf32> to vector<8x32xf32>
    %256 = arith.mulf %254, %190 : vector<8x32xf32>
    %257 = arith.mulf %253, %252 : vector<8x32xf32>
    %258 = arith.addf %256, %257 : vector<8x32xf32>
    %259 = math.tanh %258 : vector<8x32xf32>
    %260 = arith.mulf %255, %259 : vector<8x32xf32>
    %c0_91 = arith.constant 0 : index
    %c0_92 = arith.constant 0 : index
    %261 = vector.load %arg8[%c0_91, %c0_92] : memref<32x128xf32, #tpu.memory_space<vmem>>, vector<32x128xf32>
    %cst_93 = arith.constant dense<0.000000e+00> : vector<8x128xf32>
    %262 = tpu.matmul %260, %261, %cst_93 {dimension_numbers = #tpu.dot_dimension_numbers<[1], [0], [0], [1], [0, 0, 1, 1], [], []>} : vector<8x32xf32>, vector<32x128xf32>, vector<8x128xf32> -> vector<8x128xf32>
    %c0_94 = arith.constant 0 : index
    %c0_95 = arith.constant 0 : index
    %263 = vector.load %arg9[%c0_94, %c0_95] : memref<32x128xf32, #tpu.memory_space<vmem>>, vector<32x128xf32>
    %cst_96 = arith.constant dense<0.000000e+00> : vector<8x128xf32>
    %264 = tpu.matmul %216, %263, %cst_96 {dimension_numbers = #tpu.dot_dimension_numbers<[1], [0], [0], [1], [0, 0, 1, 1], [], []>} : vector<8x32xf32>, vector<32x128xf32>, vector<8x128xf32> -> vector<8x128xf32>
    %265 = arith.addf %262, %264 : vector<8x128xf32>
    %c0_97 = arith.constant 0 : index
    %c0_98 = arith.constant 0 : index
    %266 = vector.load %arg10[%c0_97, %c0_98] : memref<1x128xf32, #tpu.memory_space<vmem>>, vector<1x128xf32>
    %267 = vector.broadcast %266 : vector<1x128xf32> to vector<8x128xf32>
    %268 = arith.addf %265, %267 : vector<8x128xf32>
    %269 = vector.extract_strided_slice %268 {offsets = [0, 0], sizes = [8, 96], strides = [1, 1]} : vector<8x128xf32> to vector<8x96xf32>
    %270 = arith.negf %269 : vector<8x96xf32>
    %271 = math.exp %270 : vector<8x96xf32>
    %cst_99 = arith.constant 1.000000e+00 : f32
    %272 = vector.broadcast %cst_99 : f32 to vector<8x96xf32>
    %273 = arith.addf %272, %271 : vector<8x96xf32>
    %274 = arith.divf %272, %273 : vector<8x96xf32>
    %275 = vector.extract_strided_slice %268 {offsets = [0, 96], sizes = [8, 32], strides = [1, 1]} : vector<8x128xf32> to vector<8x32xf32>
    %276 = math.tanh %275 : vector<8x32xf32>
    %277 = vector.extract_strided_slice %274 {offsets = [0, 0], sizes = [8, 32], strides = [1, 1]} : vector<8x96xf32> to vector<8x32xf32>
    %278 = vector.extract_strided_slice %274 {offsets = [0, 32], sizes = [8, 32], strides = [1, 1]} : vector<8x96xf32> to vector<8x32xf32>
    %279 = vector.extract_strided_slice %274 {offsets = [0, 64], sizes = [8, 32], strides = [1, 1]} : vector<8x96xf32> to vector<8x32xf32>
    %280 = arith.mulf %278, %214 : vector<8x32xf32>
    %281 = arith.mulf %277, %276 : vector<8x32xf32>
    %282 = arith.addf %280, %281 : vector<8x32xf32>
    %283 = math.tanh %282 : vector<8x32xf32>
    %284 = arith.mulf %279, %283 : vector<8x32xf32>
    %285 = vector.extract_strided_slice %6 {offsets = [32, 0], sizes = [8, 128], strides = [1, 1]} : vector<64x128xf32> to vector<8x128xf32>
    %c0_100 = arith.constant 0 : index
    %c0_101 = arith.constant 0 : index
    %286 = vector.load %arg3[%c0_100, %c0_101] : memref<32x128xf32, #tpu.memory_space<vmem>>, vector<32x128xf32>
    %cst_102 = arith.constant dense<0.000000e+00> : vector<8x128xf32>
    %287 = tpu.matmul %236, %286, %cst_102 {dimension_numbers = #tpu.dot_dimension_numbers<[1], [0], [0], [1], [0, 0, 1, 1], [], []>} : vector<8x32xf32>, vector<32x128xf32>, vector<8x128xf32> -> vector<8x128xf32>
    %288 = arith.addf %285, %287 : vector<8x128xf32>
    %289 = vector.extract_strided_slice %288 {offsets = [0, 0], sizes = [8, 96], strides = [1, 1]} : vector<8x128xf32> to vector<8x96xf32>
    %290 = arith.negf %289 : vector<8x96xf32>
    %291 = math.exp %290 : vector<8x96xf32>
    %cst_103 = arith.constant 1.000000e+00 : f32
    %292 = vector.broadcast %cst_103 : f32 to vector<8x96xf32>
    %293 = arith.addf %292, %291 : vector<8x96xf32>
    %294 = arith.divf %292, %293 : vector<8x96xf32>
    %295 = vector.extract_strided_slice %288 {offsets = [0, 96], sizes = [8, 32], strides = [1, 1]} : vector<8x128xf32> to vector<8x32xf32>
    %296 = math.tanh %295 : vector<8x32xf32>
    %297 = vector.extract_strided_slice %294 {offsets = [0, 0], sizes = [8, 32], strides = [1, 1]} : vector<8x96xf32> to vector<8x32xf32>
    %298 = vector.extract_strided_slice %294 {offsets = [0, 32], sizes = [8, 32], strides = [1, 1]} : vector<8x96xf32> to vector<8x32xf32>
    %299 = vector.extract_strided_slice %294 {offsets = [0, 64], sizes = [8, 32], strides = [1, 1]} : vector<8x96xf32> to vector<8x32xf32>
    %300 = arith.mulf %298, %234 : vector<8x32xf32>
    %301 = arith.mulf %297, %296 : vector<8x32xf32>
    %302 = arith.addf %300, %301 : vector<8x32xf32>
    %303 = math.tanh %302 : vector<8x32xf32>
    %304 = arith.mulf %299, %303 : vector<8x32xf32>
    %c0_104 = arith.constant 0 : index
    %c0_105 = arith.constant 0 : index
    %305 = vector.load %arg5[%c0_104, %c0_105] : memref<32x128xf32, #tpu.memory_space<vmem>>, vector<32x128xf32>
    %cst_106 = arith.constant dense<0.000000e+00> : vector<8x128xf32>
    %306 = tpu.matmul %304, %305, %cst_106 {dimension_numbers = #tpu.dot_dimension_numbers<[1], [0], [0], [1], [0, 0, 1, 1], [], []>} : vector<8x32xf32>, vector<32x128xf32>, vector<8x128xf32> -> vector<8x128xf32>
    %c0_107 = arith.constant 0 : index
    %c0_108 = arith.constant 0 : index
    %307 = vector.load %arg6[%c0_107, %c0_108] : memref<32x128xf32, #tpu.memory_space<vmem>>, vector<32x128xf32>
    %cst_109 = arith.constant dense<0.000000e+00> : vector<8x128xf32>
    %308 = tpu.matmul %260, %307, %cst_109 {dimension_numbers = #tpu.dot_dimension_numbers<[1], [0], [0], [1], [0, 0, 1, 1], [], []>} : vector<8x32xf32>, vector<32x128xf32>, vector<8x128xf32> -> vector<8x128xf32>
    %309 = arith.addf %306, %308 : vector<8x128xf32>
    %c0_110 = arith.constant 0 : index
    %c0_111 = arith.constant 0 : index
    %310 = vector.load %arg7[%c0_110, %c0_111] : memref<1x128xf32, #tpu.memory_space<vmem>>, vector<1x128xf32>
    %311 = vector.broadcast %310 : vector<1x128xf32> to vector<8x128xf32>
    %312 = arith.addf %309, %311 : vector<8x128xf32>
    %313 = vector.extract_strided_slice %312 {offsets = [0, 0], sizes = [8, 96], strides = [1, 1]} : vector<8x128xf32> to vector<8x96xf32>
    %314 = arith.negf %313 : vector<8x96xf32>
    %315 = math.exp %314 : vector<8x96xf32>
    %cst_112 = arith.constant 1.000000e+00 : f32
    %316 = vector.broadcast %cst_112 : f32 to vector<8x96xf32>
    %317 = arith.addf %316, %315 : vector<8x96xf32>
    %318 = arith.divf %316, %317 : vector<8x96xf32>
    %319 = vector.extract_strided_slice %312 {offsets = [0, 96], sizes = [8, 32], strides = [1, 1]} : vector<8x128xf32> to vector<8x32xf32>
    %320 = math.tanh %319 : vector<8x32xf32>
    %321 = vector.extract_strided_slice %318 {offsets = [0, 0], sizes = [8, 32], strides = [1, 1]} : vector<8x96xf32> to vector<8x32xf32>
    %322 = vector.extract_strided_slice %318 {offsets = [0, 32], sizes = [8, 32], strides = [1, 1]} : vector<8x96xf32> to vector<8x32xf32>
    %323 = vector.extract_strided_slice %318 {offsets = [0, 64], sizes = [8, 32], strides = [1, 1]} : vector<8x96xf32> to vector<8x32xf32>
    %324 = arith.mulf %322, %258 : vector<8x32xf32>
    %325 = arith.mulf %321, %320 : vector<8x32xf32>
    %326 = arith.addf %324, %325 : vector<8x32xf32>
    %327 = math.tanh %326 : vector<8x32xf32>
    %328 = arith.mulf %323, %327 : vector<8x32xf32>
    %c0_113 = arith.constant 0 : index
    %c0_114 = arith.constant 0 : index
    %329 = vector.load %arg8[%c0_113, %c0_114] : memref<32x128xf32, #tpu.memory_space<vmem>>, vector<32x128xf32>
    %cst_115 = arith.constant dense<0.000000e+00> : vector<8x128xf32>
    %330 = tpu.matmul %328, %329, %cst_115 {dimension_numbers = #tpu.dot_dimension_numbers<[1], [0], [0], [1], [0, 0, 1, 1], [], []>} : vector<8x32xf32>, vector<32x128xf32>, vector<8x128xf32> -> vector<8x128xf32>
    %c0_116 = arith.constant 0 : index
    %c0_117 = arith.constant 0 : index
    %331 = vector.load %arg9[%c0_116, %c0_117] : memref<32x128xf32, #tpu.memory_space<vmem>>, vector<32x128xf32>
    %cst_118 = arith.constant dense<0.000000e+00> : vector<8x128xf32>
    %332 = tpu.matmul %284, %331, %cst_118 {dimension_numbers = #tpu.dot_dimension_numbers<[1], [0], [0], [1], [0, 0, 1, 1], [], []>} : vector<8x32xf32>, vector<32x128xf32>, vector<8x128xf32> -> vector<8x128xf32>
    %333 = arith.addf %330, %332 : vector<8x128xf32>
    %c0_119 = arith.constant 0 : index
    %c0_120 = arith.constant 0 : index
    %334 = vector.load %arg10[%c0_119, %c0_120] : memref<1x128xf32, #tpu.memory_space<vmem>>, vector<1x128xf32>
    %335 = vector.broadcast %334 : vector<1x128xf32> to vector<8x128xf32>
    %336 = arith.addf %333, %335 : vector<8x128xf32>
    %337 = vector.extract_strided_slice %336 {offsets = [0, 0], sizes = [8, 96], strides = [1, 1]} : vector<8x128xf32> to vector<8x96xf32>
    %338 = arith.negf %337 : vector<8x96xf32>
    %339 = math.exp %338 : vector<8x96xf32>
    %cst_121 = arith.constant 1.000000e+00 : f32
    %340 = vector.broadcast %cst_121 : f32 to vector<8x96xf32>
    %341 = arith.addf %340, %339 : vector<8x96xf32>
    %342 = arith.divf %340, %341 : vector<8x96xf32>
    %343 = vector.extract_strided_slice %336 {offsets = [0, 96], sizes = [8, 32], strides = [1, 1]} : vector<8x128xf32> to vector<8x32xf32>
    %344 = math.tanh %343 : vector<8x32xf32>
    %345 = vector.extract_strided_slice %342 {offsets = [0, 0], sizes = [8, 32], strides = [1, 1]} : vector<8x96xf32> to vector<8x32xf32>
    %346 = vector.extract_strided_slice %342 {offsets = [0, 32], sizes = [8, 32], strides = [1, 1]} : vector<8x96xf32> to vector<8x32xf32>
    %347 = vector.extract_strided_slice %342 {offsets = [0, 64], sizes = [8, 32], strides = [1, 1]} : vector<8x96xf32> to vector<8x32xf32>
    %348 = arith.mulf %346, %282 : vector<8x32xf32>
    %349 = arith.mulf %345, %344 : vector<8x32xf32>
    %350 = arith.addf %348, %349 : vector<8x32xf32>
    %351 = math.tanh %350 : vector<8x32xf32>
    %352 = arith.mulf %347, %351 : vector<8x32xf32>
    %353 = vector.extract_strided_slice %6 {offsets = [40, 0], sizes = [8, 128], strides = [1, 1]} : vector<64x128xf32> to vector<8x128xf32>
    %c0_122 = arith.constant 0 : index
    %c0_123 = arith.constant 0 : index
    %354 = vector.load %arg3[%c0_122, %c0_123] : memref<32x128xf32, #tpu.memory_space<vmem>>, vector<32x128xf32>
    %cst_124 = arith.constant dense<0.000000e+00> : vector<8x128xf32>
    %355 = tpu.matmul %304, %354, %cst_124 {dimension_numbers = #tpu.dot_dimension_numbers<[1], [0], [0], [1], [0, 0, 1, 1], [], []>} : vector<8x32xf32>, vector<32x128xf32>, vector<8x128xf32> -> vector<8x128xf32>
    %356 = arith.addf %353, %355 : vector<8x128xf32>
    %357 = vector.extract_strided_slice %356 {offsets = [0, 0], sizes = [8, 96], strides = [1, 1]} : vector<8x128xf32> to vector<8x96xf32>
    %358 = arith.negf %357 : vector<8x96xf32>
    %359 = math.exp %358 : vector<8x96xf32>
    %cst_125 = arith.constant 1.000000e+00 : f32
    %360 = vector.broadcast %cst_125 : f32 to vector<8x96xf32>
    %361 = arith.addf %360, %359 : vector<8x96xf32>
    %362 = arith.divf %360, %361 : vector<8x96xf32>
    %363 = vector.extract_strided_slice %356 {offsets = [0, 96], sizes = [8, 32], strides = [1, 1]} : vector<8x128xf32> to vector<8x32xf32>
    %364 = math.tanh %363 : vector<8x32xf32>
    %365 = vector.extract_strided_slice %362 {offsets = [0, 0], sizes = [8, 32], strides = [1, 1]} : vector<8x96xf32> to vector<8x32xf32>
    %366 = vector.extract_strided_slice %362 {offsets = [0, 32], sizes = [8, 32], strides = [1, 1]} : vector<8x96xf32> to vector<8x32xf32>
    %367 = vector.extract_strided_slice %362 {offsets = [0, 64], sizes = [8, 32], strides = [1, 1]} : vector<8x96xf32> to vector<8x32xf32>
    %368 = arith.mulf %366, %302 : vector<8x32xf32>
    %369 = arith.mulf %365, %364 : vector<8x32xf32>
    %370 = arith.addf %368, %369 : vector<8x32xf32>
    %371 = math.tanh %370 : vector<8x32xf32>
    %372 = arith.mulf %367, %371 : vector<8x32xf32>
    %c0_126 = arith.constant 0 : index
    %c0_127 = arith.constant 0 : index
    %373 = vector.load %arg5[%c0_126, %c0_127] : memref<32x128xf32, #tpu.memory_space<vmem>>, vector<32x128xf32>
    %cst_128 = arith.constant dense<0.000000e+00> : vector<8x128xf32>
    %374 = tpu.matmul %372, %373, %cst_128 {dimension_numbers = #tpu.dot_dimension_numbers<[1], [0], [0], [1], [0, 0, 1, 1], [], []>} : vector<8x32xf32>, vector<32x128xf32>, vector<8x128xf32> -> vector<8x128xf32>
    %c0_129 = arith.constant 0 : index
    %c0_130 = arith.constant 0 : index
    %375 = vector.load %arg6[%c0_129, %c0_130] : memref<32x128xf32, #tpu.memory_space<vmem>>, vector<32x128xf32>
    %cst_131 = arith.constant dense<0.000000e+00> : vector<8x128xf32>
    %376 = tpu.matmul %328, %375, %cst_131 {dimension_numbers = #tpu.dot_dimension_numbers<[1], [0], [0], [1], [0, 0, 1, 1], [], []>} : vector<8x32xf32>, vector<32x128xf32>, vector<8x128xf32> -> vector<8x128xf32>
    %377 = arith.addf %374, %376 : vector<8x128xf32>
    %c0_132 = arith.constant 0 : index
    %c0_133 = arith.constant 0 : index
    %378 = vector.load %arg7[%c0_132, %c0_133] : memref<1x128xf32, #tpu.memory_space<vmem>>, vector<1x128xf32>
    %379 = vector.broadcast %378 : vector<1x128xf32> to vector<8x128xf32>
    %380 = arith.addf %377, %379 : vector<8x128xf32>
    %381 = vector.extract_strided_slice %380 {offsets = [0, 0], sizes = [8, 96], strides = [1, 1]} : vector<8x128xf32> to vector<8x96xf32>
    %382 = arith.negf %381 : vector<8x96xf32>
    %383 = math.exp %382 : vector<8x96xf32>
    %cst_134 = arith.constant 1.000000e+00 : f32
    %384 = vector.broadcast %cst_134 : f32 to vector<8x96xf32>
    %385 = arith.addf %384, %383 : vector<8x96xf32>
    %386 = arith.divf %384, %385 : vector<8x96xf32>
    %387 = vector.extract_strided_slice %380 {offsets = [0, 96], sizes = [8, 32], strides = [1, 1]} : vector<8x128xf32> to vector<8x32xf32>
    %388 = math.tanh %387 : vector<8x32xf32>
    %389 = vector.extract_strided_slice %386 {offsets = [0, 0], sizes = [8, 32], strides = [1, 1]} : vector<8x96xf32> to vector<8x32xf32>
    %390 = vector.extract_strided_slice %386 {offsets = [0, 32], sizes = [8, 32], strides = [1, 1]} : vector<8x96xf32> to vector<8x32xf32>
    %391 = vector.extract_strided_slice %386 {offsets = [0, 64], sizes = [8, 32], strides = [1, 1]} : vector<8x96xf32> to vector<8x32xf32>
    %392 = arith.mulf %390, %326 : vector<8x32xf32>
    %393 = arith.mulf %389, %388 : vector<8x32xf32>
    %394 = arith.addf %392, %393 : vector<8x32xf32>
    %395 = math.tanh %394 : vector<8x32xf32>
    %396 = arith.mulf %391, %395 : vector<8x32xf32>
    %c0_135 = arith.constant 0 : index
    %c0_136 = arith.constant 0 : index
    %397 = vector.load %arg8[%c0_135, %c0_136] : memref<32x128xf32, #tpu.memory_space<vmem>>, vector<32x128xf32>
    %cst_137 = arith.constant dense<0.000000e+00> : vector<8x128xf32>
    %398 = tpu.matmul %396, %397, %cst_137 {dimension_numbers = #tpu.dot_dimension_numbers<[1], [0], [0], [1], [0, 0, 1, 1], [], []>} : vector<8x32xf32>, vector<32x128xf32>, vector<8x128xf32> -> vector<8x128xf32>
    %c0_138 = arith.constant 0 : index
    %c0_139 = arith.constant 0 : index
    %399 = vector.load %arg9[%c0_138, %c0_139] : memref<32x128xf32, #tpu.memory_space<vmem>>, vector<32x128xf32>
    %cst_140 = arith.constant dense<0.000000e+00> : vector<8x128xf32>
    %400 = tpu.matmul %352, %399, %cst_140 {dimension_numbers = #tpu.dot_dimension_numbers<[1], [0], [0], [1], [0, 0, 1, 1], [], []>} : vector<8x32xf32>, vector<32x128xf32>, vector<8x128xf32> -> vector<8x128xf32>
    %401 = arith.addf %398, %400 : vector<8x128xf32>
    %c0_141 = arith.constant 0 : index
    %c0_142 = arith.constant 0 : index
    %402 = vector.load %arg10[%c0_141, %c0_142] : memref<1x128xf32, #tpu.memory_space<vmem>>, vector<1x128xf32>
    %403 = vector.broadcast %402 : vector<1x128xf32> to vector<8x128xf32>
    %404 = arith.addf %401, %403 : vector<8x128xf32>
    %405 = vector.extract_strided_slice %404 {offsets = [0, 0], sizes = [8, 96], strides = [1, 1]} : vector<8x128xf32> to vector<8x96xf32>
    %406 = arith.negf %405 : vector<8x96xf32>
    %407 = math.exp %406 : vector<8x96xf32>
    %cst_143 = arith.constant 1.000000e+00 : f32
    %408 = vector.broadcast %cst_143 : f32 to vector<8x96xf32>
    %409 = arith.addf %408, %407 : vector<8x96xf32>
    %410 = arith.divf %408, %409 : vector<8x96xf32>
    %411 = vector.extract_strided_slice %404 {offsets = [0, 96], sizes = [8, 32], strides = [1, 1]} : vector<8x128xf32> to vector<8x32xf32>
    %412 = math.tanh %411 : vector<8x32xf32>
    %413 = vector.extract_strided_slice %410 {offsets = [0, 0], sizes = [8, 32], strides = [1, 1]} : vector<8x96xf32> to vector<8x32xf32>
    %414 = vector.extract_strided_slice %410 {offsets = [0, 32], sizes = [8, 32], strides = [1, 1]} : vector<8x96xf32> to vector<8x32xf32>
    %415 = vector.extract_strided_slice %410 {offsets = [0, 64], sizes = [8, 32], strides = [1, 1]} : vector<8x96xf32> to vector<8x32xf32>
    %416 = arith.mulf %414, %350 : vector<8x32xf32>
    %417 = arith.mulf %413, %412 : vector<8x32xf32>
    %418 = arith.addf %416, %417 : vector<8x32xf32>
    %419 = math.tanh %418 : vector<8x32xf32>
    %420 = arith.mulf %415, %419 : vector<8x32xf32>
    %421 = vector.extract_strided_slice %6 {offsets = [48, 0], sizes = [8, 128], strides = [1, 1]} : vector<64x128xf32> to vector<8x128xf32>
    %c0_144 = arith.constant 0 : index
    %c0_145 = arith.constant 0 : index
    %422 = vector.load %arg3[%c0_144, %c0_145] : memref<32x128xf32, #tpu.memory_space<vmem>>, vector<32x128xf32>
    %cst_146 = arith.constant dense<0.000000e+00> : vector<8x128xf32>
    %423 = tpu.matmul %372, %422, %cst_146 {dimension_numbers = #tpu.dot_dimension_numbers<[1], [0], [0], [1], [0, 0, 1, 1], [], []>} : vector<8x32xf32>, vector<32x128xf32>, vector<8x128xf32> -> vector<8x128xf32>
    %424 = arith.addf %421, %423 : vector<8x128xf32>
    %425 = vector.extract_strided_slice %424 {offsets = [0, 0], sizes = [8, 96], strides = [1, 1]} : vector<8x128xf32> to vector<8x96xf32>
    %426 = arith.negf %425 : vector<8x96xf32>
    %427 = math.exp %426 : vector<8x96xf32>
    %cst_147 = arith.constant 1.000000e+00 : f32
    %428 = vector.broadcast %cst_147 : f32 to vector<8x96xf32>
    %429 = arith.addf %428, %427 : vector<8x96xf32>
    %430 = arith.divf %428, %429 : vector<8x96xf32>
    %431 = vector.extract_strided_slice %424 {offsets = [0, 96], sizes = [8, 32], strides = [1, 1]} : vector<8x128xf32> to vector<8x32xf32>
    %432 = math.tanh %431 : vector<8x32xf32>
    %433 = vector.extract_strided_slice %430 {offsets = [0, 0], sizes = [8, 32], strides = [1, 1]} : vector<8x96xf32> to vector<8x32xf32>
    %434 = vector.extract_strided_slice %430 {offsets = [0, 32], sizes = [8, 32], strides = [1, 1]} : vector<8x96xf32> to vector<8x32xf32>
    %435 = vector.extract_strided_slice %430 {offsets = [0, 64], sizes = [8, 32], strides = [1, 1]} : vector<8x96xf32> to vector<8x32xf32>
    %436 = arith.mulf %434, %370 : vector<8x32xf32>
    %437 = arith.mulf %433, %432 : vector<8x32xf32>
    %438 = arith.addf %436, %437 : vector<8x32xf32>
    %439 = math.tanh %438 : vector<8x32xf32>
    %440 = arith.mulf %435, %439 : vector<8x32xf32>
    %c0_148 = arith.constant 0 : index
    %c0_149 = arith.constant 0 : index
    %441 = vector.load %arg5[%c0_148, %c0_149] : memref<32x128xf32, #tpu.memory_space<vmem>>, vector<32x128xf32>
    %cst_150 = arith.constant dense<0.000000e+00> : vector<8x128xf32>
    %442 = tpu.matmul %440, %441, %cst_150 {dimension_numbers = #tpu.dot_dimension_numbers<[1], [0], [0], [1], [0, 0, 1, 1], [], []>} : vector<8x32xf32>, vector<32x128xf32>, vector<8x128xf32> -> vector<8x128xf32>
    %c0_151 = arith.constant 0 : index
    %c0_152 = arith.constant 0 : index
    %443 = vector.load %arg6[%c0_151, %c0_152] : memref<32x128xf32, #tpu.memory_space<vmem>>, vector<32x128xf32>
    %cst_153 = arith.constant dense<0.000000e+00> : vector<8x128xf32>
    %444 = tpu.matmul %396, %443, %cst_153 {dimension_numbers = #tpu.dot_dimension_numbers<[1], [0], [0], [1], [0, 0, 1, 1], [], []>} : vector<8x32xf32>, vector<32x128xf32>, vector<8x128xf32> -> vector<8x128xf32>
    %445 = arith.addf %442, %444 : vector<8x128xf32>
    %c0_154 = arith.constant 0 : index
    %c0_155 = arith.constant 0 : index
    %446 = vector.load %arg7[%c0_154, %c0_155] : memref<1x128xf32, #tpu.memory_space<vmem>>, vector<1x128xf32>
    %447 = vector.broadcast %446 : vector<1x128xf32> to vector<8x128xf32>
    %448 = arith.addf %445, %447 : vector<8x128xf32>
    %449 = vector.extract_strided_slice %448 {offsets = [0, 0], sizes = [8, 96], strides = [1, 1]} : vector<8x128xf32> to vector<8x96xf32>
    %450 = arith.negf %449 : vector<8x96xf32>
    %451 = math.exp %450 : vector<8x96xf32>
    %cst_156 = arith.constant 1.000000e+00 : f32
    %452 = vector.broadcast %cst_156 : f32 to vector<8x96xf32>
    %453 = arith.addf %452, %451 : vector<8x96xf32>
    %454 = arith.divf %452, %453 : vector<8x96xf32>
    %455 = vector.extract_strided_slice %448 {offsets = [0, 96], sizes = [8, 32], strides = [1, 1]} : vector<8x128xf32> to vector<8x32xf32>
    %456 = math.tanh %455 : vector<8x32xf32>
    %457 = vector.extract_strided_slice %454 {offsets = [0, 0], sizes = [8, 32], strides = [1, 1]} : vector<8x96xf32> to vector<8x32xf32>
    %458 = vector.extract_strided_slice %454 {offsets = [0, 32], sizes = [8, 32], strides = [1, 1]} : vector<8x96xf32> to vector<8x32xf32>
    %459 = vector.extract_strided_slice %454 {offsets = [0, 64], sizes = [8, 32], strides = [1, 1]} : vector<8x96xf32> to vector<8x32xf32>
    %460 = arith.mulf %458, %394 : vector<8x32xf32>
    %461 = arith.mulf %457, %456 : vector<8x32xf32>
    %462 = arith.addf %460, %461 : vector<8x32xf32>
    %463 = math.tanh %462 : vector<8x32xf32>
    %464 = arith.mulf %459, %463 : vector<8x32xf32>
    %c0_157 = arith.constant 0 : index
    %c0_158 = arith.constant 0 : index
    %465 = vector.load %arg8[%c0_157, %c0_158] : memref<32x128xf32, #tpu.memory_space<vmem>>, vector<32x128xf32>
    %cst_159 = arith.constant dense<0.000000e+00> : vector<8x128xf32>
    %466 = tpu.matmul %464, %465, %cst_159 {dimension_numbers = #tpu.dot_dimension_numbers<[1], [0], [0], [1], [0, 0, 1, 1], [], []>} : vector<8x32xf32>, vector<32x128xf32>, vector<8x128xf32> -> vector<8x128xf32>
    %c0_160 = arith.constant 0 : index
    %c0_161 = arith.constant 0 : index
    %467 = vector.load %arg9[%c0_160, %c0_161] : memref<32x128xf32, #tpu.memory_space<vmem>>, vector<32x128xf32>
    %cst_162 = arith.constant dense<0.000000e+00> : vector<8x128xf32>
    %468 = tpu.matmul %420, %467, %cst_162 {dimension_numbers = #tpu.dot_dimension_numbers<[1], [0], [0], [1], [0, 0, 1, 1], [], []>} : vector<8x32xf32>, vector<32x128xf32>, vector<8x128xf32> -> vector<8x128xf32>
    %469 = arith.addf %466, %468 : vector<8x128xf32>
    %c0_163 = arith.constant 0 : index
    %c0_164 = arith.constant 0 : index
    %470 = vector.load %arg10[%c0_163, %c0_164] : memref<1x128xf32, #tpu.memory_space<vmem>>, vector<1x128xf32>
    %471 = vector.broadcast %470 : vector<1x128xf32> to vector<8x128xf32>
    %472 = arith.addf %469, %471 : vector<8x128xf32>
    %473 = vector.extract_strided_slice %472 {offsets = [0, 0], sizes = [8, 96], strides = [1, 1]} : vector<8x128xf32> to vector<8x96xf32>
    %474 = arith.negf %473 : vector<8x96xf32>
    %475 = math.exp %474 : vector<8x96xf32>
    %cst_165 = arith.constant 1.000000e+00 : f32
    %476 = vector.broadcast %cst_165 : f32 to vector<8x96xf32>
    %477 = arith.addf %476, %475 : vector<8x96xf32>
    %478 = arith.divf %476, %477 : vector<8x96xf32>
    %479 = vector.extract_strided_slice %472 {offsets = [0, 96], sizes = [8, 32], strides = [1, 1]} : vector<8x128xf32> to vector<8x32xf32>
    %480 = math.tanh %479 : vector<8x32xf32>
    %481 = vector.extract_strided_slice %478 {offsets = [0, 0], sizes = [8, 32], strides = [1, 1]} : vector<8x96xf32> to vector<8x32xf32>
    %482 = vector.extract_strided_slice %478 {offsets = [0, 32], sizes = [8, 32], strides = [1, 1]} : vector<8x96xf32> to vector<8x32xf32>
    %483 = vector.extract_strided_slice %478 {offsets = [0, 64], sizes = [8, 32], strides = [1, 1]} : vector<8x96xf32> to vector<8x32xf32>
    %484 = arith.mulf %482, %418 : vector<8x32xf32>
    %485 = arith.mulf %481, %480 : vector<8x32xf32>
    %486 = arith.addf %484, %485 : vector<8x32xf32>
    %487 = math.tanh %486 : vector<8x32xf32>
    %488 = arith.mulf %483, %487 : vector<8x32xf32>
    %489 = vector.extract_strided_slice %6 {offsets = [56, 0], sizes = [8, 128], strides = [1, 1]} : vector<64x128xf32> to vector<8x128xf32>
    %c0_166 = arith.constant 0 : index
    %c0_167 = arith.constant 0 : index
    %490 = vector.load %arg3[%c0_166, %c0_167] : memref<32x128xf32, #tpu.memory_space<vmem>>, vector<32x128xf32>
    %cst_168 = arith.constant dense<0.000000e+00> : vector<8x128xf32>
    %491 = tpu.matmul %440, %490, %cst_168 {dimension_numbers = #tpu.dot_dimension_numbers<[1], [0], [0], [1], [0, 0, 1, 1], [], []>} : vector<8x32xf32>, vector<32x128xf32>, vector<8x128xf32> -> vector<8x128xf32>
    %492 = arith.addf %489, %491 : vector<8x128xf32>
    %493 = vector.extract_strided_slice %492 {offsets = [0, 0], sizes = [8, 96], strides = [1, 1]} : vector<8x128xf32> to vector<8x96xf32>
    %494 = arith.negf %493 : vector<8x96xf32>
    %495 = math.exp %494 : vector<8x96xf32>
    %cst_169 = arith.constant 1.000000e+00 : f32
    %496 = vector.broadcast %cst_169 : f32 to vector<8x96xf32>
    %497 = arith.addf %496, %495 : vector<8x96xf32>
    %498 = arith.divf %496, %497 : vector<8x96xf32>
    %499 = vector.extract_strided_slice %492 {offsets = [0, 96], sizes = [8, 32], strides = [1, 1]} : vector<8x128xf32> to vector<8x32xf32>
    %500 = math.tanh %499 : vector<8x32xf32>
    %501 = vector.extract_strided_slice %498 {offsets = [0, 0], sizes = [8, 32], strides = [1, 1]} : vector<8x96xf32> to vector<8x32xf32>
    %502 = vector.extract_strided_slice %498 {offsets = [0, 32], sizes = [8, 32], strides = [1, 1]} : vector<8x96xf32> to vector<8x32xf32>
    %503 = vector.extract_strided_slice %498 {offsets = [0, 64], sizes = [8, 32], strides = [1, 1]} : vector<8x96xf32> to vector<8x32xf32>
    %504 = arith.mulf %502, %438 : vector<8x32xf32>
    %505 = arith.mulf %501, %500 : vector<8x32xf32>
    %506 = arith.addf %504, %505 : vector<8x32xf32>
    %507 = math.tanh %506 : vector<8x32xf32>
    %508 = arith.mulf %503, %507 : vector<8x32xf32>
    %c0_170 = arith.constant 0 : index
    %c0_171 = arith.constant 0 : index
    %509 = vector.load %arg5[%c0_170, %c0_171] : memref<32x128xf32, #tpu.memory_space<vmem>>, vector<32x128xf32>
    %cst_172 = arith.constant dense<0.000000e+00> : vector<8x128xf32>
    %510 = tpu.matmul %508, %509, %cst_172 {dimension_numbers = #tpu.dot_dimension_numbers<[1], [0], [0], [1], [0, 0, 1, 1], [], []>} : vector<8x32xf32>, vector<32x128xf32>, vector<8x128xf32> -> vector<8x128xf32>
    %c0_173 = arith.constant 0 : index
    %c0_174 = arith.constant 0 : index
    %511 = vector.load %arg6[%c0_173, %c0_174] : memref<32x128xf32, #tpu.memory_space<vmem>>, vector<32x128xf32>
    %cst_175 = arith.constant dense<0.000000e+00> : vector<8x128xf32>
    %512 = tpu.matmul %464, %511, %cst_175 {dimension_numbers = #tpu.dot_dimension_numbers<[1], [0], [0], [1], [0, 0, 1, 1], [], []>} : vector<8x32xf32>, vector<32x128xf32>, vector<8x128xf32> -> vector<8x128xf32>
    %513 = arith.addf %510, %512 : vector<8x128xf32>
    %c0_176 = arith.constant 0 : index
    %c0_177 = arith.constant 0 : index
    %514 = vector.load %arg7[%c0_176, %c0_177] : memref<1x128xf32, #tpu.memory_space<vmem>>, vector<1x128xf32>
    %515 = vector.broadcast %514 : vector<1x128xf32> to vector<8x128xf32>
    %516 = arith.addf %513, %515 : vector<8x128xf32>
    %517 = vector.extract_strided_slice %516 {offsets = [0, 0], sizes = [8, 96], strides = [1, 1]} : vector<8x128xf32> to vector<8x96xf32>
    %518 = arith.negf %517 : vector<8x96xf32>
    %519 = math.exp %518 : vector<8x96xf32>
    %cst_178 = arith.constant 1.000000e+00 : f32
    %520 = vector.broadcast %cst_178 : f32 to vector<8x96xf32>
    %521 = arith.addf %520, %519 : vector<8x96xf32>
    %522 = arith.divf %520, %521 : vector<8x96xf32>
    %523 = vector.extract_strided_slice %516 {offsets = [0, 96], sizes = [8, 32], strides = [1, 1]} : vector<8x128xf32> to vector<8x32xf32>
    %524 = math.tanh %523 : vector<8x32xf32>
    %525 = vector.extract_strided_slice %522 {offsets = [0, 0], sizes = [8, 32], strides = [1, 1]} : vector<8x96xf32> to vector<8x32xf32>
    %526 = vector.extract_strided_slice %522 {offsets = [0, 32], sizes = [8, 32], strides = [1, 1]} : vector<8x96xf32> to vector<8x32xf32>
    %527 = vector.extract_strided_slice %522 {offsets = [0, 64], sizes = [8, 32], strides = [1, 1]} : vector<8x96xf32> to vector<8x32xf32>
    %528 = arith.mulf %526, %462 : vector<8x32xf32>
    %529 = arith.mulf %525, %524 : vector<8x32xf32>
    %530 = arith.addf %528, %529 : vector<8x32xf32>
    %531 = math.tanh %530 : vector<8x32xf32>
    %532 = arith.mulf %527, %531 : vector<8x32xf32>
    %c0_179 = arith.constant 0 : index
    %c0_180 = arith.constant 0 : index
    %533 = vector.load %arg8[%c0_179, %c0_180] : memref<32x128xf32, #tpu.memory_space<vmem>>, vector<32x128xf32>
    %cst_181 = arith.constant dense<0.000000e+00> : vector<8x128xf32>
    %534 = tpu.matmul %532, %533, %cst_181 {dimension_numbers = #tpu.dot_dimension_numbers<[1], [0], [0], [1], [0, 0, 1, 1], [], []>} : vector<8x32xf32>, vector<32x128xf32>, vector<8x128xf32> -> vector<8x128xf32>
    %c0_182 = arith.constant 0 : index
    %c0_183 = arith.constant 0 : index
    %535 = vector.load %arg9[%c0_182, %c0_183] : memref<32x128xf32, #tpu.memory_space<vmem>>, vector<32x128xf32>
    %cst_184 = arith.constant dense<0.000000e+00> : vector<8x128xf32>
    %536 = tpu.matmul %488, %535, %cst_184 {dimension_numbers = #tpu.dot_dimension_numbers<[1], [0], [0], [1], [0, 0, 1, 1], [], []>} : vector<8x32xf32>, vector<32x128xf32>, vector<8x128xf32> -> vector<8x128xf32>
    %537 = arith.addf %534, %536 : vector<8x128xf32>
    %c0_185 = arith.constant 0 : index
    %c0_186 = arith.constant 0 : index
    %538 = vector.load %arg10[%c0_185, %c0_186] : memref<1x128xf32, #tpu.memory_space<vmem>>, vector<1x128xf32>
    %539 = vector.broadcast %538 : vector<1x128xf32> to vector<8x128xf32>
    %540 = arith.addf %537, %539 : vector<8x128xf32>
    %541 = vector.extract_strided_slice %540 {offsets = [0, 0], sizes = [8, 96], strides = [1, 1]} : vector<8x128xf32> to vector<8x96xf32>
    %542 = arith.negf %541 : vector<8x96xf32>
    %543 = math.exp %542 : vector<8x96xf32>
    %cst_187 = arith.constant 1.000000e+00 : f32
    %544 = vector.broadcast %cst_187 : f32 to vector<8x96xf32>
    %545 = arith.addf %544, %543 : vector<8x96xf32>
    %546 = arith.divf %544, %545 : vector<8x96xf32>
    %547 = vector.extract_strided_slice %540 {offsets = [0, 96], sizes = [8, 32], strides = [1, 1]} : vector<8x128xf32> to vector<8x32xf32>
    %548 = math.tanh %547 : vector<8x32xf32>
    %549 = vector.extract_strided_slice %546 {offsets = [0, 0], sizes = [8, 32], strides = [1, 1]} : vector<8x96xf32> to vector<8x32xf32>
    %550 = vector.extract_strided_slice %546 {offsets = [0, 32], sizes = [8, 32], strides = [1, 1]} : vector<8x96xf32> to vector<8x32xf32>
    %551 = vector.extract_strided_slice %546 {offsets = [0, 64], sizes = [8, 32], strides = [1, 1]} : vector<8x96xf32> to vector<8x32xf32>
    %552 = arith.mulf %550, %486 : vector<8x32xf32>
    %553 = arith.mulf %549, %548 : vector<8x32xf32>
    %554 = arith.addf %552, %553 : vector<8x32xf32>
    %555 = math.tanh %554 : vector<8x32xf32>
    %556 = arith.mulf %551, %555 : vector<8x32xf32>
    %c0_188 = arith.constant 0 : index
    %c0_189 = arith.constant 0 : index
    %557 = vector.load %arg11[%c0_188, %c0_189] : memref<1x32xf32, #tpu.memory_space<vmem>>, vector<1x32xf32>
    %558 = vector.broadcast %557 : vector<1x32xf32> to vector<8x32xf32>
    %559 = arith.mulf %556, %558 : vector<8x32xf32>
    %cst_190 = arith.constant dense<0.000000e+00> : vector<8xf32>
    %560 = vector.multi_reduction <add>, %559, %cst_190 [1] : vector<8x32xf32> to vector<8xf32>
    %561 = vector.shape_cast %560 : vector<8xf32> to vector<8x1xf32>
    %c0_191 = arith.constant 0 : index
    %c0_192 = arith.constant 0 : index
    %562 = vector.load %arg12[%c0_191, %c0_192] : memref<1x1xf32, #tpu.memory_space<vmem>>, vector<1x1xf32>
    %563 = vector.broadcast %562 : vector<1x1xf32> to vector<8x1xf32>
    %564 = arith.addf %561, %563 : vector<8x1xf32>
    %c0_193 = arith.constant 0 : index
    %c0_194 = arith.constant 0 : index
    %565 = vector.load %arg13[%c0_193, %c0_194] : memref<8x1xf32, #tpu.memory_space<vmem>>, vector<8x1xf32>
    tpu.vector_store %arg13[%c0_193, %c0_194], %564 {strides = array<i32>} : memref<8x1xf32, #tpu.memory_space<vmem>>, vector<8x1xf32>,
    return
  }
  func.func @transform_0(%arg0: i32) -> (i32, i32, i32) {
    %c0_i32 = arith.constant 0 : i32
    %c0_i32_0 = arith.constant 0 : i32
    %c0_i32_1 = arith.constant 0 : i32
    return %arg0, %c0_i32, %c0_i32_0 : i32, i32, i32
  }
  func.func @transform_1(%arg0: i32) -> (i32, i32) {
    %c0_i32 = arith.constant 0 : i32
    %c0_i32_0 = arith.constant 0 : i32
    %c0_i32_1 = arith.constant 0 : i32
    return %c0_i32, %c0_i32_0 : i32, i32
  }
  func.func @transform_2(%arg0: i32) -> (i32, i32) {
    %c0_i32 = arith.constant 0 : i32
    %c0_i32_0 = arith.constant 0 : i32
    %c0_i32_1 = arith.constant 0 : i32
    return %c0_i32, %c0_i32_0 : i32, i32
  }
  func.func @transform_3(%arg0: i32) -> (i32, i32) {
    %c0_i32 = arith.constant 0 : i32
    %c0_i32_0 = arith.constant 0 : i32
    %c0_i32_1 = arith.constant 0 : i32
    return %c0_i32, %c0_i32_0 : i32, i32
  }
  func.func @transform_4(%arg0: i32) -> (i32, i32) {
    %c0_i32 = arith.constant 0 : i32
    %c0_i32_0 = arith.constant 0 : i32
    %c0_i32_1 = arith.constant 0 : i32
    return %c0_i32, %c0_i32_0 : i32, i32
  }
  func.func @transform_5(%arg0: i32) -> (i32, i32) {
    %c0_i32 = arith.constant 0 : i32
    %c0_i32_0 = arith.constant 0 : i32
    %c0_i32_1 = arith.constant 0 : i32
    return %c0_i32, %c0_i32_0 : i32, i32
  }
  func.func @transform_6(%arg0: i32) -> (i32, i32) {
    %c0_i32 = arith.constant 0 : i32
    %c0_i32_0 = arith.constant 0 : i32
    %c0_i32_1 = arith.constant 0 : i32
    return %c0_i32, %c0_i32_0 : i32, i32
  }
  func.func @transform_7(%arg0: i32) -> (i32, i32) {
    %c0_i32 = arith.constant 0 : i32
    %c0_i32_0 = arith.constant 0 : i32
    %c0_i32_1 = arith.constant 0 : i32
    return %c0_i32, %c0_i32_0 : i32, i32
  }
  func.func @transform_8(%arg0: i32) -> (i32, i32) {
    %c0_i32 = arith.constant 0 : i32
    %c0_i32_0 = arith.constant 0 : i32
    %c0_i32_1 = arith.constant 0 : i32
    return %c0_i32, %c0_i32_0 : i32, i32
  }
  func.func @transform_9(%arg0: i32) -> (i32, i32) {
    %c0_i32 = arith.constant 0 : i32
    %c0_i32_0 = arith.constant 0 : i32
    %c0_i32_1 = arith.constant 0 : i32
    return %c0_i32, %c0_i32_0 : i32, i32
  }
  func.func @transform_10(%arg0: i32) -> (i32, i32) {
    %c0_i32 = arith.constant 0 : i32
    %c0_i32_0 = arith.constant 0 : i32
    %c0_i32_1 = arith.constant 0 : i32
    return %c0_i32, %c0_i32_0 : i32, i32
  }
  func.func @transform_11(%arg0: i32) -> (i32, i32) {
    %c0_i32 = arith.constant 0 : i32
    %c0_i32_0 = arith.constant 0 : i32
    %c0_i32_1 = arith.constant 0 : i32
    return %c0_i32, %c0_i32_0 : i32, i32
  }
  func.func @transform_12(%arg0: i32) -> (i32, i32) {
    %c0_i32 = arith.constant 0 : i32
    %c0_i32_0 = arith.constant 0 : i32
    return %arg0, %c0_i32 : i32, i32
  }
}

</mosaic_0001>

<bundles_post_ra>
// kernel: tpu_custom_call.1
= control target key start
LH: loop header
LB: loop body
LE: loop exit
PB: predicated region body
PF: predicated region fallthrough
CT: control target
= control target key end

     0   :  { %s5832_s0 = inlined_call_operand.vmem [shape: f32[1,64,6], index: 0, kind: input, shape index: {}]   ;;  %s5833_s1 = inlined_call_operand.vmem [shape: f32[6,128], index: 1, kind: input, shape index: {}]   ;;  %s5834_s2 = inlined_call_operand.vmem [shape: f32[32,128], index: 2, kind: input, shape index: {}]   ;;  %s5835_s3 = inlined_call_operand.vmem [shape: f32[1,128], index: 3, kind: input, shape index: {}]   ;;  %s5836_s4 = inlined_call_operand.vmem [shape: f32[32,128], index: 4, kind: input, shape index: {}]   ;;  %s5837_s5 = inlined_call_operand.hbm [shape: f32[32,128], index: 5, kind: input, shape index: {}]   ;;  %s5838_s6 = inlined_call_operand.vmem [shape: f32[1,128], index: 6, kind: input, shape index: {}]   ;;  %s5839_s7 = inlined_call_operand.hbm [shape: f32[32,128], index: 7, kind: input, shape index: {}]   ;;  %s5840_s8 = inlined_call_operand.hbm [shape: f32[32,128], index: 8, kind: input, shape index: {}]   ;;  %s5841_s9 = inlined_call_operand.vmem [shape: f32[1,128], index: 9, kind: input, shape index: {}]   ;;  %s5842_s10 = inlined_call_operand.vmem [shape: f32[1,32], index: 10, kind: input, shape index: {}]   ;;  %s5843_s11 = inlined_call_operand.<no memory space> [shape: f32[1,1], index: 11, kind: input, shape index: {}]   ;;  %s5844_s12 = inlined_call_operand.vmem [shape: f32[8,1], index: 12, kind: output, shape index: {}]  }
   0x1   :  { %v17_v0 = vstv %s5843_s11 }
   0x2   :  { %18 = vst [vmem:[#allocation2] sm:$0x1] %v17_v0 }
   0x3   :  { %19 = vsyncpa [#allocation4], 0 }
   0x4   :  { %20 = vsyncpa [#allocation6], 0  ;;  %s4846_s23 = smov [#allocation5]   ;;  %s4847_s25 = smov [#allocation3]  }
   0x5   :  { %s50_s24 = sshll.u32 %s4846_s23, 4  ;;  %s36_s26 = sshll.u32 %s4847_s25, 4  ;;  %s51_s24 = int_to_ptr.vmem [resolvable:$true] %s50_s24  ;;  %s37_s26 = int_to_ptr.vmem [resolvable:$true] %s36_s26 }
   0x6   :  { %s4790_s27 = scalar_lea.vmem %s51_s24, 512  ;;  %p4795_p1 = scmp.lt.s32.totalorder %s51_s24, %s51_s24 }
   0x7   :  { %p4791_p0 = scmp.ne.s32.totalorder %s51_s24, %s4790_s27  ;;  %p4796_p2 = scmp.lt.s32.totalorder %s4790_s27, %s4790_s27 }
   0x9   :  { %p4797_p3 = por %p4796_p2, %p4795_p1 }
   0xb   :  { %p4798_p4 = pnand %p4797_p3, %p4791_p0 }
   0xd   :  { %4801 = shalt.err (!%p4798_p4)
}
   0xe   :  { %s4848_s28 = smov 128   ;;  %s4849_s29 = smov 8  }
   0xf   :  { %56 = dma.hbm_to_vmem [thread:$0]  %s5839_s7, 512, %s51_s24, [#allocation6], %s4848_s28, %s4848_s28, %s4849_s29  }
  0x10   :  { %s4810_s13 = scalar_lea.vmem %s37_s26, 512  ;;  %p4815_p6 = scmp.lt.s32.totalorder %s37_s26, %s37_s26 }
  0x11   :  { %p4811_p5 = scmp.ne.s32.totalorder %s37_s26, %s4810_s13  ;;  %p4816_p7 = scmp.lt.s32.totalorder %s4810_s13, %s4810_s13 }
  0x13   :  { %p4817_p8 = por %p4816_p7, %p4815_p6 }
  0x15   :  { %p4818_p9 = pnand %p4817_p8, %p4811_p5 }
  0x17   :  { %4821 = shalt.err (!%p4818_p9)
}
  0x18   :  { %42 = dma.hbm_to_vmem [thread:$0]  %s5837_s5, 512, %s37_s26, [#allocation4], %s4848_s28, %s4848_s28, %s4849_s29  }
  0x19   :  { %s4850_s16 = smov [#allocation7]  }
  0x1a   :  { %s62_s17 = sshll.u32 %s4850_s16, 4  ;;  %s63_s17 = int_to_ptr.vmem [resolvable:$true] %s62_s17 }
  0x1b   :  { %s4830_s18 = scalar_lea.vmem %s63_s17, 512  ;;  %p4835_p11 = scmp.lt.s32.totalorder %s63_s17, %s63_s17 }
  0x1c   :  { %p4831_p10 = scmp.ne.s32.totalorder %s63_s17, %s4830_s18  ;;  %p4836_p12 = scmp.lt.s32.totalorder %s4830_s18, %s4830_s18 }
  0x1e   :  { %p4837_p13 = por %p4836_p12, %p4835_p11 }
  0x20   :  { %p4838_p0 = pnand %p4837_p13, %p4831_p10 }
  0x22   :  { %4841 = shalt.err (!%p4838_p0)
}
  0x23   :  { %68 = dma.hbm_to_vmem [thread:$0]  %s5840_s8, 512, %s63_s17, [#allocation6], %s4848_s28, %s4848_s28, %s4849_s29  }
  0x24   :  { %4842 = dma.done.wait [#allocation4], 512  }
  0x25   :  { %4843 = vsyncadd [#allocation4], 4294966784 }
  0x26   :  { %4844 = dma.done.wait [#allocation6], 1024  }
  0x27   :  { %4845 = vsyncadd [#allocation6], 4294966272  ;;  %v4851_v1 = vmov 0.0   ;;  %vm4852_vm0 = vmmov 0   ;;  %vm125_vm1 = vcmask 1045504   ;;  %vm100_vm2 = vcmask 48128  }
  0x28   :  { %4118 = vmatprep.subr.mxu1 %v4851_v1  ;;  %4126 = vmatprep.mubr.msk.f32.mxu1 %vm4852_vm0, %v4851_v1  ;;  %v92_v2 = vld [vmem:[%s5833_s1] sm:$0x3f]  ;;  %v4941_v3 = vld [vmem:[%s5834_s2 + $0x18] sm:$0xff]  ;;  %v85_v5 = vld [vmem:[%s5832_s0 + $0x8] sm:$0xff]  ;;  %s4853_s14 = smov 32   ;;  %vm238_vm3 = vcmask 261120  }
  0x29   :  { %v84_v4 = vld [vmem:[%s5832_s0] sm:$0xff]  ;;  %4104 = vmatprep.subr.msk.mxu0 %vm125_vm1, %v92_v2  ;;  %4119 = vmatpush3.msra.mxu1 %v4941_v3  ;;  %v4953_v6 = vld [vmem:[%s5834_s2 + $0x10] sm:$0xff]  ;;  %v4961_v7 = vld [vmem:[%s5834_s2 + $0x8] sm:$0xff]  ;;  %vm3812_vm4 = vcmask 7168  }
  0x2a   :  { %4105 = vmatpush3.msk.msra.mxu0 %vm125_vm1, %v92_v2  ;;  %4106 = vmatprep.mubr.msk.f32.mxu0 %vm100_vm2, %v84_v4  ;;  %v4969_v8 = vld [vmem:[%s5834_s2] sm:$0xff]  ;;  %v4997_v27 = vld [vmem:[#allocation3 + $0x10] sm:$0xff]  ;;  %v5009_v30 = vld [vmem:[#allocation3 + $0x8] sm:$0xff] }
  0x2b   :  { %4120 = vmatprep.subr.mxu1 %v4851_v1  ;;  %4107 = vmatmul.mubr.msk.f32.vlgmr.msra.gmra.mxu0 %vm100_vm2, %v85_v5  ;;  %v4983_v10 = vld [vmem:[%s5835_s3] ss:$0 sm:$0xff]  ;;  %v5003_v28 = vld [vmem:[%s5836_s4 + $0x18] sm:$0xff]  ;;  %v86_v29 = vld [vmem:[%s5832_s0 + $0x10] sm:$0xff] }
  0x2c   :  { %4121 = vmatpush3.msra.mxu1 %v4953_v6  ;;  %4140 = vmatprep.subr.mxu0 %v4851_v1  ;;  %v4995_v26 = vld [vmem:[#allocation3 + $0x18] sm:$0xff]  ;;  %v5020_v32 = vld [vmem:[%s5836_s4 + $0x10] sm:$0xff]  ;;  %v5023_v33 = vld [vmem:[#allocation3] sm:$0xff] }
  0x2d   :  { %4122 = vmatprep.subr.mxu1 %v4851_v1  ;;  %4141 = vmatpush3.msra.mxu0 %v5003_v28  ;;  %v87_v31 = vld [vmem:[%s5832_s0 + $0x18] sm:$0xff]  ;;  %v88_v34 = vld [vmem:[%s5832_s0 + $0x20] sm:$0xff]  ;;  %v89_v36 = vld [vmem:[%s5832_s0 + $0x28] sm:$0xff] }
  0x2e   :  { %4123 = vmatpush3.msra.mxu1 %v4961_v7  ;;  %4109 = vmatprep.mubr.msk.f32.mxu0 %vm100_vm2, %v86_v29  ;;  %v5032_v35 = vld [vmem:[#allocation7 + $0x18] sm:$0xff]  ;;  %v5042_v37 = vld [vmem:[#allocation7 + $0x10] sm:$0xff]  ;;  %v5049_v38 = vld [vmem:[%s5836_s4 + $0x8] sm:$0xff] }
  0x2f   :  { %4124 = vmatprep.subr.mxu1 %v4851_v1  ;;  %4110 = vmatmul.mubr.msk.f32.gmra.mxu0 %vm100_vm2, %v87_v31  ;;  %v5052_v40 = vld [vmem:[#allocation7 + $0x8] sm:$0xff]  ;;  %v5061_v42 = vld [vmem:[#allocation7] sm:$0xff]  ;;  %v91_v43 = vld [vmem:[%s5832_s0 + $0x38] sm:$0xff] }
  0x30   :  { %4125 = vmatpush3.msra.mxu1 %v4969_v8  ;;  %4142 = vmatprep.subr.mxu0 %v4851_v1  ;;  %v90_v41 = vld [vmem:[%s5832_s0 + $0x30] sm:$0xff]  ;;  %v5077_v44 = vld [vmem:[%s5836_s4] sm:$0xff]  ;;  %s4854_s0 = smov 64  }
  0x31   :  { %4127 = vmatmul.mubr.f32.vlgmr.msra.gmra.mxu1 %v4851_v1  ;;  %4129 = vmatprep.subr.mxu1 %v4851_v1  ;;  %v5131_v60 = vld [vmem:[%s5838_s6] ss:$0 sm:$0xff] }
  0x32   :  { %4137 = vmatprep.mubr.msk.f32.mxu1 %vm4852_vm0, %v4851_v1  ;;  %4130 = vmatpush3.msra.mxu1 %v4995_v26 }
  0x33   :  { %4131 = vmatprep.subr.mxu1 %v4851_v1  ;;  %4143 = vmatpush3.msra.mxu0 %v5020_v32 }
  0x34   :  { %4132 = vmatpush3.msra.mxu1 %v4997_v27  ;;  %4112 = vmatprep.mubr.msk.f32.mxu0 %vm100_vm2, %v88_v34 }
  0x35   :  { %4133 = vmatprep.subr.mxu1 %v4851_v1  ;;  %4113 = vmatmul.mubr.msk.f32.gmra.mxu0 %vm100_vm2, %v89_v36 }
  0x36   :  { %4134 = vmatpush3.msra.mxu1 %v5009_v30  ;;  %4144 = vmatprep.subr.mxu0 %v4851_v1 }
  0x37   :  { %4135 = vmatprep.subr.mxu1 %v4851_v1  ;;  %4145 = vmatpush3.msra.mxu0 %v5049_v38 }
  0x38   :  { %4136 = vmatpush3.msra.mxu1 %v5023_v33  ;;  %4115 = vmatprep.mubr.msk.f32.mxu0 %vm100_vm2, %v90_v41  ;;  %v5147_v41 = vld [vmem:[#allocation5 + $0x10] sm:$0xff] }
  0x39   :  { %4151 = vmatprep.subr.mxu1 %v4851_v1  ;;  %4138 = vmatmul.mubr.f32.vlgmr.msra.gmra.mxu1 %v4851_v1 }
  0x3a   :  { %4152 = vmatpush3.msra.mxu1 %v5032_v35  ;;  %4159 = vmatprep.mubr.msk.f32.mxu1 %vm4852_vm0, %v4851_v1 }
  0x3b   :  { %4153 = vmatprep.subr.mxu1 %v4851_v1  ;;  %4116 = vmatmul.mubr.msk.f32.gmra.mxu0 %vm100_vm2, %v91_v43 }
  0x3c   :  { %4154 = vmatpush3.msra.mxu1 %v5042_v37  ;;  %4146 = vmatprep.subr.mxu0 %v4851_v1 }
  0x3d   :  { %4155 = vmatprep.subr.mxu1 %v4851_v1  ;;  %4147 = vmatpush3.msra.mxu0 %v5077_v44 }
  0x3e   :  { %4156 = vmatpush3.msra.mxu1 %v5052_v40  ;;  %4148 = vmatprep.mubr.msk.f32.mxu0 %vm4852_vm0, %v4851_v1 }
  0x3f   :  { %4157 = vmatprep.subr.mxu1 %v4851_v1  ;;  %4162 = vmatprep.subr.mxu0 %v4851_v1 }
  0x40   :  { %4158 = vmatpush3.msra.mxu1 %v5061_v42 }
  0x41   :  { %4173 = vmatprep.subr.mxu1 %v4851_v1  ;;  %4160 = vmatmul.mubr.f32.vlgmr.msra.gmra.mxu1 %v4851_v1 }
  0x42   :  { %4174 = vmatpush3.msra.mxu1 %v4941_v3  ;;  %4181 = vmatprep.mubr.msk.f32.mxu1 %vm4852_vm0, %v4851_v1 }
  0x43   :  { %4175 = vmatprep.subr.mxu1 %v4851_v1 }
  0x44   :  { %4176 = vmatpush3.msra.mxu1 %v4953_v6 }
  0x45   :  { %4177 = vmatprep.subr.mxu1 %v4851_v1 }
  0x46   :  { %4178 = vmatpush3.msra.mxu1 %v4961_v7 }
  0x47   :  { %4179 = vmatprep.subr.mxu1 %v4851_v1 }
  0x48   :  { %4180 = vmatpush3.msra.mxu1 %v4969_v8 }
  0x49   :  { %4195 = vmatprep.subr.mxu1 %v4851_v1 }
  0xeb   :  { %v4978_v9 = vpop.f32.mrf.mxu0 }
  0xec   :  { %v201_v58 = vadd.f32 %v4978_v9, %v4983_v10 }
  0xed   :  { %v195_v11 = vpop.f32.mrf.mxu0 }
  0xee   :  { %v196_v12 = vadd.f32 %v4983_v10, %v195_v11 }
  0xef   :  { %v5114_v52 = vpop.f32.mrf.mxu0 }
  0xf1   :  { %v308_v13 = vpop.f32.mrf.mxu1  ;;  %v5116_v53 = vpop.f32.mrf.mxu0 }
  0xf2   :  { %v312_v14 = vadd.f32 %v308_v13, %v196_v12 }
  0xf3   :  { %v4128_v15 = vpop.f32.mrf.mxu1 }
  0xf4   :  { %4567 = vtanh.f32 %v312_v14  ;;  %v3830_v17 = vmul.f32 -1.442695, %v312_v14 }
  0xf5   :  { %v5118_v54 = vpop.f32.mrf.mxu0 }
  0xf6   :  { %4569 = vpow2.f32 %v3830_v17 }
  0xf7   :  { %v5120_v55 = vpop.f32.mrf.mxu0 }
  0xf9   :  { %v411_v47 = vpop.f32.mrf.mxu1 }
  0xfb   :  { %v4139_v48 = vpop.f32.mrf.mxu1  ;;  %v5122_v56 = vpop.f32.mrf.mxu0 }
  0xfd   :  { %v5124_v57 = vpop.f32.mrf.mxu0 }
 0x101   :  { %v4568_v16 = vpop.eup %4567  ;;  %v5098_v49 = vpop.f32.mrf.mxu1 }
 0x102   :  { %322 = vrot.lane.b32.xlu0 %v4568_v16, %s4853_s14 }
 0x103   :  { %v4570_v18 = vpop.eup %4569  ;;  %v4161_v50 = vpop.f32.mrf.mxu1 }
 0x104   :  { %v316_v19 = vadd.f32 1.0, %v4570_v18 }
 0x106   :  { %4571 = vrcp.f32 %v316_v19 }
 0x113   :  { %v4987_v20 = vpop.eup %4571 }
 0x114   :  { %v320_v23 = vmul.f32 0.0, %v4987_v20 }
 0x174   :  { %v323_v21 = vpop.permute.xlu0 %322 }
 0x175   :  { %v325_v22 = vmul.f32 %v4987_v20, %v323_v21 }
 0x177   :  { %327 = vrot.lane.b32.xlu0 %v325_v22, %s4853_s14 }
 0x1e9   :  { %v328_v24 = vpop.permute.xlu0 %327 }
 0x1ea   :  { %v4992_v25 = vadd.f32 %v328_v24, %v320_v23 }
 0x1ec   :  { %4573 = vtanh.f32 %v4992_v25 }
 0x1f9   :  { %v4574_v39 = vpop.eup %4573 }
 0x1fa   :  { %333 = vrot.lane.b32.xlu1 %v4574_v39, %s4853_s14  ;;  %v5145_v39 = vld [vmem:[#allocation5 + $0x18] sm:$0xff] }
 0x26c   :  { %v334_v45 = vpop.permute.xlu1 %333 }
 0x26d   :  { %v336_v46 = vmul.f32 %v4987_v20, %v334_v45 }
 0x26f   :  { %416 = vrot.lane.b32.xlu1 %v336_v46, %s4854_s0  ;;  %v5159_v46 = vld [vmem:[#allocation5] sm:$0xff] }
 0x2e1   :  { %v417_v51 = vpop.permute.xlu1 %416 }
 0x2e2   :  { %4149 = vmatmul.mubr.msk.f32.vlgmr.msra.gmra.mxu0 %vm238_vm3, %v417_v51  ;;  %4182 = vmatmul.mubr.msk.f32.vlgmr.msra.gmra.mxu1 %vm238_vm3, %v417_v51 }
 0x2e3   :  { %4196 = vmatpush3.msra.mxu1 %v5003_v28  ;;  %4203 = vmatprep.mubr.msk.f32.mxu1 %vm4852_vm0, %v4851_v1 }
 0x2e4   :  { %4197 = vmatprep.subr.mxu1 %v4851_v1  ;;  %4170 = vmatprep.mubr.msk.f32.mxu0 %vm4852_vm0, %v4851_v1 }
 0x2e5   :  { %4198 = vmatpush3.msra.mxu1 %v5020_v32  ;;  %4163 = vmatpush3.msra.mxu0 %v5145_v39 }
 0x2e6   :  { %4199 = vmatprep.subr.mxu1 %v4851_v1  ;;  %4164 = vmatprep.subr.mxu0 %v4851_v1 }
 0x2e7   :  { %4200 = vmatpush3.msra.mxu1 %v5049_v38  ;;  %4165 = vmatpush3.msra.mxu0 %v5147_v41 }
 0x2e8   :  { %4201 = vmatprep.subr.mxu1 %v4851_v1  ;;  %4166 = vmatprep.subr.mxu0 %v4851_v1 }
 0x2e9   :  { %4202 = vmatpush3.msra.mxu1 %v5077_v44 }
 0x2ea   :  { %4217 = vmatprep.subr.mxu1 %v4851_v1 }
 0x3a2   :  { %v486_v59 = vpop.f32.mrf.mxu0  ;;  %v773_v61 = vpop.f32.mrf.mxu1 }
 0x3a3   :  { %v487_v62 = vadd.f32 %v486_v59, %v411_v47  ;;  %v777_v63 = vadd.f32 %v773_v61, %v201_v58 }
 0x3a4   :  { %v4150_v0 = vpop.f32.mrf.mxu0  ;;  %v4183_v2 = vpop.f32.mrf.mxu1 }
 0x3a5   :  { %v497_v4 = vadd.f32 %v5131_v60, %v487_v62  ;;  %4575 = vtanh.f32 %v777_v63  ;;  %v3838_v9 = vmul.f32 -1.442695, %v777_v63  ;;  %v5204_v63 = vld [vmem:[%s5841_s9] ss:$0 sm:$0xff] }
 0x3a7   :  { %4577 = vtanh.f32 %v497_v4  ;;  %v3833_v12 = vmul.f32 -1.442695, %v497_v4 }
 0x3a8   :  { %4579 = vpow2.f32 %v3838_v9 }
 0x3a9   :  { %4581 = vpow2.f32 %v3833_v12 }
 0x3b2   :  { %v4576_v5 = vpop.eup %4575 }
 0x3b3   :  { %787 = vrot.lane.b32.xlu1 %v4576_v5, %s4853_s14 }
 0x3b4   :  { %v4578_v11 = vpop.eup %4577 }
 0x3b5   :  { %507 = vrot.lane.b32.xlu0 %v4578_v11, %s4853_s14  ;;  %v4580_v13 = vpop.eup %4579 }
 0x3b6   :  { %v4582_v14 = vpop.eup %4581  ;;  %v781_v15 = vadd.f32 1.0, %v4580_v13 }
 0x3b7   :  { %v501_v16 = vadd.f32 1.0, %v4582_v14 }
 0x3b8   :  { %4583 = vrcp.f32 %v781_v15 }
 0x3b9   :  { %4585 = vrcp.f32 %v501_v16 }
 0x3c5   :  { %v4584_v17 = vpop.eup %4583 }
 0x3c6   :  { %v4586_v20 = vpop.eup %4585  ;;  %v785_v23 = vmul.f32 %v4584_v17, %v4992_v25  ;;  %v5151_v25 = vld [vmem:[#allocation5 + $0x8] sm:$0xff] }
 0x3c7   :  { %v505_v31 = vmul.f32 0.0, %v4586_v20  ;;  %4167 = vmatpush3.msra.mxu0 %v5151_v25 }
 0x3c8   :  { %4168 = vmatprep.subr.mxu0 %v4851_v1 }
 0x3c9   :  { %4169 = vmatpush3.msra.mxu0 %v5159_v46 }
 0x3ca   :  { %4184 = vmatprep.subr.mxu0 %v4851_v1 }
 0x425   :  { %v788_v18 = vpop.permute.xlu1 %787 }
 0x426   :  { %v790_v19 = vmul.f32 %v4584_v17, %v788_v18 }
 0x427   :  { %v508_v21 = vpop.permute.xlu0 %507 }
 0x428   :  { %v510_v22 = vmul.f32 %v4586_v20, %v508_v21  ;;  %792 = vrot.lane.b32.xlu1 %v790_v19, %s4853_s14 }
 0x42a   :  { %512 = vrot.lane.b32.xlu0 %v510_v22, %s4853_s14 }
 0x49a   :  { %v793_v24 = vpop.permute.xlu1 %792 }
 0x49b   :  { %v5139_v29 = vadd.f32 %v793_v24, %v785_v23 }
 0x49c   :  { %v513_v34 = vpop.permute.xlu0 %512 }
 0x49d   :  { %4587 = vtanh.f32 %v5139_v29  ;;  %v5142_v36 = vadd.f32 %v513_v34, %v505_v31 }
 0x49f   :  { %4589 = vtanh.f32 %v5142_v36 }
 0x4aa   :  { %v4588_v43 = vpop.eup %4587 }
 0x4ab   :  { %798 = vrot.lane.b32.xlu1 %v4588_v43, %s4853_s14 }
 0x4ac   :  { %v4590_v45 = vpop.eup %4589 }
 0x4ad   :  { %518 = vrot.lane.b32.xlu0 %v4590_v45, %s4853_s14 }
 0x51d   :  { %v799_v47 = vpop.permute.xlu1 %798 }
 0x51e   :  { %v801_v48 = vmul.f32 %v4584_v17, %v799_v47 }
 0x51f   :  { %v519_v50 = vpop.permute.xlu0 %518 }
 0x520   :  { %v521_v51 = vmul.f32 %v4586_v20, %v519_v50  ;;  %873 = vrot.lane.b32.xlu1 %v801_v48, %s4854_s0 }
 0x522   :  { %601 = vrot.lane.b32.xlu0 %v521_v51, %s4854_s0 }
 0x592   :  { %v5165_v58 = vpop.permute.xlu1 %873 }
 0x593   :  { %4204 = vmatmul.mubr.msk.f32.vlgmr.msra.gmra.mxu1 %vm238_vm3, %v5165_v58 }
 0x594   :  { %v602_v59 = vpop.permute.xlu0 %601  ;;  %4218 = vmatpush3.msra.mxu1 %v5145_v39  ;;  %4225 = vmatprep.mubr.msk.f32.mxu1 %vm4852_vm0, %v4851_v1 }
 0x595   :  { %4171 = vmatmul.mubr.msk.f32.vlgmr.msra.gmra.mxu0 %vm238_vm3, %v602_v59  ;;  %4219 = vmatprep.subr.mxu1 %v4851_v1 }
 0x596   :  { %4185 = vmatpush3.msra.mxu0 %v4995_v26  ;;  %4192 = vmatprep.mubr.msk.f32.mxu0 %vm4852_vm0, %v4851_v1 }
 0x597   :  { %4186 = vmatprep.subr.mxu0 %v4851_v1  ;;  %4220 = vmatpush3.msra.mxu1 %v5147_v41 }
 0x598   :  { %4187 = vmatpush3.msra.mxu0 %v4997_v27  ;;  %4221 = vmatprep.subr.mxu1 %v4851_v1 }
 0x599   :  { %4188 = vmatprep.subr.mxu0 %v4851_v1  ;;  %4222 = vmatpush3.msra.mxu1 %v5151_v25 }
 0x59a   :  { %4189 = vmatpush3.msra.mxu0 %v5009_v30  ;;  %4223 = vmatprep.subr.mxu1 %v4851_v1 }
 0x59b   :  { %4190 = vmatprep.subr.mxu0 %v4851_v1  ;;  %4224 = vmatpush3.msra.mxu1 %v5159_v46 }
 0x59c   :  { %4191 = vmatpush3.msra.mxu0 %v5023_v33  ;;  %4239 = vmatprep.subr.mxu1 %v4851_v1 }
 0x59d   :  { %4193 = vmatmul.mubr.msk.f32.vlgmr.msra.gmra.mxu0 %vm238_vm3, %v602_v59  ;;  %4206 = vmatprep.subr.mxu0 %v4851_v1 }
 0x59e   :  { %4207 = vmatpush3.msra.mxu0 %v5032_v35  ;;  %4214 = vmatprep.mubr.msk.f32.mxu0 %vm4852_vm0, %v4851_v1 }
 0x59f   :  { %4208 = vmatprep.subr.mxu0 %v4851_v1 }
 0x5a0   :  { %4209 = vmatpush3.msra.mxu0 %v5042_v37 }
 0x5a1   :  { %4210 = vmatprep.subr.mxu0 %v4851_v1 }
 0x5a2   :  { %4211 = vmatpush3.msra.mxu0 %v5052_v40 }
 0x5a3   :  { %4212 = vmatprep.subr.mxu0 %v4851_v1 }
 0x5a4   :  { %4213 = vmatpush3.msra.mxu0 %v5061_v42 }
 0x5a5   :  { %4228 = vmatprep.subr.mxu0 %v4851_v1 }
 0x653   :  { %v943_v61 = vpop.f32.mrf.mxu1 }
 0x655   :  { %v671_v62 = vpop.f32.mrf.mxu0  ;;  %v4205_v0 = vpop.f32.mrf.mxu1 }
 0x656   :  { %v672_v2 = vadd.f32 %v671_v62, %v5098_v49 }
 0x657   :  { %v4172_v4 = vpop.f32.mrf.mxu0 }
 0x658   :  { %v682_v5 = vadd.f32 %v5204_v63, %v672_v2 }
 0x65a   :  { %4591 = vtanh.f32 %v682_v5  ;;  %v3836_v16 = vmul.f32 -1.442695, %v682_v5 }
 0x65d   :  { %v868_v11 = vpop.f32.mrf.mxu0 }
 0x65e   :  { %v944_v9 = vadd.f32 %v943_v61, %v868_v11 }
 0x65f   :  { %v4194_v12 = vpop.f32.mrf.mxu0 }
 0x660   :  { %v947_v13 = vadd.f32 %v5131_v60, %v944_v9  ;;  %v206_v9 = vadd.f32 %v4983_v10, %v5116_v53 }
 0x662   :  { %4593 = vtanh.f32 %v947_v13  ;;  %v3841_v17 = vmul.f32 -1.442695, %v947_v13 }
 0x663   :  { %4595 = vpow2.f32 %v3836_v16 }
 0x664   :  { %4597 = vpow2.f32 %v3841_v17 }
 0x667   :  { %v4592_v14 = vpop.eup %4591 }
 0x668   :  { %692 = vrot.lane.b32.xlu0 %v4592_v14, %s4853_s14 }
 0x66f   :  { %v4594_v15 = vpop.eup %4593 }
 0x670   :  { %957 = vrot.lane.b32.xlu1 %v4594_v15, %s4853_s14  ;;  %v4596_v49 = vpop.eup %4595 }
 0x671   :  { %v686_v18 = vadd.f32 1.0, %v4596_v49  ;;  %v4598_v19 = vpop.eup %4597 }
 0x672   :  { %v951_v20 = vadd.f32 1.0, %v4598_v19 }
 0x673   :  { %4599 = vrcp.f32 %v686_v18 }
 0x674   :  { %4601 = vrcp.f32 %v951_v20 }
 0x680   :  { %v4600_v21 = vpop.eup %4599 }
 0x681   :  { %v4602_v24 = vpop.eup %4601  ;;  %v690_v43 = vmul.f32 0.0, %v4600_v21 }
 0x682   :  { %v955_v48 = vmul.f32 %v4602_v24, %v5142_v36 }
 0x6da   :  { %v693_v22 = vpop.permute.xlu0 %692 }
 0x6db   :  { %v695_v23 = vmul.f32 %v4600_v21, %v693_v22 }
 0x6dd   :  { %697 = vrot.lane.b32.xlu0 %v695_v23, %s4853_s14 }
 0x6e2   :  { %v958_v31 = vpop.permute.xlu1 %957 }
 0x6e3   :  { %v960_v34 = vmul.f32 %v4602_v24, %v958_v31 }
 0x6e5   :  { %962 = vrot.lane.b32.xlu1 %v960_v34, %s4853_s14 }
 0x74f   :  { %v698_v45 = vpop.permute.xlu0 %697 }
 0x750   :  { %v5213_v47 = vadd.f32 %v698_v45, %v690_v43 }
 0x752   :  { %4603 = vtanh.f32 %v5213_v47 }
 0x757   :  { %v963_v50 = vpop.permute.xlu1 %962 }
 0x758   :  { %v5217_v51 = vadd.f32 %v963_v50, %v955_v48 }
 0x75a   :  { %4605 = vtanh.f32 %v5217_v51 }
 0x75f   :  { %v4604_v59 = vpop.eup %4603 }
 0x760   :  { %703 = vrot.lane.b32.xlu0 %v4604_v59, %s4853_s14 }
 0x767   :  { %v4606_v61 = vpop.eup %4605 }
 0x768   :  { %968 = vrot.lane.b32.xlu1 %v4606_v61, %s4853_s14 }
 0x7d2   :  { %v704_v62 = vpop.permute.xlu0 %703 }
 0x7d3   :  { %v706_v0 = vmul.f32 %v4600_v21, %v704_v62 }
 0x7d5   :  { %973 = vrot.lane.b32.xlu0 %v706_v0, %s4854_s0 }
 0x7da   :  { %v969_v2 = vpop.permute.xlu1 %968 }
 0x7db   :  { %v971_v4 = vmul.f32 %v4602_v24, %v969_v2 }
 0x7dd   :  { %1048 = vrot.lane.b32.xlu1 %v971_v4, %s4854_s0 }
 0x847   :  { %v974_v36 = vpop.permute.xlu0 %973 }
 0x848   :  { %4215 = vmatmul.mubr.msk.f32.vlgmr.msra.gmra.mxu0 %vm238_vm3, %v974_v36 }
 0x849   :  { %4229 = vmatpush3.msra.mxu0 %v4941_v3  ;;  %4236 = vmatprep.mubr.msk.f32.mxu0 %vm4852_vm0, %v4851_v1 }
 0x84a   :  { %4230 = vmatprep.subr.mxu0 %v4851_v1 }
 0x84b   :  { %4231 = vmatpush3.msra.mxu0 %v4953_v6 }
 0x84c   :  { %4232 = vmatprep.subr.mxu0 %v4851_v1 }
 0x84d   :  { %4233 = vmatpush3.msra.mxu0 %v4961_v7 }
 0x84e   :  { %4234 = vmatprep.subr.mxu0 %v4851_v1 }
 0x84f   :  { %4235 = vmatpush3.msra.mxu0 %v4969_v8  ;;  %v1049_v5 = vpop.permute.xlu1 %1048 }
 0x850   :  { %4226 = vmatmul.mubr.msk.f32.vlgmr.msra.gmra.mxu1 %vm238_vm3, %v1049_v5  ;;  %4237 = vmatmul.mubr.msk.f32.vlgmr.msra.gmra.mxu0 %vm238_vm3, %v5165_v58 }
 0x851   :  { %4240 = vmatpush3.msra.mxu1 %v4995_v26  ;;  %4247 = vmatprep.mubr.msk.f32.mxu1 %vm4852_vm0, %v4851_v1 }
 0x852   :  { %4241 = vmatprep.subr.mxu1 %v4851_v1  ;;  %4250 = vmatprep.subr.mxu0 %v4851_v1 }
 0x853   :  { %4242 = vmatpush3.msra.mxu1 %v4997_v27  ;;  %4251 = vmatpush3.msra.mxu0 %v5003_v28 }
 0x854   :  { %4243 = vmatprep.subr.mxu1 %v4851_v1  ;;  %4252 = vmatprep.subr.mxu0 %v4851_v1 }
 0x855   :  { %4244 = vmatpush3.msra.mxu1 %v5009_v30  ;;  %4253 = vmatpush3.msra.mxu0 %v5020_v32 }
 0x856   :  { %4245 = vmatprep.subr.mxu1 %v4851_v1  ;;  %4254 = vmatprep.subr.mxu0 %v4851_v1 }
 0x857   :  { %4246 = vmatpush3.msra.mxu1 %v5023_v33  ;;  %4255 = vmatpush3.msra.mxu0 %v5049_v38 }
 0x858   :  { %4248 = vmatmul.mubr.msk.f32.vlgmr.msra.gmra.mxu1 %vm238_vm3, %v1049_v5  ;;  %4261 = vmatprep.subr.mxu1 %v4851_v1 }
 0x859   :  { %4262 = vmatpush3.msra.mxu1 %v5032_v35  ;;  %4256 = vmatprep.subr.mxu0 %v4851_v1 }
 0x85a   :  { %4263 = vmatprep.subr.mxu1 %v4851_v1  ;;  %4257 = vmatpush3.msra.mxu0 %v5077_v44 }
 0x85b   :  { %4264 = vmatpush3.msra.mxu1 %v5042_v37  ;;  %4258 = vmatprep.mubr.msk.f32.mxu0 %vm4852_vm0, %v4851_v1 }
 0x85c   :  { %4265 = vmatprep.subr.mxu1 %v4851_v1  ;;  %4269 = vmatprep.mubr.msk.f32.mxu1 %vm4852_vm0, %v4851_v1 }
 0x85d   :  { %4266 = vmatpush3.msra.mxu1 %v5052_v40  ;;  %4272 = vmatprep.subr.mxu0 %v4851_v1 }
 0x85e   :  { %4267 = vmatprep.subr.mxu1 %v4851_v1 }
 0x85f   :  { %4268 = vmatpush3.msra.mxu1 %v5061_v42 }
 0x860   :  { %4283 = vmatprep.subr.mxu1 %v4851_v1 }
 0x908   :  { %v1043_v58 = vpop.f32.mrf.mxu0 }
 0x90a   :  { %v4216_v11 = vpop.f32.mrf.mxu0 }
 0x910   :  { %v1118_v12 = vpop.f32.mrf.mxu1  ;;  %v1213_v13 = vpop.f32.mrf.mxu0 }
 0x911   :  { %v1119_v14 = vadd.f32 %v1118_v12, %v1043_v58  ;;  %v1217_v15 = vadd.f32 %v1213_v13, %v206_v9 }
 0x912   :  { %v4227_v16 = vpop.f32.mrf.mxu1  ;;  %v4238_v17 = vpop.f32.mrf.mxu0 }
 0x913   :  { %v1122_v49 = vadd.f32 %v5204_v63, %v1119_v14  ;;  %4607 = vtanh.f32 %v1217_v15  ;;  %v3846_v53 = vmul.f32 -1.442695, %v1217_v15 }
 0x915   :  { %4609 = vtanh.f32 %v1122_v49  ;;  %v3844_v22 = vmul.f32 -1.442695, %v1122_v49 }
 0x916   :  { %4611 = vpow2.f32 %v3846_v53 }
 0x917   :  { %4613 = vpow2.f32 %v3844_v22 }
 0x918   :  { %v5272_v18 = vpop.f32.mrf.mxu1 }
 0x91a   :  { %v4249_v19 = vpop.f32.mrf.mxu1 }
 0x920   :  { %v4608_v20 = vpop.eup %4607 }
 0x921   :  { %1227 = vrot.lane.b32.xlu0 %v4608_v20, %s4853_s14 }
 0x922   :  { %v4610_v21 = vpop.eup %4609 }
 0x923   :  { %1132 = vrot.lane.b32.xlu1 %v4610_v21, %s4853_s14  ;;  %v4612_v23 = vpop.eup %4611 }
 0x924   :  { %v4614_v24 = vpop.eup %4613  ;;  %v1221_v31 = vadd.f32 1.0, %v4612_v23 }
 0x925   :  { %v1126_v34 = vadd.f32 1.0, %v4614_v24 }
 0x926   :  { %4615 = vrcp.f32 %v1221_v31 }
 0x927   :  { %4617 = vrcp.f32 %v1126_v34 }
 0x933   :  { %v4616_v43 = vpop.eup %4615 }
 0x934   :  { %v4618_v50 = vpop.eup %4617  ;;  %v1225_v62 = vmul.f32 %v4616_v43, %v5139_v29 }
 0x935   :  { %v1130_v4 = vmul.f32 %v4618_v50, %v5213_v47 }
 0x993   :  { %v1228_v45 = vpop.permute.xlu0 %1227 }
 0x994   :  { %v1230_v48 = vmul.f32 %v4616_v43, %v1228_v45 }
 0x995   :  { %v1133_v59 = vpop.permute.xlu1 %1132 }
 0x996   :  { %v1135_v61 = vmul.f32 %v4618_v50, %v1133_v59  ;;  %1232 = vrot.lane.b32.xlu0 %v1230_v48, %s4853_s14 }
 0x998   :  { %1137 = vrot.lane.b32.xlu1 %v1135_v61, %s4853_s14 }
 0xa08   :  { %v1233_v0 = vpop.permute.xlu0 %1232 }
 0xa09   :  { %v5279_v2 = vadd.f32 %v1233_v0, %v1225_v62 }
 0xa0a   :  { %v1138_v36 = vpop.permute.xlu1 %1137 }
 0xa0b   :  { %4619 = vtanh.f32 %v5279_v2  ;;  %v5283_v5 = vadd.f32 %v1138_v36, %v1130_v4 }
 0xa0d   :  { %4621 = vtanh.f32 %v5283_v5 }
 0xa18   :  { %v4620_v58 = vpop.eup %4619 }
 0xa19   :  { %1238 = vrot.lane.b32.xlu0 %v4620_v58, %s4853_s14 }
 0xa1a   :  { %v4622_v11 = vpop.eup %4621 }
 0xa1b   :  { %1143 = vrot.lane.b32.xlu1 %v4622_v11, %s4853_s14 }
 0xa8b   :  { %v1239_v9 = vpop.permute.xlu0 %1238 }
 0xa8c   :  { %v1241_v29 = vmul.f32 %v4616_v43, %v1239_v9 }
 0xa8d   :  { %v1144_v12 = vpop.permute.xlu1 %1143 }
 0xa8e   :  { %v1146_v13 = vmul.f32 %v4618_v50, %v1144_v12  ;;  %1313 = vrot.lane.b32.xlu0 %v1241_v29, %s4854_s0 }
 0xa90   :  { %1413 = vrot.lane.b32.xlu1 %v1146_v13, %s4854_s0 }
 0xb00   :  { %v1314_v47 = vpop.permute.xlu0 %1313 }
 0xb01   :  { %4259 = vmatmul.mubr.msk.f32.vlgmr.msra.gmra.mxu0 %vm238_vm3, %v1314_v47 }
 0xb02   :  { %v1414_v14 = vpop.permute.xlu1 %1413  ;;  %4273 = vmatpush3.msra.mxu0 %v5145_v39  ;;  %4280 = vmatprep.mubr.msk.f32.mxu0 %vm4852_vm0, %v4851_v1 }
 0xb03   :  { %4270 = vmatmul.mubr.msk.f32.vlgmr.msra.gmra.mxu1 %vm238_vm3, %v1414_v14  ;;  %4274 = vmatprep.subr.mxu0 %v4851_v1 }
 0xb04   :  { %4284 = vmatpush3.msra.mxu1 %v4941_v3  ;;  %4291 = vmatprep.mubr.msk.f32.mxu1 %vm4852_vm0, %v4851_v1 }
 0xb05   :  { %4285 = vmatprep.subr.mxu1 %v4851_v1  ;;  %4275 = vmatpush3.msra.mxu0 %v5147_v41 }
 0xb06   :  { %4286 = vmatpush3.msra.mxu1 %v4953_v6  ;;  %4276 = vmatprep.subr.mxu0 %v4851_v1 }
 0xb07   :  { %4287 = vmatprep.subr.mxu1 %v4851_v1  ;;  %4277 = vmatpush3.msra.mxu0 %v5151_v25 }
 0xb08   :  { %4288 = vmatpush3.msra.mxu1 %v4961_v7  ;;  %4278 = vmatprep.subr.mxu0 %v4851_v1 }
 0xb09   :  { %4289 = vmatprep.subr.mxu1 %v4851_v1  ;;  %4279 = vmatpush3.msra.mxu0 %v5159_v46 }
 0xb0a   :  { %4290 = vmatpush3.msra.mxu1 %v4969_v8  ;;  %4294 = vmatprep.subr.mxu0 %v4851_v1 }
 0xb0b   :  { %4292 = vmatmul.mubr.msk.f32.vlgmr.msra.gmra.mxu1 %vm238_vm3, %v1314_v47  ;;  %4305 = vmatprep.subr.mxu1 %v4851_v1 }
 0xb0c   :  { %4306 = vmatpush3.msra.mxu1 %v5003_v28  ;;  %4313 = vmatprep.mubr.msk.f32.mxu1 %vm4852_vm0, %v4851_v1 }
 0xb0d   :  { %4307 = vmatprep.subr.mxu1 %v4851_v1 }
 0xb0e   :  { %4308 = vmatpush3.msra.mxu1 %v5020_v32  ;;  %v211_v32 = vadd.f32 %v5114_v52, %v4983_v10 }
 0xb0f   :  { %4309 = vmatprep.subr.mxu1 %v4851_v1 }
 0xb10   :  { %4310 = vmatpush3.msra.mxu1 %v5049_v38 }
 0xb11   :  { %4311 = vmatprep.subr.mxu1 %v4851_v1 }
 0xb12   :  { %4312 = vmatpush3.msra.mxu1 %v5077_v44 }
 0xb13   :  { %4327 = vmatprep.subr.mxu1 %v4851_v1 }
 0xbc1   :  { %v1383_v3 = vpop.f32.mrf.mxu0 }
 0xbc2   :  { %v1384_v6 = vadd.f32 %v1383_v3, %v5272_v18 }
 0xbc3   :  { %v4260_v7 = vpop.f32.mrf.mxu0  ;;  %v5324_v8 = vpop.f32.mrf.mxu1 }
 0xbc4   :  { %v1387_v28 = vadd.f32 %v5131_v60, %v1384_v6 }
 0xbc5   :  { %v4271_v15 = vpop.f32.mrf.mxu1 }
 0xbc6   :  { %4623 = vtanh.f32 %v1387_v28  ;;  %v3849_v18 = vmul.f32 -1.442695, %v1387_v28 }
 0xbcb   :  { %v1653_v16 = vpop.f32.mrf.mxu1 }
 0xbcc   :  { %v1657_v17 = vadd.f32 %v1653_v16, %v211_v32 }
 0xbcd   :  { %v4293_v49 = vpop.f32.mrf.mxu1 }
 0xbce   :  { %4625 = vtanh.f32 %v1657_v17  ;;  %v3854_v21 = vmul.f32 -1.442695, %v1657_v17 }
 0xbcf   :  { %4627 = vpow2.f32 %v3849_v18 }
 0xbd0   :  { %4629 = vpow2.f32 %v3854_v21 }
 0xbd3   :  { %v4624_v19 = vpop.eup %4623 }
 0xbd4   :  { %1397 = vrot.lane.b32.xlu0 %v4624_v19, %s4853_s14 }
 0xbdb   :  { %v4626_v20 = vpop.eup %4625 }
 0xbdc   :  { %1667 = vrot.lane.b32.xlu1 %v4626_v20, %s4853_s14  ;;  %v4628_v53 = vpop.eup %4627 }
 0xbdd   :  { %v1391_v22 = vadd.f32 1.0, %v4628_v53  ;;  %v4630_v23 = vpop.eup %4629 }
 0xbde   :  { %v1661_v24 = vadd.f32 1.0, %v4630_v23 }
 0xbdf   :  { %4631 = vrcp.f32 %v1391_v22 }
 0xbe0   :  { %4633 = vrcp.f32 %v1661_v24 }
 0xbec   :  { %v4632_v10 = vpop.eup %4631 }
 0xbed   :  { %v4634_v34 = vpop.eup %4633  ;;  %v1395_v48 = vmul.f32 %v4632_v10, %v5217_v51 }
 0xbee   :  { %v1665_v61 = vmul.f32 %v4634_v34, %v5279_v2 }
 0xc46   :  { %v1398_v52 = vpop.permute.xlu0 %1397 }
 0xc47   :  { %v1400_v31 = vmul.f32 %v4632_v10, %v1398_v52 }
 0xc49   :  { %1402 = vrot.lane.b32.xlu0 %v1400_v31, %s4853_s14 }
 0xc4e   :  { %v1668_v43 = vpop.permute.xlu1 %1667 }
 0xc4f   :  { %v1670_v45 = vmul.f32 %v4634_v34, %v1668_v43 }
 0xc51   :  { %1672 = vrot.lane.b32.xlu1 %v1670_v45, %s4853_s14 }
 0xcbb   :  { %v1403_v50 = vpop.permute.xlu0 %1402 }
 0xcbc   :  { %v5334_v59 = vadd.f32 %v1403_v50, %v1395_v48 }
 0xcbe   :  { %4635 = vtanh.f32 %v5334_v59 }
 0xcc3   :  { %v1673_v62 = vpop.permute.xlu1 %1672 }
 0xcc4   :  { %v5338_v0 = vadd.f32 %v1673_v62, %v1665_v61  ;;  %v5413_v61 = vld [vmem:[%s5834_s2 + $0x10] sm:$0xff]  ;;  %v5420_v62 = vld [vmem:[%s5834_s2 + $0x8] sm:$0xff] }
 0xcc6   :  { %4637 = vtanh.f32 %v5338_v0 }
 0xccb   :  { %v4636_v4 = vpop.eup %4635 }
 0xccc   :  { %1408 = vrot.lane.b32.xlu0 %v4636_v4, %s4853_s14  ;;  %v5427_v4 = vld [vmem:[%s5834_s2] sm:$0xff] }
 0xcd3   :  { %v4638_v36 = vpop.eup %4637 }
 0xcd4   :  { %1678 = vrot.lane.b32.xlu1 %v4638_v36, %s4853_s14 }
 0xd3e   :  { %v1409_v58 = vpop.permute.xlu0 %1408 }
 0xd3f   :  { %v1411_v51 = vmul.f32 %v4632_v10, %v1409_v58  ;;  %v5433_v58 = vld [vmem:[#allocation3 + $0x18] sm:$0xff] }
 0xd41   :  { %1488 = vrot.lane.b32.xlu0 %v1411_v51, %s4854_s0  ;;  %v5440_v51 = vld [vmem:[#allocation3 + $0x10] sm:$0xff] }
 0xd46   :  { %v1679_v11 = vpop.permute.xlu1 %1678 }
 0xd47   :  { %v1681_v9 = vmul.f32 %v4634_v34, %v1679_v11  ;;  %v5446_v11 = vld [vmem:[%s5836_s4 + $0x18] sm:$0xff] }
 0xd49   :  { %1753 = vrot.lane.b32.xlu1 %v1681_v9, %s4854_s0  ;;  %v5451_v9 = vld [vmem:[#allocation3 + $0x8] sm:$0xff] }
 0xdb3   :  { %v1489_v2 = vpop.permute.xlu0 %1488 }
 0xdb4   :  { %4281 = vmatmul.mubr.msk.f32.vlgmr.msra.gmra.mxu0 %vm238_vm3, %v1489_v2 }
 0xdb5   :  { %4295 = vmatpush3.msra.mxu0 %v4995_v26  ;;  %4302 = vmatprep.mubr.msk.f32.mxu0 %vm4852_vm0, %v4851_v1 }
 0xdb6   :  { %4296 = vmatprep.subr.mxu0 %v4851_v1 }
 0xdb7   :  { %4297 = vmatpush3.msra.mxu0 %v4997_v27 }
 0xdb8   :  { %4298 = vmatprep.subr.mxu0 %v4851_v1 }
 0xdb9   :  { %4299 = vmatpush3.msra.mxu0 %v5009_v30 }
 0xdba   :  { %4300 = vmatprep.subr.mxu0 %v4851_v1 }
 0xdbb   :  { %v5354_v29 = vpop.permute.xlu1 %1753  ;;  %4301 = vmatpush3.msra.mxu0 %v5023_v33 }
 0xdbc   :  { %4303 = vmatmul.mubr.msk.f32.vlgmr.msra.gmra.mxu0 %vm238_vm3, %v1489_v2  ;;  %4314 = vmatmul.mubr.msk.f32.vlgmr.msra.gmra.mxu1 %vm238_vm3, %v5354_v29  ;;  %v5457_v2 = vld [vmem:[%s5836_s4 + $0x10] sm:$0xff] }
 0xdbd   :  { %4316 = vmatprep.subr.mxu0 %v4851_v1  ;;  %4324 = vmatprep.mubr.msk.f32.mxu0 %vm4852_vm0, %v4851_v1 }
 0xdbe   :  { %4317 = vmatpush3.msra.mxu0 %v5032_v35  ;;  %4328 = vmatpush3.msra.mxu1 %v5145_v39 }
 0xdbf   :  { %4318 = vmatprep.subr.mxu0 %v4851_v1  ;;  %4329 = vmatprep.subr.mxu1 %v4851_v1 }
 0xdc0   :  { %4319 = vmatpush3.msra.mxu0 %v5042_v37  ;;  %4330 = vmatpush3.msra.mxu1 %v5147_v41 }
 0xdc1   :  { %4320 = vmatprep.subr.mxu0 %v4851_v1  ;;  %4331 = vmatprep.subr.mxu1 %v4851_v1 }
 0xdc2   :  { %4321 = vmatpush3.msra.mxu0 %v5052_v40  ;;  %4332 = vmatpush3.msra.mxu1 %v5151_v25 }
 0xdc3   :  { %4322 = vmatprep.subr.mxu0 %v4851_v1  ;;  %4333 = vmatprep.subr.mxu1 %v4851_v1 }
 0xdc4   :  { %4323 = vmatpush3.msra.mxu0 %v5061_v42  ;;  %4334 = vmatpush3.msra.mxu1 %v5159_v46 }
 0xdc5   :  { %4338 = vmatprep.subr.mxu0 %v4851_v1  ;;  %4335 = vmatprep.mubr.msk.f32.mxu1 %vm4852_vm0, %v4851_v1 }
 0xdc6   :  { %4349 = vmatprep.subr.mxu1 %v4851_v1 }
 0xe74   :  { %v1558_v26 = vpop.f32.mrf.mxu0 }
 0xe75   :  { %v1559_v27 = vadd.f32 %v1558_v26, %v5324_v8  ;;  %v5468_v26 = vld [vmem:[#allocation7 + $0x18] sm:$0xff] }
 0xe76   :  { %v4282_v30 = vpop.f32.mrf.mxu0 }
 0xe77   :  { %v1562_v33 = vadd.f32 %v5204_v63, %v1559_v27 }
 0xe79   :  { %4639 = vtanh.f32 %v1562_v33  ;;  %v3852_v28 = vmul.f32 -1.442695, %v1562_v33 }
 0xe7c   :  { %v1748_v35 = vpop.f32.mrf.mxu0  ;;  %v1823_v12 = vpop.f32.mrf.mxu1 }
 0xe7d   :  { %v1824_v13 = vadd.f32 %v1823_v12, %v1748_v35 }
 0xe7e   :  { %v4304_v47 = vpop.f32.mrf.mxu0  ;;  %v4315_v14 = vpop.f32.mrf.mxu1 }
 0xe7f   :  { %v1827_v3 = vadd.f32 %v5131_v60, %v1824_v13 }
 0xe81   :  { %4641 = vtanh.f32 %v1827_v3  ;;  %v3857_v8 = vmul.f32 -1.442695, %v1827_v3 }
 0xe82   :  { %4643 = vpow2.f32 %v3852_v28 }
 0xe83   :  { %4645 = vpow2.f32 %v3857_v8 }
 0xe86   :  { %v4640_v6 = vpop.eup %4639 }
 0xe87   :  { %1572 = vrot.lane.b32.xlu0 %v4640_v6, %s4853_s14 }
 0xe8e   :  { %v4642_v7 = vpop.eup %4641 }
 0xe8f   :  { %1837 = vrot.lane.b32.xlu1 %v4642_v7, %s4853_s14  ;;  %v4644_v15 = vpop.eup %4643 }
 0xe90   :  { %v1566_v32 = vadd.f32 1.0, %v4644_v15  ;;  %v4646_v16 = vpop.eup %4645 }
 0xe91   :  { %v1831_v17 = vadd.f32 1.0, %v4646_v16 }
 0xe92   :  { %4647 = vrcp.f32 %v1566_v32 }
 0xe93   :  { %4649 = vrcp.f32 %v1831_v17 }
 0xe9f   :  { %v4648_v49 = vpop.eup %4647 }
 0xea0   :  { %v4650_v20 = vpop.eup %4649  ;;  %v1570_v53 = vmul.f32 %v4648_v49, %v5283_v5 }
 0xea1   :  { %v1835_v24 = vmul.f32 %v4650_v20, %v5334_v59  ;;  %v5404_v59 = vld [vmem:[%s5834_s2 + $0x18] sm:$0xff] }
 0xef9   :  { %v1573_v19 = vpop.permute.xlu0 %1572 }
 0xefa   :  { %v1575_v60 = vmul.f32 %v4648_v49, %v1573_v19 }
 0xefc   :  { %1577 = vrot.lane.b32.xlu0 %v1575_v60, %s4853_s14 }
 0xf01   :  { %v1838_v18 = vpop.permute.xlu1 %1837 }
 0xf02   :  { %v1840_v21 = vmul.f32 %v4650_v20, %v1838_v18 }
 0xf04   :  { %1842 = vrot.lane.b32.xlu1 %v1840_v21, %s4853_s14 }
 0xf6e   :  { %v1578_v22 = vpop.permute.xlu0 %1577 }
 0xf6f   :  { %v5389_v23 = vadd.f32 %v1578_v22, %v1570_v53 }
 0xf71   :  { %4651 = vtanh.f32 %v5389_v23 }
 0xf76   :  { %v1843_v10 = vpop.permute.xlu1 %1842 }
 0xf77   :  { %v5393_v52 = vadd.f32 %v1843_v10, %v1835_v24 }
 0xf79   :  { %4653 = vtanh.f32 %v5393_v52 }
 0xf7e   :  { %v4652_v31 = vpop.eup %4651 }
 0xf7f   :  { %1583 = vrot.lane.b32.xlu0 %v4652_v31, %s4853_s14 }
 0xf86   :  { %v4654_v34 = vpop.eup %4653 }
 0xf87   :  { %1848 = vrot.lane.b32.xlu1 %v4654_v34, %s4853_s14 }
 0xff1   :  { %v1584_v43 = vpop.permute.xlu0 %1583 }
 0xff2   :  { %v1586_v5 = vmul.f32 %v4648_v49, %v1584_v43 }
 0xff4   :  { %1853 = vrot.lane.b32.xlu0 %v1586_v5, %s4854_s0 }
 0xff9   :  { %v1849_v45 = vpop.permute.xlu1 %1848 }
 0xffa   :  { %v1851_v48 = vmul.f32 %v4650_v20, %v1849_v45 }
 0xffc   :  { %1928 = vrot.lane.b32.xlu1 %v1851_v48, %s4854_s0 }
0x1066   :  { %v1854_v50 = vpop.permute.xlu0 %1853 }
0x1067   :  { %4325 = vmatmul.mubr.msk.f32.vlgmr.msra.gmra.mxu0 %vm238_vm3, %v1854_v50 }
0x1068   :  { %4339 = vmatpush3.msra.mxu0 %v5404_v59  ;;  %4346 = vmatprep.mubr.msk.f32.mxu0 %vm4852_vm0, %v4851_v1 }
0x1069   :  { %4340 = vmatprep.subr.mxu0 %v4851_v1 }
0x106a   :  { %4341 = vmatpush3.msra.mxu0 %v5413_v61 }
0x106b   :  { %4342 = vmatprep.subr.mxu0 %v4851_v1 }
0x106c   :  { %4343 = vmatpush3.msra.mxu0 %v5420_v62 }
0x106d   :  { %4344 = vmatprep.subr.mxu0 %v4851_v1 }
0x106e   :  { %4345 = vmatpush3.msra.mxu0 %v5427_v4  ;;  %v1929_v36 = vpop.permute.xlu1 %1928 }
0x106f   :  { %4336 = vmatmul.mubr.msk.f32.vlgmr.msra.gmra.mxu1 %vm238_vm3, %v1929_v36  ;;  %4347 = vmatmul.mubr.msk.f32.vlgmr.msra.gmra.mxu0 %vm238_vm3, %v5354_v29  ;;  %v5462_v29 = vld [vmem:[#allocation3] sm:$0xff] }
0x1070   :  { %4350 = vmatpush3.msra.mxu1 %v5433_v58  ;;  %4357 = vmatprep.mubr.msk.f32.mxu1 %vm4852_vm0, %v4851_v1 }
0x1071   :  { %4351 = vmatprep.subr.mxu1 %v4851_v1  ;;  %4360 = vmatprep.subr.mxu0 %v4851_v1 }
0x1072   :  { %4352 = vmatpush3.msra.mxu1 %v5440_v51  ;;  %4361 = vmatpush3.msra.mxu0 %v5446_v11 }
0x1073   :  { %4353 = vmatprep.subr.mxu1 %v4851_v1  ;;  %4362 = vmatprep.subr.mxu0 %v4851_v1 }
0x1074   :  { %4354 = vmatpush3.msra.mxu1 %v5451_v9  ;;  %4363 = vmatpush3.msra.mxu0 %v5457_v2 }
0x1075   :  { %4355 = vmatprep.subr.mxu1 %v4851_v1  ;;  %4364 = vmatprep.subr.mxu0 %v4851_v1 }
0x1076   :  { %4356 = vmatpush3.msra.mxu1 %v5462_v29  ;;  %4365 = vmatpush3.msra.mxu0 %v5049_v38 }
0x1077   :  { %4358 = vmatmul.mubr.msk.f32.vlgmr.msra.gmra.mxu1 %vm238_vm3, %v1929_v36  ;;  %4371 = vmatprep.subr.mxu1 %v4851_v1  ;;  %v5560_v36 = vld [vmem:[%s5838_s6] ss:$0 sm:$0xff] }
0x1078   :  { %4372 = vmatpush3.msra.mxu1 %v5468_v26  ;;  %4366 = vmatprep.subr.mxu0 %v4851_v1 }
0x1079   :  { %4373 = vmatprep.subr.mxu1 %v4851_v1  ;;  %4367 = vmatpush3.msra.mxu0 %v5077_v44  ;;  %v5488_v44 = vld [vmem:[%s5835_s3] ss:$0 sm:$0xff] }
0x107a   :  { %4374 = vmatpush3.msra.mxu1 %v5042_v37  ;;  %4368 = vmatprep.mubr.msk.f32.mxu0 %vm4852_vm0, %v4851_v1  ;;  %v216_v27 = vadd.f32 %v5488_v44, %v5120_v55 }
0x107b   :  { %4375 = vmatprep.subr.mxu1 %v4851_v1  ;;  %4379 = vmatprep.mubr.msk.f32.mxu1 %vm4852_vm0, %v4851_v1 }
0x107c   :  { %4376 = vmatpush3.msra.mxu1 %v5052_v40  ;;  %4382 = vmatprep.subr.mxu0 %v4851_v1 }
0x107d   :  { %4377 = vmatprep.subr.mxu1 %v4851_v1 }
0x107e   :  { %4378 = vmatpush3.msra.mxu1 %v5061_v42 }
0x107f   :  { %4393 = vmatprep.subr.mxu1 %v4851_v1 }
0x1127   :  { %v1923_v38 = vpop.f32.mrf.mxu0 }
0x1129   :  { %v4326_v37 = vpop.f32.mrf.mxu0 }
0x112f   :  { %v1998_v30 = vpop.f32.mrf.mxu1  ;;  %v2093_v40 = vpop.f32.mrf.mxu0 }
0x1130   :  { %v1999_v33 = vadd.f32 %v1998_v30, %v1923_v38  ;;  %v2097_v35 = vadd.f32 %v2093_v40, %v216_v27  ;;  %v221_v27 = vadd.f32 %v5488_v44, %v5118_v54 }
0x1131   :  { %v4337_v12 = vpop.f32.mrf.mxu1  ;;  %v4348_v13 = vpop.f32.mrf.mxu0 }
0x1132   :  { %v2002_v42 = vadd.f32 %v5204_v63, %v1999_v33  ;;  %4655 = vtanh.f32 %v2097_v35  ;;  %v3862_v55 = vmul.f32 -1.442695, %v2097_v35 }
0x1134   :  { %4657 = vtanh.f32 %v2002_v42  ;;  %v3860_v7 = vmul.f32 -1.442695, %v2002_v42 }
0x1135   :  { %4659 = vpow2.f32 %v3862_v55 }
0x1136   :  { %4661 = vpow2.f32 %v3860_v7 }
0x1137   :  { %v5493_v47 = vpop.f32.mrf.mxu1 }
0x1139   :  { %v4359_v14 = vpop.f32.mrf.mxu1 }
0x113f   :  { %v4656_v3 = vpop.eup %4655 }
0x1140   :  { %2107 = vrot.lane.b32.xlu0 %v4656_v3, %s4853_s14 }
0x1141   :  { %v4658_v6 = vpop.eup %4657 }
0x1142   :  { %2012 = vrot.lane.b32.xlu1 %v4658_v6, %s4853_s14  ;;  %v4660_v28 = vpop.eup %4659 }
0x1143   :  { %v4662_v8 = vpop.eup %4661  ;;  %v2101_v15 = vadd.f32 1.0, %v4660_v28 }
0x1144   :  { %v2006_v32 = vadd.f32 1.0, %v4662_v8 }
0x1145   :  { %4663 = vrcp.f32 %v2101_v15 }
0x1146   :  { %4665 = vrcp.f32 %v2006_v32 }
0x1152   :  { %v4664_v63 = vpop.eup %4663 }
0x1153   :  { %v4666_v49 = vpop.eup %4665  ;;  %v2105_v20 = vmul.f32 %v4664_v63, %v5338_v0 }
0x1154   :  { %v2010_v53 = vmul.f32 %v4666_v49, %v5389_v23 }
0x11b2   :  { %v2108_v16 = vpop.permute.xlu0 %2107 }
0x11b3   :  { %v2110_v17 = vmul.f32 %v4664_v63, %v2108_v16 }
0x11b4   :  { %v2013_v19 = vpop.permute.xlu1 %2012 }
0x11b5   :  { %v2015_v60 = vmul.f32 %v4666_v49, %v2013_v19  ;;  %2112 = vrot.lane.b32.xlu0 %v2110_v17, %s4853_s14 }
0x11b7   :  { %2017 = vrot.lane.b32.xlu1 %v2015_v60, %s4853_s14 }
0x1227   :  { %v2113_v18 = vpop.permute.xlu0 %2112 }
0x1228   :  { %v5500_v21 = vadd.f32 %v2113_v18, %v2105_v20 }
0x1229   :  { %v2018_v22 = vpop.permute.xlu1 %2017 }
0x122a   :  { %4667 = vtanh.f32 %v5500_v21  ;;  %v5504_v24 = vadd.f32 %v2018_v22, %v2010_v53 }
0x122c   :  { %4669 = vtanh.f32 %v5504_v24 }
0x1237   :  { %v4668_v10 = vpop.eup %4667 }
0x1238   :  { %2118 = vrot.lane.b32.xlu0 %v4668_v10, %s4853_s14 }
0x1239   :  { %v4670_v31 = vpop.eup %4669 }
0x123a   :  { %2023 = vrot.lane.b32.xlu1 %v4670_v31, %s4853_s14  ;;  %v5600_v31 = vld [vmem:[#allocation5 + $0x18] sm:$0xff] }
0x12aa   :  { %v2119_v34 = vpop.permute.xlu0 %2118 }
0x12ab   :  { %v2121_v0 = vmul.f32 %v4664_v63, %v2119_v34  ;;  %v5605_v34 = vld [vmem:[#allocation7 + $0x10] sm:$0xff] }
0x12ac   :  { %v2024_v43 = vpop.permute.xlu1 %2023 }
0x12ad   :  { %v2026_v5 = vmul.f32 %v4666_v49, %v2024_v43  ;;  %2193 = vrot.lane.b32.xlu0 %v2121_v0, %s4854_s0  ;;  %v5608_v0 = vld [vmem:[#allocation5 + $0x10] sm:$0xff]  ;;  %v5613_v43 = vld [vmem:[#allocation7 + $0x8] sm:$0xff] }
0x12af   :  { %2293 = vrot.lane.b32.xlu1 %v2026_v5, %s4854_s0  ;;  %v5616_v5 = vld [vmem:[#allocation5 + $0x8] sm:$0xff] }
0x131f   :  { %v2194_v23 = vpop.permute.xlu0 %2193 }
0x1320   :  { %4369 = vmatmul.mubr.msk.f32.vlgmr.msra.gmra.mxu0 %vm238_vm3, %v2194_v23 }
0x1321   :  { %v2294_v45 = vpop.permute.xlu1 %2293  ;;  %4383 = vmatpush3.msra.mxu0 %v5145_v39  ;;  %4390 = vmatprep.mubr.msk.f32.mxu0 %vm4852_vm0, %v4851_v1  ;;  %v5543_v39 = vld [vmem:[%s5836_s4 + $0x8] sm:$0xff] }
0x1322   :  { %4380 = vmatmul.mubr.msk.f32.vlgmr.msra.gmra.mxu1 %vm238_vm3, %v2294_v45  ;;  %4384 = vmatprep.subr.mxu0 %v4851_v1  ;;  %v5624_v45 = vld [vmem:[#allocation5] sm:$0xff] }
0x1323   :  { %4394 = vmatpush3.msra.mxu1 %v5404_v59  ;;  %4401 = vmatprep.mubr.msk.f32.mxu1 %vm4852_vm0, %v4851_v1 }
0x1324   :  { %4395 = vmatprep.subr.mxu1 %v4851_v1  ;;  %4385 = vmatpush3.msra.mxu0 %v5147_v41  ;;  %v5550_v41 = vld [vmem:[%s5836_s4] sm:$0xff] }
0x1325   :  { %4396 = vmatpush3.msra.mxu1 %v5413_v61  ;;  %4386 = vmatprep.subr.mxu0 %v4851_v1 }
0x1326   :  { %4397 = vmatprep.subr.mxu1 %v4851_v1  ;;  %4387 = vmatpush3.msra.mxu0 %v5151_v25 }
0x1327   :  { %4398 = vmatpush3.msra.mxu1 %v5420_v62  ;;  %4388 = vmatprep.subr.mxu0 %v4851_v1 }
0x1328   :  { %4399 = vmatprep.subr.mxu1 %v4851_v1  ;;  %4389 = vmatpush3.msra.mxu0 %v5159_v46 }
0x1329   :  { %4400 = vmatpush3.msra.mxu1 %v5427_v4  ;;  %4404 = vmatprep.subr.mxu0 %v4851_v1 }
0x132a   :  { %4402 = vmatmul.mubr.msk.f32.vlgmr.msra.gmra.mxu1 %vm238_vm3, %v2194_v23  ;;  %4415 = vmatprep.subr.mxu1 %v4851_v1  ;;  %v5621_v23 = vld [vmem:[#allocation7] sm:$0xff] }
0x132b   :  { %4416 = vmatpush3.msra.mxu1 %v5446_v11  ;;  %4423 = vmatprep.mubr.msk.f32.mxu1 %vm4852_vm0, %v4851_v1 }
0x132c   :  { %4417 = vmatprep.subr.mxu1 %v4851_v1 }
0x132d   :  { %4418 = vmatpush3.msra.mxu1 %v5457_v2 }
0x132e   :  { %4419 = vmatprep.subr.mxu1 %v4851_v1 }
0x132f   :  { %4420 = vmatpush3.msra.mxu1 %v5543_v39 }
0x1330   :  { %4421 = vmatprep.subr.mxu1 %v4851_v1 }
0x1331   :  { %4422 = vmatpush3.msra.mxu1 %v5550_v41 }
0x1332   :  { %4437 = vmatprep.subr.mxu1 %v4851_v1 }
0x13e0   :  { %v2263_v25 = vpop.f32.mrf.mxu0 }
0x13e1   :  { %v2264_v46 = vadd.f32 %v2263_v25, %v5493_v47 }
0x13e2   :  { %v4370_v48 = vpop.f32.mrf.mxu0  ;;  %v5555_v50 = vpop.f32.mrf.mxu1 }
0x13e3   :  { %v2267_v38 = vadd.f32 %v5560_v36, %v2264_v46 }
0x13e4   :  { %v4381_v37 = vpop.f32.mrf.mxu1 }
0x13e5   :  { %4671 = vtanh.f32 %v2267_v38  ;;  %v3865_v13 = vmul.f32 -1.442695, %v2267_v38  ;;  %v5635_v38 = vld [vmem:[%s5841_s9] ss:$0 sm:$0xff] }
0x13ea   :  { %v2533_v30 = vpop.f32.mrf.mxu1 }
0x13eb   :  { %v2537_v40 = vadd.f32 %v2533_v30, %v221_v27 }
0x13ec   :  { %v4403_v33 = vpop.f32.mrf.mxu1 }
0x13ed   :  { %4673 = vtanh.f32 %v2537_v40  ;;  %v3870_v42 = vmul.f32 -1.442695, %v2537_v40 }
0x13ee   :  { %4675 = vpow2.f32 %v3865_v13 }
0x13ef   :  { %4677 = vpow2.f32 %v3870_v42 }
0x13f2   :  { %v4672_v35 = vpop.eup %4671 }
0x13f3   :  { %2277 = vrot.lane.b32.xlu0 %v4672_v35, %s4853_s14 }
0x13fa   :  { %v4674_v12 = vpop.eup %4673 }
0x13fb   :  { %2547 = vrot.lane.b32.xlu1 %v4674_v12, %s4853_s14  ;;  %v4676_v47 = vpop.eup %4675 }
0x13fc   :  { %v2271_v14 = vadd.f32 1.0, %v4676_v47  ;;  %v4678_v3 = vpop.eup %4677 }
0x13fd   :  { %v2541_v6 = vadd.f32 1.0, %v4678_v3 }
0x13fe   :  { %4679 = vrcp.f32 %v2271_v14 }
0x13ff   :  { %4681 = vrcp.f32 %v2541_v6 }
0x140b   :  { %v4680_v54 = vpop.eup %4679 }
0x140c   :  { %v4682_v28 = vpop.eup %4681  ;;  %v2275_v32 = vmul.f32 %v4680_v54, %v5393_v52 }
0x140d   :  { %v2545_v17 = vmul.f32 %v4682_v28, %v5500_v21 }
0x1465   :  { %v2278_v55 = vpop.permute.xlu0 %2277 }
0x1466   :  { %v2280_v7 = vmul.f32 %v4680_v54, %v2278_v55 }
0x1468   :  { %2282 = vrot.lane.b32.xlu0 %v2280_v7, %s4853_s14 }
0x146d   :  { %v2548_v8 = vpop.permute.xlu1 %2547 }
0x146e   :  { %v2550_v15 = vmul.f32 %v4682_v28, %v2548_v8 }
0x1470   :  { %2552 = vrot.lane.b32.xlu1 %v2550_v15, %s4853_s14 }
0x14da   :  { %v2283_v63 = vpop.permute.xlu0 %2282 }
0x14db   :  { %v5570_v16 = vadd.f32 %v2283_v63, %v2275_v32 }
0x14dd   :  { %4683 = vtanh.f32 %v5570_v16 }
0x14e2   :  { %v2553_v49 = vpop.permute.xlu1 %2552 }
0x14e3   :  { %v5574_v19 = vadd.f32 %v2553_v49, %v2545_v17 }
0x14e5   :  { %4685 = vtanh.f32 %v5574_v19 }
0x14ea   :  { %v4684_v60 = vpop.eup %4683 }
0x14eb   :  { %2288 = vrot.lane.b32.xlu0 %v4684_v60, %s4853_s14 }
0x14f2   :  { %v4686_v20 = vpop.eup %4685 }
0x14f3   :  { %2558 = vrot.lane.b32.xlu1 %v4686_v20, %s4853_s14 }
0x155d   :  { %v2289_v18 = vpop.permute.xlu0 %2288 }
0x155e   :  { %v2291_v52 = vmul.f32 %v4680_v54, %v2289_v18 }
0x1560   :  { %2368 = vrot.lane.b32.xlu0 %v2291_v52, %s4854_s0 }
0x1565   :  { %v2559_v53 = vpop.permute.xlu1 %2558 }
0x1566   :  { %v2561_v22 = vmul.f32 %v4682_v28, %v2559_v53 }
0x1568   :  { %2633 = vrot.lane.b32.xlu1 %v2561_v22, %s4854_s0 }
0x15d2   :  { %v2369_v21 = vpop.permute.xlu0 %2368 }
0x15d3   :  { %4391 = vmatmul.mubr.msk.f32.vlgmr.msra.gmra.mxu0 %vm238_vm3, %v2369_v21 }
0x15d4   :  { %4405 = vmatpush3.msra.mxu0 %v5433_v58  ;;  %4412 = vmatprep.mubr.msk.f32.mxu0 %vm4852_vm0, %v4851_v1 }
0x15d5   :  { %4406 = vmatprep.subr.mxu0 %v4851_v1 }
0x15d6   :  { %4407 = vmatpush3.msra.mxu0 %v5440_v51 }
0x15d7   :  { %4408 = vmatprep.subr.mxu0 %v4851_v1 }
0x15d8   :  { %4409 = vmatpush3.msra.mxu0 %v5451_v9 }
0x15d9   :  { %4410 = vmatprep.subr.mxu0 %v4851_v1 }
0x15da   :  { %v5590_v10 = vpop.permute.xlu1 %2633  ;;  %4411 = vmatpush3.msra.mxu0 %v5462_v29 }
0x15db   :  { %4413 = vmatmul.mubr.msk.f32.vlgmr.msra.gmra.mxu0 %vm238_vm3, %v2369_v21  ;;  %4424 = vmatmul.mubr.msk.f32.vlgmr.msra.gmra.mxu1 %vm238_vm3, %v5590_v10 }
0x15dc   :  { %4426 = vmatprep.subr.mxu0 %v4851_v1  ;;  %4434 = vmatprep.mubr.msk.f32.mxu0 %vm4852_vm0, %v4851_v1 }
0x15dd   :  { %4427 = vmatpush3.msra.mxu0 %v5468_v26  ;;  %4438 = vmatpush3.msra.mxu1 %v5600_v31 }
0x15de   :  { %4428 = vmatprep.subr.mxu0 %v4851_v1  ;;  %4439 = vmatprep.subr.mxu1 %v4851_v1 }
0x15df   :  { %4429 = vmatpush3.msra.mxu0 %v5605_v34  ;;  %4440 = vmatpush3.msra.mxu1 %v5608_v0 }
0x15e0   :  { %4430 = vmatprep.subr.mxu0 %v4851_v1  ;;  %4441 = vmatprep.subr.mxu1 %v4851_v1 }
0x15e1   :  { %4431 = vmatpush3.msra.mxu0 %v5613_v43  ;;  %4442 = vmatpush3.msra.mxu1 %v5616_v5 }
0x15e2   :  { %4432 = vmatprep.subr.mxu0 %v4851_v1  ;;  %4443 = vmatprep.subr.mxu1 %v4851_v1 }
0x15e3   :  { %4433 = vmatpush3.msra.mxu0 %v5621_v23  ;;  %4444 = vmatpush3.msra.mxu1 %v5624_v45 }
0x15e4   :  { %4448 = vmatprep.subr.mxu0 %v4851_v1  ;;  %4445 = vmatprep.mubr.msk.f32.mxu1 %vm4852_vm0, %v4851_v1 }
0x15e5   :  { %4459 = vmatprep.subr.mxu1 %v4851_v1 }
0x1693   :  { %v2438_v25 = vpop.f32.mrf.mxu0 }
0x1694   :  { %v2439_v46 = vadd.f32 %v2438_v25, %v5555_v50 }
0x1695   :  { %v4392_v48 = vpop.f32.mrf.mxu0 }
0x1696   :  { %v2442_v37 = vadd.f32 %v5635_v38, %v2439_v46 }
0x1698   :  { %4687 = vtanh.f32 %v2442_v37  ;;  %v3868_v42 = vmul.f32 -1.442695, %v2442_v37  ;;  %v226_v37 = vadd.f32 %v5488_v44, %v5124_v57 }
0x169b   :  { %v2628_v27 = vpop.f32.mrf.mxu0  ;;  %v2703_v30 = vpop.f32.mrf.mxu1 }
0x169c   :  { %v2704_v40 = vadd.f32 %v2703_v30, %v2628_v27 }
0x169d   :  { %v4414_v33 = vpop.f32.mrf.mxu0  ;;  %v4425_v35 = vpop.f32.mrf.mxu1 }
0x169e   :  { %v2707_v12 = vadd.f32 %v5560_v36, %v2704_v40 }
0x16a0   :  { %4689 = vtanh.f32 %v2707_v12  ;;  %v3873_v47 = vmul.f32 -1.442695, %v2707_v12 }
0x16a1   :  { %4691 = vpow2.f32 %v3868_v42 }
0x16a2   :  { %4693 = vpow2.f32 %v3873_v47 }
0x16a5   :  { %v4688_v13 = vpop.eup %4687 }
0x16a6   :  { %2452 = vrot.lane.b32.xlu0 %v4688_v13, %s4853_s14 }
0x16ad   :  { %v4690_v50 = vpop.eup %4689 }
0x16ae   :  { %2717 = vrot.lane.b32.xlu1 %v4690_v50, %s4853_s14  ;;  %v4692_v14 = vpop.eup %4691 }
0x16af   :  { %v2446_v3 = vadd.f32 1.0, %v4692_v14  ;;  %v4694_v6 = vpop.eup %4693 }
0x16b0   :  { %v2711_v54 = vadd.f32 1.0, %v4694_v6 }
0x16b1   :  { %4695 = vrcp.f32 %v2446_v3 }
0x16b2   :  { %4697 = vrcp.f32 %v2711_v54 }
0x16be   :  { %v4696_v55 = vpop.eup %4695 }
0x16bf   :  { %v4698_v8 = vpop.eup %4697  ;;  %v2450_v63 = vmul.f32 %v4696_v55, %v5504_v24 }
0x16c0   :  { %v2715_v60 = vmul.f32 %v4698_v8, %v5570_v16 }
0x1718   :  { %v2453_v7 = vpop.permute.xlu0 %2452 }
0x1719   :  { %v2455_v28 = vmul.f32 %v4696_v55, %v2453_v7 }
0x171b   :  { %2457 = vrot.lane.b32.xlu0 %v2455_v28, %s4853_s14 }
0x1720   :  { %v2718_v15 = vpop.permute.xlu1 %2717 }
0x1721   :  { %v2720_v32 = vmul.f32 %v4698_v8, %v2718_v15 }
0x1723   :  { %2722 = vrot.lane.b32.xlu1 %v2720_v32, %s4853_s14 }
0x178d   :  { %v2458_v17 = vpop.permute.xlu0 %2457 }
0x178e   :  { %v5644_v49 = vadd.f32 %v2458_v17, %v2450_v63 }
0x1790   :  { %4699 = vtanh.f32 %v5644_v49 }
0x1795   :  { %v2723_v20 = vpop.permute.xlu1 %2722 }
0x1796   :  { %v5648_v18 = vadd.f32 %v2723_v20, %v2715_v60 }
0x1798   :  { %4701 = vtanh.f32 %v5648_v18 }
0x179d   :  { %v4700_v52 = vpop.eup %4699 }
0x179e   :  { %2463 = vrot.lane.b32.xlu0 %v4700_v52, %s4853_s14 }
0x17a5   :  { %v4702_v53 = vpop.eup %4701 }
0x17a6   :  { %2728 = vrot.lane.b32.xlu1 %v4702_v53, %s4853_s14 }
0x1810   :  { %v2464_v22 = vpop.permute.xlu0 %2463 }
0x1811   :  { %v2466_v24 = vmul.f32 %v4696_v55, %v2464_v22 }
0x1813   :  { %2733 = vrot.lane.b32.xlu0 %v2466_v24, %s4854_s0 }
0x1818   :  { %v2729_v21 = vpop.permute.xlu1 %2728 }
0x1819   :  { %v2731_v25 = vmul.f32 %v4698_v8, %v2729_v21 }
0x181b   :  { %2808 = vrot.lane.b32.xlu1 %v2731_v25, %s4854_s0 }
0x1885   :  { %v2734_v16 = vpop.permute.xlu0 %2733 }
0x1886   :  { %4435 = vmatmul.mubr.msk.f32.vlgmr.msra.gmra.mxu0 %vm238_vm3, %v2734_v16 }
0x1887   :  { %4449 = vmatpush3.msra.mxu0 %v5404_v59  ;;  %4456 = vmatprep.mubr.msk.f32.mxu0 %vm4852_vm0, %v4851_v1 }
0x1888   :  { %4450 = vmatprep.subr.mxu0 %v4851_v1 }
0x1889   :  { %4451 = vmatpush3.msra.mxu0 %v5413_v61 }
0x188a   :  { %4452 = vmatprep.subr.mxu0 %v4851_v1 }
0x188b   :  { %4453 = vmatpush3.msra.mxu0 %v5420_v62 }
0x188c   :  { %4454 = vmatprep.subr.mxu0 %v4851_v1 }
0x188d   :  { %4455 = vmatpush3.msra.mxu0 %v5427_v4  ;;  %v2809_v46 = vpop.permute.xlu1 %2808 }
0x188e   :  { %4446 = vmatmul.mubr.msk.f32.vlgmr.msra.gmra.mxu1 %vm238_vm3, %v2809_v46  ;;  %4457 = vmatmul.mubr.msk.f32.vlgmr.msra.gmra.mxu0 %vm238_vm3, %v5590_v10 }
0x188f   :  { %4460 = vmatpush3.msra.mxu1 %v5433_v58  ;;  %4467 = vmatprep.mubr.msk.f32.mxu1 %vm4852_vm0, %v4851_v1 }
0x1890   :  { %4461 = vmatprep.subr.mxu1 %v4851_v1  ;;  %4470 = vmatprep.subr.mxu0 %v4851_v1 }
0x1891   :  { %4462 = vmatpush3.msra.mxu1 %v5440_v51  ;;  %4471 = vmatpush3.msra.mxu0 %v5446_v11 }
0x1892   :  { %4463 = vmatprep.subr.mxu1 %v4851_v1  ;;  %4472 = vmatprep.subr.mxu0 %v4851_v1 }
0x1893   :  { %4464 = vmatpush3.msra.mxu1 %v5451_v9  ;;  %4473 = vmatpush3.msra.mxu0 %v5457_v2 }
0x1894   :  { %4465 = vmatprep.subr.mxu1 %v4851_v1  ;;  %4474 = vmatprep.subr.mxu0 %v4851_v1 }
0x1895   :  { %4466 = vmatpush3.msra.mxu1 %v5462_v29  ;;  %4475 = vmatpush3.msra.mxu0 %v5543_v39 }
0x1896   :  { %4468 = vmatmul.mubr.msk.f32.vlgmr.msra.gmra.mxu1 %vm238_vm3, %v2809_v46  ;;  %4481 = vmatprep.subr.mxu1 %v4851_v1 }
0x1897   :  { %4482 = vmatpush3.msra.mxu1 %v5468_v26  ;;  %4476 = vmatprep.subr.mxu0 %v4851_v1 }
0x1898   :  { %4483 = vmatprep.subr.mxu1 %v4851_v1  ;;  %4477 = vmatpush3.msra.mxu0 %v5550_v41 }
0x1899   :  { %4484 = vmatpush3.msra.mxu1 %v5605_v34  ;;  %4478 = vmatprep.mubr.msk.f32.mxu0 %vm4852_vm0, %v4851_v1 }
0x189a   :  { %4485 = vmatprep.subr.mxu1 %v4851_v1  ;;  %4489 = vmatprep.mubr.msk.f32.mxu1 %vm4852_vm0, %v4851_v1 }
0x189b   :  { %4486 = vmatpush3.msra.mxu1 %v5613_v43  ;;  %4492 = vmatprep.subr.mxu0 %v4851_v1 }
0x189c   :  { %4487 = vmatprep.subr.mxu1 %v4851_v1 }
0x189d   :  { %4488 = vmatpush3.msra.mxu1 %v5621_v23 }
0x189e   :  { %4503 = vmatprep.subr.mxu1 %v4851_v1 }
0x1946   :  { %v2803_v10 = vpop.f32.mrf.mxu0 }
0x1948   :  { %v4436_v48 = vpop.f32.mrf.mxu0 }
0x194e   :  { %v2878_v27 = vpop.f32.mrf.mxu1  ;;  %v2973_v30 = vpop.f32.mrf.mxu0 }
0x194f   :  { %v2879_v40 = vadd.f32 %v2878_v27, %v2803_v10  ;;  %v2977_v33 = vadd.f32 %v2973_v30, %v226_v37 }
0x1950   :  { %v4447_v35 = vpop.f32.mrf.mxu1  ;;  %v4458_v12 = vpop.f32.mrf.mxu0 }
0x1951   :  { %v2882_v13 = vadd.f32 %v5635_v38, %v2879_v40  ;;  %4703 = vtanh.f32 %v2977_v33  ;;  %v3878_v57 = vmul.f32 -1.442695, %v2977_v33 }
0x1953   :  { %4705 = vtanh.f32 %v2882_v13  ;;  %v3876_v3 = vmul.f32 -1.442695, %v2882_v13 }
0x1954   :  { %4707 = vpow2.f32 %v3878_v57 }
0x1955   :  { %4709 = vpow2.f32 %v3876_v3 }
0x1956   :  { %v5703_v50 = vpop.f32.mrf.mxu1 }
0x1958   :  { %v4469_v42 = vpop.f32.mrf.mxu1 }
0x195e   :  { %v4704_v47 = vpop.eup %4703 }
0x195f   :  { %2987 = vrot.lane.b32.xlu0 %v4704_v47, %s4853_s14 }
0x1960   :  { %v4706_v14 = vpop.eup %4705 }
0x1961   :  { %2892 = vrot.lane.b32.xlu1 %v4706_v14, %s4853_s14  ;;  %v4708_v6 = vpop.eup %4707 }
0x1962   :  { %v4710_v54 = vpop.eup %4709  ;;  %v2981_v55 = vadd.f32 1.0, %v4708_v6 }
0x1963   :  { %v2886_v7 = vadd.f32 1.0, %v4710_v54 }
0x1964   :  { %4711 = vrcp.f32 %v2981_v55 }
0x1965   :  { %4713 = vrcp.f32 %v2886_v7 }
0x1971   :  { %v4712_v28 = vpop.eup %4711 }
0x1972   :  { %v4714_v32 = vpop.eup %4713  ;;  %v2985_v60 = vmul.f32 %v4712_v28, %v5574_v19 }
0x1973   :  { %v2890_v53 = vmul.f32 %v4714_v32, %v5644_v49 }
0x19d1   :  { %v2988_v8 = vpop.permute.xlu0 %2987 }
0x19d2   :  { %v2990_v15 = vmul.f32 %v4712_v28, %v2988_v8 }
0x19d3   :  { %v2893_v63 = vpop.permute.xlu1 %2892 }
0x19d4   :  { %v2895_v17 = vmul.f32 %v4714_v32, %v2893_v63  ;;  %2992 = vrot.lane.b32.xlu0 %v2990_v15, %s4853_s14 }
0x19d6   :  { %2897 = vrot.lane.b32.xlu1 %v2895_v17, %s4853_s14 }
0x1a46   :  { %v2993_v20 = vpop.permute.xlu0 %2992 }
0x1a47   :  { %v5710_v52 = vadd.f32 %v2993_v20, %v2985_v60 }
0x1a48   :  { %v2898_v22 = vpop.permute.xlu1 %2897 }
0x1a49   :  { %4715 = vtanh.f32 %v5710_v52  ;;  %v5714_v24 = vadd.f32 %v2898_v22, %v2890_v53 }
0x1a4b   :  { %4717 = vtanh.f32 %v5714_v24 }
0x1a56   :  { %v4716_v21 = vpop.eup %4715 }
0x1a57   :  { %2998 = vrot.lane.b32.xlu0 %v4716_v21, %s4853_s14 }
0x1a58   :  { %v4718_v25 = vpop.eup %4717 }
0x1a59   :  { %2903 = vrot.lane.b32.xlu1 %v4718_v25, %s4853_s14 }
0x1ac9   :  { %v2999_v16 = vpop.permute.xlu0 %2998 }
0x1aca   :  { %v3001_v19 = vmul.f32 %v4712_v28, %v2999_v16 }
0x1acb   :  { %v2904_v46 = vpop.permute.xlu1 %2903 }
0x1acc   :  { %v2906_v10 = vmul.f32 %v4714_v32, %v2904_v46  ;;  %3073 = vrot.lane.b32.xlu0 %v3001_v19, %s4854_s0 }
0x1ace   :  { %3173 = vrot.lane.b32.xlu1 %v2906_v10, %s4854_s0 }
0x1b3e   :  { %v3074_v49 = vpop.permute.xlu0 %3073 }
0x1b3f   :  { %4479 = vmatmul.mubr.msk.f32.vlgmr.msra.gmra.mxu0 %vm238_vm3, %v3074_v49 }
0x1b40   :  { %v3174_v48 = vpop.permute.xlu1 %3173  ;;  %4493 = vmatpush3.msra.mxu0 %v5600_v31  ;;  %4500 = vmatprep.mubr.msk.f32.mxu0 %vm4852_vm0, %v4851_v1 }
0x1b41   :  { %4490 = vmatmul.mubr.msk.f32.vlgmr.msra.gmra.mxu1 %vm238_vm3, %v3174_v48  ;;  %4494 = vmatprep.subr.mxu0 %v4851_v1 }
0x1b42   :  { %4504 = vmatpush3.msra.mxu1 %v5404_v59  ;;  %4511 = vmatprep.mubr.msk.f32.mxu1 %vm4852_vm0, %v4851_v1 }
0x1b43   :  { %4505 = vmatprep.subr.mxu1 %v4851_v1  ;;  %4495 = vmatpush3.msra.mxu0 %v5608_v0 }
0x1b44   :  { %4506 = vmatpush3.msra.mxu1 %v5413_v61  ;;  %4496 = vmatprep.subr.mxu0 %v4851_v1 }
0x1b45   :  { %4507 = vmatprep.subr.mxu1 %v4851_v1  ;;  %4497 = vmatpush3.msra.mxu0 %v5616_v5 }
0x1b46   :  { %4508 = vmatpush3.msra.mxu1 %v5420_v62  ;;  %4498 = vmatprep.subr.mxu0 %v4851_v1 }
0x1b47   :  { %4509 = vmatprep.subr.mxu1 %v4851_v1  ;;  %4499 = vmatpush3.msra.mxu0 %v5624_v45 }
0x1b48   :  { %4510 = vmatpush3.msra.mxu1 %v5427_v4  ;;  %4514 = vmatprep.subr.mxu0 %v4851_v1 }
0x1b49   :  { %4512 = vmatmul.mubr.msk.f32.vlgmr.msra.gmra.mxu1 %vm238_vm3, %v3074_v49  ;;  %4525 = vmatprep.subr.mxu1 %v4851_v1 }
0x1b4a   :  { %4526 = vmatpush3.msra.mxu1 %v5446_v11  ;;  %4533 = vmatprep.mubr.msk.f32.mxu1 %vm4852_vm0, %v4851_v1 }
0x1b4b   :  { %4527 = vmatprep.subr.mxu1 %v4851_v1 }
0x1b4c   :  { %4528 = vmatpush3.msra.mxu1 %v5457_v2  ;;  %v231_v2 = vadd.f32 %v5488_v44, %v5122_v56 }
0x1b4d   :  { %4529 = vmatprep.subr.mxu1 %v4851_v1 }
0x1b4e   :  { %4530 = vmatpush3.msra.mxu1 %v5543_v39 }
0x1b4f   :  { %4531 = vmatprep.subr.mxu1 %v4851_v1 }
0x1b50   :  { %4532 = vmatpush3.msra.mxu1 %v5550_v41 }
0x1b51   :  { %4547 = vmatprep.subr.mxu1 %v4851_v1 }
0x1bff   :  { %v3143_v59 = vpop.f32.mrf.mxu0 }
0x1c00   :  { %v3144_v61 = vadd.f32 %v3143_v59, %v5703_v50 }
0x1c01   :  { %v4480_v62 = vpop.f32.mrf.mxu0  ;;  %v5755_v4 = vpop.f32.mrf.mxu1 }
0x1c02   :  { %v3147_v11 = vadd.f32 %v5560_v36, %v3144_v61 }
0x1c03   :  { %v4491_v37 = vpop.f32.mrf.mxu1 }
0x1c04   :  { %4719 = vtanh.f32 %v3147_v11  ;;  %v3881_v33 = vmul.f32 -1.442695, %v3147_v11 }
0x1c09   :  { %v3413_v39 = vpop.f32.mrf.mxu1 }
0x1c0a   :  { %v3417_v27 = vadd.f32 %v3413_v39, %v231_v2 }
0x1c0b   :  { %v4513_v30 = vpop.f32.mrf.mxu1 }
0x1c0c   :  { %4721 = vtanh.f32 %v3417_v27  ;;  %v3886_v35 = vmul.f32 -1.442695, %v3417_v27 }
0x1c0d   :  { %4723 = vpow2.f32 %v3881_v33 }
0x1c0e   :  { %4725 = vpow2.f32 %v3886_v35 }
0x1c11   :  { %v4720_v41 = vpop.eup %4719 }
0x1c12   :  { %3157 = vrot.lane.b32.xlu0 %v4720_v41, %s4853_s14 }
0x1c19   :  { %v4722_v40 = vpop.eup %4721 }
0x1c1a   :  { %3427 = vrot.lane.b32.xlu1 %v4722_v40, %s4853_s14  ;;  %v4724_v12 = vpop.eup %4723 }
0x1c1b   :  { %v3151_v13 = vadd.f32 1.0, %v4724_v12  ;;  %v4726_v50 = vpop.eup %4725 }
0x1c1c   :  { %v3421_v42 = vadd.f32 1.0, %v4726_v50 }
0x1c1d   :  { %4727 = vrcp.f32 %v3151_v13 }
0x1c1e   :  { %4729 = vrcp.f32 %v3421_v42 }
0x1c2a   :  { %v4728_v56 = vpop.eup %4727 }
0x1c2b   :  { %v4730_v14 = vpop.eup %4729  ;;  %v3155_v6 = vmul.f32 %v4728_v56, %v5648_v18 }
0x1c2c   :  { %v3425_v7 = vmul.f32 %v4730_v14, %v5710_v52 }
0x1c84   :  { %v3158_v44 = vpop.permute.xlu0 %3157 }
0x1c85   :  { %v3160_v47 = vmul.f32 %v4728_v56, %v3158_v44 }
0x1c87   :  { %3162 = vrot.lane.b32.xlu0 %v3160_v47, %s4853_s14 }
0x1c8c   :  { %v3428_v57 = vpop.permute.xlu1 %3427 }
0x1c8d   :  { %v3430_v3 = vmul.f32 %v4730_v14, %v3428_v57 }
0x1c8f   :  { %3432 = vrot.lane.b32.xlu1 %v3430_v3, %s4853_s14 }
0x1cf9   :  { %v3163_v54 = vpop.permute.xlu0 %3162 }
0x1cfa   :  { %v5765_v55 = vadd.f32 %v3163_v54, %v3155_v6 }
0x1cfc   :  { %4731 = vtanh.f32 %v5765_v55 }
0x1d01   :  { %v3433_v28 = vpop.permute.xlu1 %3432 }
0x1d02   :  { %v3435_v8 = vadd.f32 %v3433_v28, %v3425_v7 }
0x1d04   :  { %4733 = vtanh.f32 %v3435_v8 }
0x1d09   :  { %v4732_v15 = vpop.eup %4731 }
0x1d0a   :  { %3168 = vrot.lane.b32.xlu0 %v4732_v15, %s4853_s14 }
0x1d11   :  { %v4734_v32 = vpop.eup %4733 }
0x1d12   :  { %3438 = vrot.lane.b32.xlu1 %v4734_v32, %s4853_s14 }
0x1d7c   :  { %v3169_v63 = vpop.permute.xlu0 %3168 }
0x1d7d   :  { %v3171_v17 = vmul.f32 %v4728_v56, %v3169_v63 }
0x1d7f   :  { %3248 = vrot.lane.b32.xlu0 %v3171_v17, %s4854_s0 }
0x1d84   :  { %v3439_v18 = vpop.permute.xlu1 %3438 }
0x1d85   :  { %v3441_v60 = vmul.f32 %v4730_v14, %v3439_v18 }
0x1d87   :  { %3513 = vrot.lane.b32.xlu1 %v3441_v60, %s4854_s0 }
0x1df1   :  { %v3249_v20 = vpop.permute.xlu0 %3248 }
0x1df2   :  { %4501 = vmatmul.mubr.msk.f32.vlgmr.msra.gmra.mxu0 %vm238_vm3, %v3249_v20 }
0x1df3   :  { %4515 = vmatpush3.msra.mxu0 %v5433_v58  ;;  %4522 = vmatprep.mubr.msk.f32.mxu0 %vm4852_vm0, %v4851_v1 }
0x1df4   :  { %4516 = vmatprep.subr.mxu0 %v4851_v1 }
0x1df5   :  { %4517 = vmatpush3.msra.mxu0 %v5440_v51 }
0x1df6   :  { %4518 = vmatprep.subr.mxu0 %v4851_v1 }
0x1df7   :  { %4519 = vmatpush3.msra.mxu0 %v5451_v9 }
0x1df8   :  { %4520 = vmatprep.subr.mxu0 %v4851_v1 }
0x1df9   :  { %v3514_v52 = vpop.permute.xlu1 %3513  ;;  %4521 = vmatpush3.msra.mxu0 %v5462_v29 }
0x1dfa   :  { %4523 = vmatmul.mubr.msk.f32.vlgmr.msra.gmra.mxu0 %vm238_vm3, %v3249_v20  ;;  %4534 = vmatmul.mubr.msk.f32.vlgmr.msra.gmra.mxu1 %vm238_vm3, %v3514_v52  ;;  %v3894_v20 = vld [vmem:[#allocation2] ss:$0 sm:$0xff] }
0x1dfb   :  { %4536 = vmatprep.subr.mxu0 %v4851_v1  ;;  %4544 = vmatprep.mubr.msk.f32.mxu0 %vm4852_vm0, %v4851_v1 }
0x1dfc   :  { %4537 = vmatpush3.msra.mxu0 %v5468_v26  ;;  %4548 = vmatpush3.msra.mxu1 %v5600_v31 }
0x1dfd   :  { %4538 = vmatprep.subr.mxu0 %v4851_v1  ;;  %4549 = vmatprep.subr.mxu1 %v4851_v1 }
0x1dfe   :  { %4539 = vmatpush3.msra.mxu0 %v5605_v34  ;;  %4550 = vmatpush3.msra.mxu1 %v5608_v0 }
0x1dff   :  { %4540 = vmatprep.subr.mxu0 %v4851_v1  ;;  %4551 = vmatprep.subr.mxu1 %v4851_v1 }
0x1e00   :  { %4541 = vmatpush3.msra.mxu0 %v5613_v43  ;;  %4552 = vmatpush3.msra.mxu1 %v5616_v5 }
0x1e01   :  { %4542 = vmatprep.subr.mxu0 %v4851_v1  ;;  %4553 = vmatprep.subr.mxu1 %v4851_v1 }
0x1e02   :  { %4543 = vmatpush3.msra.mxu0 %v5621_v23  ;;  %4554 = vmatpush3.msra.mxu1 %v5624_v45 }
0x1e03   :  { %4555 = vmatprep.mubr.msk.f32.mxu1 %vm4852_vm0, %v4851_v1 }
0x1eb2   :  { %v3318_v58 = vpop.f32.mrf.mxu0 }
0x1eb3   :  { %v3319_v51 = vadd.f32 %v3318_v58, %v5755_v4 }
0x1eb4   :  { %v4502_v9 = vpop.f32.mrf.mxu0 }
0x1eb5   :  { %v3322_v29 = vadd.f32 %v5635_v38, %v3319_v51 }
0x1eb7   :  { %4735 = vtanh.f32 %v3322_v29  ;;  %v3884_v1 = vmul.f32 -1.442695, %v3322_v29 }
0x1eba   :  { %v3508_v26 = vpop.f32.mrf.mxu0  ;;  %v3583_v31 = vpop.f32.mrf.mxu1 }
0x1ebb   :  { %v3584_v34 = vadd.f32 %v3583_v31, %v3508_v26 }
0x1ebc   :  { %v4524_v0 = vpop.f32.mrf.mxu0  ;;  %v4535_v43 = vpop.f32.mrf.mxu1 }
0x1ebd   :  { %v3587_v5 = vadd.f32 %v5560_v36, %v3584_v34 }
0x1ebf   :  { %4737 = vtanh.f32 %v3587_v5  ;;  %v3889_v53 = vmul.f32 -1.442695, %v3587_v5 }
0x1ec0   :  { %4739 = vpow2.f32 %v3884_v1 }
0x1ec1   :  { %4741 = vpow2.f32 %v3889_v53 }
0x1ec4   :  { %v4736_v23 = vpop.eup %4735 }
0x1ec5   :  { %3332 = vrot.lane.b32.xlu0 %v4736_v23, %s4853_s14 }
0x1ecc   :  { %v4738_v45 = vpop.eup %4737 }
0x1ecd   :  { %3597 = vrot.lane.b32.xlu1 %v4738_v45, %s4853_s14  ;;  %v4740_v22 = vpop.eup %4739 }
0x1ece   :  { %v3326_v21 = vadd.f32 1.0, %v4740_v22  ;;  %v4742_v25 = vpop.eup %4741 }
0x1ecf   :  { %v3591_v16 = vadd.f32 1.0, %v4742_v25 }
0x1ed0   :  { %4743 = vrcp.f32 %v3326_v21 }
0x1ed1   :  { %4745 = vrcp.f32 %v3591_v16 }
0x1edd   :  { %v4744_v19 = vpop.eup %4743 }
0x1ede   :  { %v4746_v10 = vpop.eup %4745  ;;  %v3330_v59 = vmul.f32 %v4744_v19, %v5714_v24 }
0x1edf   :  { %v3595_v4 = vmul.f32 %v4746_v10, %v5765_v55  ;;  %v3893_v55 = vld [vmem:[%s5842_s10] ss:$0 sm:$0xff] }
0x1f37   :  { %v3333_v46 = vpop.permute.xlu0 %3332 }
0x1f38   :  { %v3335_v36 = vmul.f32 %v4744_v19, %v3333_v46 }
0x1f3a   :  { %3337 = vrot.lane.b32.xlu0 %v3335_v36, %s4853_s14 }
0x1f3f   :  { %v3598_v49 = vpop.permute.xlu1 %3597 }
0x1f40   :  { %v3600_v48 = vmul.f32 %v4746_v10, %v3598_v49 }
0x1f42   :  { %3602 = vrot.lane.b32.xlu1 %v3600_v48, %s4853_s14 }
0x1fac   :  { %v3338_v61 = vpop.permute.xlu0 %3337 }
0x1fad   :  { %v3340_v62 = vadd.f32 %v3338_v61, %v3330_v59 }
0x1faf   :  { %4747 = vtanh.f32 %v3340_v62 }
0x1fb4   :  { %v3603_v11 = vpop.permute.xlu1 %3602 }
0x1fb5   :  { %v3605_v37 = vadd.f32 %v3603_v11, %v3595_v4 }
0x1fb7   :  { %4749 = vtanh.f32 %v3605_v37 }
0x1fbc   :  { %v4748_v2 = vpop.eup %4747 }
0x1fbd   :  { %3343 = vrot.lane.b32.xlu0 %v4748_v2, %s4853_s14 }
0x1fc4   :  { %v4750_v39 = vpop.eup %4749 }
0x1fc5   :  { %3608 = vrot.lane.b32.xlu1 %v4750_v39, %s4853_s14 }
0x202f   :  { %v3344_v27 = vpop.permute.xlu0 %3343 }
0x2030   :  { %v3346_v30 = vmul.f32 %v4744_v19, %v3344_v27 }
0x2032   :  { %3613 = vrot.lane.b32.xlu0 %v3346_v30, %s4854_s0 }
0x2037   :  { %v3609_v41 = vpop.permute.xlu1 %3608 }
0x2038   :  { %v3611_v24 = vmul.f32 %v4746_v10, %v3609_v41 }
0x203a   :  { %3688 = vrot.lane.b32.xlu1 %v3611_v24, %s4854_s0 }
0x20a4   :  { %v3614_v40 = vpop.permute.xlu0 %3613 }
0x20a5   :  { %4545 = vmatmul.mubr.msk.f32.vlgmr.msra.gmra.mxu0 %vm238_vm3, %v3614_v40 }
0x20ac   :  { %v3689_v33 = vpop.permute.xlu1 %3688 }
0x20ad   :  { %4556 = vmatmul.mubr.msk.f32.vlgmr.msra.gmra.mxu1 %vm238_vm3, %v3689_v33 }
0x2165   :  { %v3683_v35 = vpop.f32.mrf.mxu0 }
0x2167   :  { %v4546_v12 = vpop.f32.mrf.mxu0 }
0x216d   :  { %v3758_v13 = vpop.f32.mrf.mxu1 }
0x216e   :  { %v3759_v50 = vadd.f32 %v3758_v13, %v3683_v35 }
0x216f   :  { %v4557_v42 = vpop.f32.mrf.mxu1 }
0x2170   :  { %v3762_v56 = vadd.f32 %v5635_v38, %v3759_v50 }
0x2172   :  { %4751 = vtanh.f32 %v3762_v56  ;;  %v3892_v47 = vmul.f32 -1.442695, %v3762_v56 }
0x2174   :  { %4753 = vpow2.f32 %v3892_v47 }
0x217f   :  { %v4752_v44 = vpop.eup %4751 }
0x2180   :  { %3772 = vrot.lane.b32.xlu0 %v4752_v44, %s4853_s14 }
0x2181   :  { %v4754_v14 = vpop.eup %4753 }
0x2182   :  { %v3766_v57 = vadd.f32 1.0, %v4754_v14 }
0x2184   :  { %4755 = vrcp.f32 %v3766_v57 }
0x2191   :  { %v4756_v3 = vpop.eup %4755 }
0x2192   :  { %v3770_v38 = vmul.f32 %v4756_v3, %v3340_v62 }
0x21f2   :  { %v3773_v6 = vpop.permute.xlu0 %3772 }
0x21f3   :  { %v3775_v54 = vmul.f32 %v4756_v3, %v3773_v6 }
0x21f5   :  { %3777 = vrot.lane.b32.xlu1 %v3775_v54, %s4853_s14 }
0x21f9   :  { %3793 = vrot.lane.b32.xlu1 %v3893_v55, %s4854_s0 }
0x2267   :  { %v3778_v7 = vpop.permute.xlu1 %3777 }
0x2268   :  { %v3780_v28 = vadd.f32 %v3778_v7, %v3770_v38 }
0x226a   :  { %4757 = vtanh.f32 %v3780_v28 }
0x226b   :  { %v3794_v32 = vpop.permute.xlu1 %3793 }
0x2277   :  { %v4758_v8 = vpop.eup %4757 }
0x2278   :  { %3783 = vrot.lane.b32.xlu0 %v4758_v8, %s4853_s14 }
0x22ea   :  { %v3784_v15 = vpop.permute.xlu0 %3783 }
0x22eb   :  { %v3786_v63 = vmul.f32 %v4756_v3, %v3784_v15 }
0x22ed   :  { %v3796_v17 = vmul.f32 %v3794_v32, %v3786_v63 }
0x22ef   :  { %3798 = vrot.lane.b32.xlu0 %v3796_v17, %s4854_s0 }
0x2361   :  { %v3799_v18 = vpop.permute.xlu0 %3798 }
0x2362   :  { %v3801_v60 = vsel %vm238_vm3, %v3799_v18, 0.0 }
0x2363   :  { %3802 = vadd.xlane.f32.xlu1 %v3801_v60 }
0x23ec   :  { %v3803_v52 = vpop.xlane.xlu1 %3802 }
0x23ed   :  { %v3811_v58 = vadd.f32 %v3894_v20, %v3803_v52 }
0x23ef   :  { %3813 = vst.msk [vmem:[%s5844_s12] sm:$0xff] %vm3812_vm4, %v3811_v58 }
0x23f0   :  { %3818 = vsyncpa [#allocation4], 1 }
0x23f1   :  { %3819 = vsyncpa [#allocation6], 1 }

</bundles_post_ra>
